<compile_context>
chip_gen: v5e
topology: v5e:2x2
jax: 0.10.0
libtpu: 0.0.40
codegen_flags: <defaults>
</compile_context>

<pallas_src>
import jax
import jax.numpy as jnp
from jax.experimental import pallas as pl
from jax.experimental.pallas import tpu as pltpu

EPS = 1e-5


def _make_kernel(has_short, B, Cin, Cmid, Cout, Cpx, Cpy, H, W):
    Hp, Wp = H + 2, W + 2
    L = Hp * Wp                    # flattened padded image length (per image)
    BL = B * L                     # batch-block slab length
    M = Wp + 1                     # margin so every shifted tap slice is in-bounds
    Lbuf = BL + 2 * M
    taps = [(dh, dw) for dh in range(3) for dw in range(3)]

    def kernel(*refs):
        if has_short:
            (x_ref, mask_ref, w1_ref, b1_ref, w2_ref, b2_ref,
             ws_ref, bs_ref, o_ref, xbuf, ybuf) = refs
        else:
            (x_ref, mask_ref, w1_ref, b1_ref, w2_ref, b2_ref,
             o_ref, xbuf, ybuf) = refs
            ws_ref = bs_ref = None

        # ---- scratch init ---------------------------------------------------
        # xbuf must have zero margins / pad rings / pad channels every step.
        xbuf[...] = jnp.zeros((Cpx, Lbuf), jnp.float32)
        # ybuf: only the margins (and padded channel rows) need zeroing — the
        # slab itself is fully overwritten by the masked conv1 output below.
        ybuf[:, 0:M] = jnp.zeros((Cpy, M), jnp.float32)
        ybuf[:, M + BL:M + BL + M] = jnp.zeros((Cpy, M), jnp.float32)
        if Cpy > Cmid:
            ybuf[Cmid:Cpy, 0:Lbuf] = jnp.zeros((Cpy - Cmid, Lbuf), jnp.float32)

        # ---- stage the batch block into zero-bordered flat slabs -------------
        # (conv "padding=1" zeros are folded into the kernel; wrapper pads nothing)
        for b in range(B):
            base = M + b * L
            for h in range(H):
                dst = base + (h + 1) * Wp + 1
                xbuf[:Cin, dst:dst + W] = x_ref[b, :, h, :]

        # ---- conv1 + BN + ReLU: 9 accumulated MXU dots (no im2col buffer) ----
        acc = None
        for t, (dh, dw) in enumerate(taps):
            s = M + (dh - 1) * Wp + (dw - 1)
            part = jnp.dot(w1_ref[t], xbuf[:, s:s + BL],
                           preferred_element_type=jnp.float32)
            acc = part if acc is None else acc + part
        # ReLU, then zero the pad-ring positions so conv2 sees correct padding.
        y1 = jnp.maximum(acc + b1_ref[...], 0.0) * mask_ref[...]

        # ---- stage conv1 output slab (ring already zero via the mask) --------
        ybuf[:Cmid, M:M + BL] = y1

        # ---- conv2 + BN: 9 accumulated MXU dots ------------------------------
        acc2 = None
        for t, (dh, dw) in enumerate(taps):
            s = M + (dh - 1) * Wp + (dw - 1)
            part = jnp.dot(w2_ref[t], ybuf[:, s:s + BL],
                           preferred_element_type=jnp.float32)
            acc2 = part if acc2 is None else acc2 + part
        y2 = acc2 + b2_ref[...]

        # ---- shortcut: 1x1 conv + BN (projection) or identity (static) -------
        if has_short:
            sc = jnp.dot(ws_ref[...], xbuf[:, M:M + BL],
                         preferred_element_type=jnp.float32) + bs_ref[...]
        else:
            sc = xbuf[:Cout, M:M + BL]

        out_full = jnp.maximum(y2 + sc, 0.0)        # (Cout, BL), ring lanes unused

        # ---- un-padded interior writeback straight to the output block -------
        for b in range(B):
            for h in range(H):
                src = b * L + (h + 1) * Wp + 1
                o_ref[b, :, h, :] = out_full[:, src:src + W]

    return kernel


def _fold_bn(bn, conv_bias):
    scale = bn['gamma'] / jnp.sqrt(bn['var'] + EPS)
    shift = bn['beta'] + (conv_bias - bn['mean']) * scale
    return scale.astype(jnp.float32), shift.astype(jnp.float32)


def _conv3x3_wmat(w, scale, cp_in):
    """(3,3,cin,cout) conv weight with folded BN scale -> (9, cout, cp_in)."""
    kh, kw, cin, cout = w.shape
    w = (w * scale[None, None, None, :]).astype(jnp.float32)
    w = jnp.transpose(w.reshape(kh * kw, cin, cout), (0, 2, 1))     # (9, cout, cin)
    return jnp.pad(w, ((0, 0), (0, 0), (0, cp_in - cin)))


def _conv1x1_wmat(w, scale, cp_in):
    cin, cout = w.shape[2], w.shape[3]
    wm = (w[0, 0] * scale[None, :]).astype(jnp.float32)             # (cin, cout)
    return jnp.pad(wm.T, ((0, 0), (0, cp_in - cin)))                # (cout, cp_in)


def residual_basic_block(x_nchw, params, batch_block=1):
    N, Cin, H, W = x_nchw.shape
    Cmid = params['w1'].shape[-1]
    Cout = params['w2'].shape[-1]
    has_short = params['has_short']
    B = batch_block
    assert N % B == 0, "batch_block must divide N"

    Hp, Wp = H + 2, W + 2
    L, M = Hp * Wp, Wp + 1
    BL = B * L
    Lbuf = BL + 2 * M
    Cpx = -(-Cin // 8) * 8            # input channels rounded to a sublane tile
    Cpy = -(-Cmid // 8) * 8           # mid channels rounded to a sublane tile

    x = x_nchw.astype(jnp.float32)
    mask = jnp.tile(
        jnp.pad(jnp.ones((H, W), jnp.float32), ((1, 1), (1, 1))).reshape(1, L),
        (1, B))                                                      # (1, BL)

    s1, b1 = _fold_bn(params['bn1'], params['b1'])
    s2, b2 = _fold_bn(params['bn2'], params['b2'])
    w1t = _conv3x3_wmat(params['w1'], s1, Cpx)                       # (9, Cmid, Cpx)
    w2t = _conv3x3_wmat(params['w2'], s2, Cpy)                       # (9, Cout, Cpy)

    args = [x, mask, w1t, b1.reshape(Cmid, 1), w2t, b2.reshape(Cout, 1)]
    in_specs = [
        pl.BlockSpec((B, Cin, H, W), lambda n: (n, 0, 0, 0)),
        pl.BlockSpec((1, BL), lambda n: (0, 0)),
        pl.BlockSpec((9, Cmid, Cpx), lambda n: (0, 0, 0)),
        pl.BlockSpec((Cmid, 1), lambda n: (0, 0)),
        pl.BlockSpec((9, Cout, Cpy), lambda n: (0, 0, 0)),
        pl.BlockSpec((Cout, 1), lambda n: (0, 0)),
    ]
    if has_short:
        ss, bs = _fold_bn(params['bns'], params['bs'])
        args += [_conv1x1_wmat(params['ws'], ss, Cpx), bs.reshape(Cout, 1)]
        in_specs += [pl.BlockSpec((Cout, Cpx), lambda n: (0, 0)),
                     pl.BlockSpec((Cout, 1), lambda n: (0, 0))]

    kernel = _make_kernel(has_short, B, Cin, Cmid, Cout, Cpx, Cpy, H, W)

    return pl.pallas_call(
        kernel,
        out_shape=jax.ShapeDtypeStruct((N, Cout, H, W), jnp.float32),
        grid=(N // B,),
        in_specs=in_specs,
        out_specs=pl.BlockSpec((B, Cout, H, W), lambda n: (n, 0, 0, 0)),
        scratch_shapes=[pltpu.VMEM((Cpx, Lbuf), jnp.float32),    # padded input slab
                        pltpu.VMEM((Cpy, Lbuf), jnp.float32)],   # padded conv1 output
        compiler_params=pltpu.CompilerParams(
            dimension_semantics=("parallel",)),
    )(*args)


def make_params(key, cin, cout):
    ks = jax.random.split(key, 9)

    def bn_params(k):
        k1, k2, k3, k4 = jax.random.split(k, 4)
        return dict(gamma=jax.random.uniform(k1, (cout,), minval=0.5, maxval=1.5),
                    beta=0.1 * jax.random.normal(k2, (cout,)),
                    mean=0.1 * jax.random.normal(k3, (cout,)),
                    var=jax.random.uniform(k4, (cout,), minval=0.5, maxval=1.5))

    p = dict(
        w1=(1.0 / jnp.sqrt(9.0 * cin)) * jax.random.normal(ks[0], (3, 3, cin, cout), jnp.float32),
        b1=0.1 * jax.random.normal(ks[1], (cout,), jnp.float32),
        bn1=bn_params(ks[2]),
        w2=(1.0 / jnp.sqrt(9.0 * cout)) * jax.random.normal(ks[3], (3, 3, cout, cout), jnp.float32),
        b2=0.1 * jax.random.normal(ks[4], (cout,), jnp.float32),
        bn2=bn_params(ks[5]),
        has_short=(cin != cout),
    )
    if p['has_short']:
        p['ws'] = (1.0 / jnp.sqrt(float(cin))) * jax.random.normal(ks[6], (1, 1, cin, cout), jnp.float32)
        p['bs'] = 0.1 * jax.random.normal(ks[7], (cout,), jnp.float32)
        p['bns'] = bn_params(ks[8])
    return p


def reference_forward(x_nchw, p):
    """Pure-JAX reference (lax.conv at HIGHEST precision), NCHW in/out, BN eval mode."""
    x = jnp.transpose(x_nchw, (0, 2, 3, 1)).astype(jnp.float32)
    dn = ('NHWC', 'HWIO', 'NHWC')

    def conv(x, w, b, pad):
        y = jax.lax.conv_general_dilated(x, w, (1, 1), [(pad, pad), (pad, pad)],
                                         dimension_numbers=dn,
                                         precision=jax.lax.Precision.HIGHEST)
        return y + b

    def bn(x, bnp):
        return (x - bnp['mean']) / jnp.sqrt(bnp['var'] + EPS) * bnp['gamma'] + bnp['beta']

    y = jax.nn.relu(bn(conv(x, p['w1'], p['b1'], 1), p['bn1']))
    y = bn(conv(y, p['w2'], p['b2'], 1), p['bn2'])
    s = bn(conv(x, p['ws'], p['bs'], 0), p['bns']) if p['has_short'] else x
    out = jax.nn.relu(y + s)
    return jnp.transpose(out, (0, 3, 1, 2))


if __name__ == "__main__":
    key = jax.random.PRNGKey(0)
    k_x, k_x2, k_p, k_p2 = jax.random.split(key, 4)

    N, Cin, Cout, H, W = 2, 4, 8, 16, 16

    # Tolerance: the kernel's matmuls run at default MXU precision (one bf16
    # pass, f32 accumulation) while the reference uses Precision.HIGHEST.
    ATOL = RTOL = 1e-1

    # Case 1: projection shortcut (in_channel != out_channel, stride=1)
    x = jax.random.normal(k_x, (N, Cin, H, W), jnp.float32)
    p = make_params(k_p, Cin, Cout)
    out = residual_basic_block(x, p, batch_block=1)
    jax.block_until_ready(out)
    ref = reference_forward(x, p)
    assert out.shape == (N, Cout, H, W)
    assert jnp.allclose(out, ref, atol=ATOL, rtol=RTOL), float(jnp.max(jnp.abs(out - ref)))

    # Case 2: identity shortcut (in_channel == out_channel, stride=1)
    x2 = jax.random.normal(k_x2, (N, Cout, H, W), jnp.float32)
    p2 = make_params(k_p2, Cout, Cout)
    out2 = residual_basic_block(x2, p2, batch_block=1)
    jax.block_until_ready(out2)
    ref2 = reference_forward(x2, p2)
    assert jnp.allclose(out2, ref2, atol=ATOL, rtol=RTOL), float(jnp.max(jnp.abs(out2 - ref2)))

    print("KERNEL_OK")
</pallas_src>

<mosaic_0001>
module attributes {stable_mosaic.version = 11 : i64} {
  func.func @kernel(%arg0: i32, %arg1: memref<1x4x16x16xf32, #tpu.memory_space<vmem>>, %arg2: memref<1x324xf32, #tpu.memory_space<vmem>>, %arg3: memref<9x8x8xf32, #tpu.memory_space<vmem>>, %arg4: memref<8x1xf32, #tpu.memory_space<vmem>>, %arg5: memref<9x8x8xf32, #tpu.memory_space<vmem>>, %arg6: memref<8x1xf32, #tpu.memory_space<vmem>>, %arg7: memref<8x8xf32, #tpu.memory_space<vmem>>, %arg8: memref<8x1xf32, #tpu.memory_space<vmem>>, %arg9: memref<1x8x16x16xf32, #tpu.memory_space<vmem>>, %arg10: memref<8x362xf32, #tpu.memory_space<vmem>>, %arg11: memref<8x362xf32, #tpu.memory_space<vmem>>) attributes {dimension_semantics = [#tpu.dimension_semantics<parallel>], iteration_bounds = array<i64: 2>, scalar_prefetch = 0 : i64, scratch_operands = 2 : i64, tpu.core_type = #tpu.core_type<tc>, window_params = [{transform_indices = @transform_0, window_bounds = array<i64: 1, 4, 16, 16>}, {pipeline_mode = #tpu.pipeline_mode<synchronous>, transform_indices = @transform_1, window_bounds = array<i64: 1, 324>}, {pipeline_mode = #tpu.pipeline_mode<synchronous>, transform_indices = @transform_2, window_bounds = array<i64: 9, 8, 8>}, {pipeline_mode = #tpu.pipeline_mode<synchronous>, transform_indices = @transform_3, window_bounds = array<i64: 8, 1>}, {pipeline_mode = #tpu.pipeline_mode<synchronous>, transform_indices = @transform_4, window_bounds = array<i64: 9, 8, 8>}, {pipeline_mode = #tpu.pipeline_mode<synchronous>, transform_indices = @transform_5, window_bounds = array<i64: 8, 1>}, {pipeline_mode = #tpu.pipeline_mode<synchronous>, transform_indices = @transform_6, window_bounds = array<i64: 8, 8>}, {pipeline_mode = #tpu.pipeline_mode<synchronous>, transform_indices = @transform_7, window_bounds = array<i64: 8, 1>}, {transform_indices = @transform_8, window_bounds = array<i64: 1, 8, 16, 16>}]} {
    %cst = arith.constant 0.000000e+00 : f32
    %0 = vector.broadcast %cst : f32 to vector<8x362xf32>
    %c0 = arith.constant 0 : index
    %c0_0 = arith.constant 0 : index
    %1 = vector.load %arg10[%c0, %c0_0] : memref<8x362xf32, #tpu.memory_space<vmem>>, vector<8x362xf32>
    tpu.vector_store %arg10[%c0, %c0_0], %0 {strides = array<i32>} : memref<8x362xf32, #tpu.memory_space<vmem>>, vector<8x362xf32>,
    %cst_1 = arith.constant 0.000000e+00 : f32
    %2 = vector.broadcast %cst_1 : f32 to vector<8x19xf32>
    %c0_2 = arith.constant 0 : index
    %c0_3 = arith.constant 0 : index
    %3 = vector.load %arg11[%c0_2, %c0_3] : memref<8x362xf32, #tpu.memory_space<vmem>>, vector<8x19xf32>
    tpu.vector_store %arg11[%c0_2, %c0_3], %2 {strides = array<i32>} : memref<8x362xf32, #tpu.memory_space<vmem>>, vector<8x19xf32>,
    %cst_4 = arith.constant 0.000000e+00 : f32
    %4 = vector.broadcast %cst_4 : f32 to vector<8x19xf32>
    %c0_5 = arith.constant 0 : index
    %c343 = arith.constant 343 : index
    %5 = vector.load %arg11[%c0_5, %c343] : memref<8x362xf32, #tpu.memory_space<vmem>>, vector<8x19xf32>
    tpu.vector_store %arg11[%c0_5, %c343], %4 {strides = array<i32>} : memref<8x362xf32, #tpu.memory_space<vmem>>, vector<8x19xf32>,
    %c0_6 = arith.constant 0 : index
    %c0_7 = arith.constant 0 : index
    %c0_8 = arith.constant 0 : index
    %c0_9 = arith.constant 0 : index
    %6 = vector.load %arg1[%c0_6, %c0_7, %c0_8, %c0_9] : memref<1x4x16x16xf32, #tpu.memory_space<vmem>>, vector<1x4x1x16xf32>
    %7 = vector.shape_cast %6 : vector<1x4x1x16xf32> to vector<4x16xf32>
    %c0_10 = arith.constant 0 : index
    %c38 = arith.constant 38 : index
    %8 = vector.load %arg10[%c0_10, %c38] : memref<8x362xf32, #tpu.memory_space<vmem>>, vector<4x16xf32>
    tpu.vector_store %arg10[%c0_10, %c38], %7 {strides = array<i32>} : memref<8x362xf32, #tpu.memory_space<vmem>>, vector<4x16xf32>,
    %c0_11 = arith.constant 0 : index
    %c0_12 = arith.constant 0 : index
    %c1 = arith.constant 1 : index
    %c0_13 = arith.constant 0 : index
    %9 = vector.load %arg1[%c0_11, %c0_12, %c1, %c0_13] : memref<1x4x16x16xf32, #tpu.memory_space<vmem>>, vector<1x4x1x16xf32>
    %10 = vector.shape_cast %9 : vector<1x4x1x16xf32> to vector<4x16xf32>
    %c0_14 = arith.constant 0 : index
    %c56 = arith.constant 56 : index
    %11 = vector.load %arg10[%c0_14, %c56] : memref<8x362xf32, #tpu.memory_space<vmem>>, vector<4x16xf32>
    tpu.vector_store %arg10[%c0_14, %c56], %10 {strides = array<i32>} : memref<8x362xf32, #tpu.memory_space<vmem>>, vector<4x16xf32>,
    %c0_15 = arith.constant 0 : index
    %c0_16 = arith.constant 0 : index
    %c2 = arith.constant 2 : index
    %c0_17 = arith.constant 0 : index
    %12 = vector.load %arg1[%c0_15, %c0_16, %c2, %c0_17] : memref<1x4x16x16xf32, #tpu.memory_space<vmem>>, vector<1x4x1x16xf32>
    %13 = vector.shape_cast %12 : vector<1x4x1x16xf32> to vector<4x16xf32>
    %c0_18 = arith.constant 0 : index
    %c74 = arith.constant 74 : index
    %14 = vector.load %arg10[%c0_18, %c74] : memref<8x362xf32, #tpu.memory_space<vmem>>, vector<4x16xf32>
    tpu.vector_store %arg10[%c0_18, %c74], %13 {strides = array<i32>} : memref<8x362xf32, #tpu.memory_space<vmem>>, vector<4x16xf32>,
    %c0_19 = arith.constant 0 : index
    %c0_20 = arith.constant 0 : index
    %c3 = arith.constant 3 : index
    %c0_21 = arith.constant 0 : index
    %15 = vector.load %arg1[%c0_19, %c0_20, %c3, %c0_21] : memref<1x4x16x16xf32, #tpu.memory_space<vmem>>, vector<1x4x1x16xf32>
    %16 = vector.shape_cast %15 : vector<1x4x1x16xf32> to vector<4x16xf32>
    %c0_22 = arith.constant 0 : index
    %c92 = arith.constant 92 : index
    %17 = vector.load %arg10[%c0_22, %c92] : memref<8x362xf32, #tpu.memory_space<vmem>>, vector<4x16xf32>
    tpu.vector_store %arg10[%c0_22, %c92], %16 {strides = array<i32>} : memref<8x362xf32, #tpu.memory_space<vmem>>, vector<4x16xf32>,
    %c0_23 = arith.constant 0 : index
    %c0_24 = arith.constant 0 : index
    %c4 = arith.constant 4 : index
    %c0_25 = arith.constant 0 : index
    %18 = vector.load %arg1[%c0_23, %c0_24, %c4, %c0_25] : memref<1x4x16x16xf32, #tpu.memory_space<vmem>>, vector<1x4x1x16xf32>
    %19 = vector.shape_cast %18 : vector<1x4x1x16xf32> to vector<4x16xf32>
    %c0_26 = arith.constant 0 : index
    %c110 = arith.constant 110 : index
    %20 = vector.load %arg10[%c0_26, %c110] : memref<8x362xf32, #tpu.memory_space<vmem>>, vector<4x16xf32>
    tpu.vector_store %arg10[%c0_26, %c110], %19 {strides = array<i32>} : memref<8x362xf32, #tpu.memory_space<vmem>>, vector<4x16xf32>,
    %c0_27 = arith.constant 0 : index
    %c0_28 = arith.constant 0 : index
    %c5 = arith.constant 5 : index
    %c0_29 = arith.constant 0 : index
    %21 = vector.load %arg1[%c0_27, %c0_28, %c5, %c0_29] : memref<1x4x16x16xf32, #tpu.memory_space<vmem>>, vector<1x4x1x16xf32>
    %22 = vector.shape_cast %21 : vector<1x4x1x16xf32> to vector<4x16xf32>
    %c0_30 = arith.constant 0 : index
    %c128 = arith.constant 128 : index
    %23 = vector.load %arg10[%c0_30, %c128] : memref<8x362xf32, #tpu.memory_space<vmem>>, vector<4x16xf32>
    tpu.vector_store %arg10[%c0_30, %c128], %22 {strides = array<i32>} : memref<8x362xf32, #tpu.memory_space<vmem>>, vector<4x16xf32>,
    %c0_31 = arith.constant 0 : index
    %c0_32 = arith.constant 0 : index
    %c6 = arith.constant 6 : index
    %c0_33 = arith.constant 0 : index
    %24 = vector.load %arg1[%c0_31, %c0_32, %c6, %c0_33] : memref<1x4x16x16xf32, #tpu.memory_space<vmem>>, vector<1x4x1x16xf32>
    %25 = vector.shape_cast %24 : vector<1x4x1x16xf32> to vector<4x16xf32>
    %c0_34 = arith.constant 0 : index
    %c146 = arith.constant 146 : index
    %26 = vector.load %arg10[%c0_34, %c146] : memref<8x362xf32, #tpu.memory_space<vmem>>, vector<4x16xf32>
    tpu.vector_store %arg10[%c0_34, %c146], %25 {strides = array<i32>} : memref<8x362xf32, #tpu.memory_space<vmem>>, vector<4x16xf32>,
    %c0_35 = arith.constant 0 : index
    %c0_36 = arith.constant 0 : index
    %c7 = arith.constant 7 : index
    %c0_37 = arith.constant 0 : index
    %27 = vector.load %arg1[%c0_35, %c0_36, %c7, %c0_37] : memref<1x4x16x16xf32, #tpu.memory_space<vmem>>, vector<1x4x1x16xf32>
    %28 = vector.shape_cast %27 : vector<1x4x1x16xf32> to vector<4x16xf32>
    %c0_38 = arith.constant 0 : index
    %c164 = arith.constant 164 : index
    %29 = vector.load %arg10[%c0_38, %c164] : memref<8x362xf32, #tpu.memory_space<vmem>>, vector<4x16xf32>
    tpu.vector_store %arg10[%c0_38, %c164], %28 {strides = array<i32>} : memref<8x362xf32, #tpu.memory_space<vmem>>, vector<4x16xf32>,
    %c0_39 = arith.constant 0 : index
    %c0_40 = arith.constant 0 : index
    %c8 = arith.constant 8 : index
    %c0_41 = arith.constant 0 : index
    %30 = vector.load %arg1[%c0_39, %c0_40, %c8, %c0_41] : memref<1x4x16x16xf32, #tpu.memory_space<vmem>>, vector<1x4x1x16xf32>
    %31 = vector.shape_cast %30 : vector<1x4x1x16xf32> to vector<4x16xf32>
    %c0_42 = arith.constant 0 : index
    %c182 = arith.constant 182 : index
    %32 = vector.load %arg10[%c0_42, %c182] : memref<8x362xf32, #tpu.memory_space<vmem>>, vector<4x16xf32>
    tpu.vector_store %arg10[%c0_42, %c182], %31 {strides = array<i32>} : memref<8x362xf32, #tpu.memory_space<vmem>>, vector<4x16xf32>,
    %c0_43 = arith.constant 0 : index
    %c0_44 = arith.constant 0 : index
    %c9 = arith.constant 9 : index
    %c0_45 = arith.constant 0 : index
    %33 = vector.load %arg1[%c0_43, %c0_44, %c9, %c0_45] : memref<1x4x16x16xf32, #tpu.memory_space<vmem>>, vector<1x4x1x16xf32>
    %34 = vector.shape_cast %33 : vector<1x4x1x16xf32> to vector<4x16xf32>
    %c0_46 = arith.constant 0 : index
    %c200 = arith.constant 200 : index
    %35 = vector.load %arg10[%c0_46, %c200] : memref<8x362xf32, #tpu.memory_space<vmem>>, vector<4x16xf32>
    tpu.vector_store %arg10[%c0_46, %c200], %34 {strides = array<i32>} : memref<8x362xf32, #tpu.memory_space<vmem>>, vector<4x16xf32>,
    %c0_47 = arith.constant 0 : index
    %c0_48 = arith.constant 0 : index
    %c10 = arith.constant 10 : index
    %c0_49 = arith.constant 0 : index
    %36 = vector.load %arg1[%c0_47, %c0_48, %c10, %c0_49] : memref<1x4x16x16xf32, #tpu.memory_space<vmem>>, vector<1x4x1x16xf32>
    %37 = vector.shape_cast %36 : vector<1x4x1x16xf32> to vector<4x16xf32>
    %c0_50 = arith.constant 0 : index
    %c218 = arith.constant 218 : index
    %38 = vector.load %arg10[%c0_50, %c218] : memref<8x362xf32, #tpu.memory_space<vmem>>, vector<4x16xf32>
    tpu.vector_store %arg10[%c0_50, %c218], %37 {strides = array<i32>} : memref<8x362xf32, #tpu.memory_space<vmem>>, vector<4x16xf32>,
    %c0_51 = arith.constant 0 : index
    %c0_52 = arith.constant 0 : index
    %c11 = arith.constant 11 : index
    %c0_53 = arith.constant 0 : index
    %39 = vector.load %arg1[%c0_51, %c0_52, %c11, %c0_53] : memref<1x4x16x16xf32, #tpu.memory_space<vmem>>, vector<1x4x1x16xf32>
    %40 = vector.shape_cast %39 : vector<1x4x1x16xf32> to vector<4x16xf32>
    %c0_54 = arith.constant 0 : index
    %c236 = arith.constant 236 : index
    %41 = vector.load %arg10[%c0_54, %c236] : memref<8x362xf32, #tpu.memory_space<vmem>>, vector<4x16xf32>
    tpu.vector_store %arg10[%c0_54, %c236], %40 {strides = array<i32>} : memref<8x362xf32, #tpu.memory_space<vmem>>, vector<4x16xf32>,
    %c0_55 = arith.constant 0 : index
    %c0_56 = arith.constant 0 : index
    %c12 = arith.constant 12 : index
    %c0_57 = arith.constant 0 : index
    %42 = vector.load %arg1[%c0_55, %c0_56, %c12, %c0_57] : memref<1x4x16x16xf32, #tpu.memory_space<vmem>>, vector<1x4x1x16xf32>
    %43 = vector.shape_cast %42 : vector<1x4x1x16xf32> to vector<4x16xf32>
    %c0_58 = arith.constant 0 : index
    %c254 = arith.constant 254 : index
    %44 = vector.load %arg10[%c0_58, %c254] : memref<8x362xf32, #tpu.memory_space<vmem>>, vector<4x16xf32>
    tpu.vector_store %arg10[%c0_58, %c254], %43 {strides = array<i32>} : memref<8x362xf32, #tpu.memory_space<vmem>>, vector<4x16xf32>,
    %c0_59 = arith.constant 0 : index
    %c0_60 = arith.constant 0 : index
    %c13 = arith.constant 13 : index
    %c0_61 = arith.constant 0 : index
    %45 = vector.load %arg1[%c0_59, %c0_60, %c13, %c0_61] : memref<1x4x16x16xf32, #tpu.memory_space<vmem>>, vector<1x4x1x16xf32>
    %46 = vector.shape_cast %45 : vector<1x4x1x16xf32> to vector<4x16xf32>
    %c0_62 = arith.constant 0 : index
    %c272 = arith.constant 272 : index
    %47 = vector.load %arg10[%c0_62, %c272] : memref<8x362xf32, #tpu.memory_space<vmem>>, vector<4x16xf32>
    tpu.vector_store %arg10[%c0_62, %c272], %46 {strides = array<i32>} : memref<8x362xf32, #tpu.memory_space<vmem>>, vector<4x16xf32>,
    %c0_63 = arith.constant 0 : index
    %c0_64 = arith.constant 0 : index
    %c14 = arith.constant 14 : index
    %c0_65 = arith.constant 0 : index
    %48 = vector.load %arg1[%c0_63, %c0_64, %c14, %c0_65] : memref<1x4x16x16xf32, #tpu.memory_space<vmem>>, vector<1x4x1x16xf32>
    %49 = vector.shape_cast %48 : vector<1x4x1x16xf32> to vector<4x16xf32>
    %c0_66 = arith.constant 0 : index
    %c290 = arith.constant 290 : index
    %50 = vector.load %arg10[%c0_66, %c290] : memref<8x362xf32, #tpu.memory_space<vmem>>, vector<4x16xf32>
    tpu.vector_store %arg10[%c0_66, %c290], %49 {strides = array<i32>} : memref<8x362xf32, #tpu.memory_space<vmem>>, vector<4x16xf32>,
    %c0_67 = arith.constant 0 : index
    %c0_68 = arith.constant 0 : index
    %c15 = arith.constant 15 : index
    %c0_69 = arith.constant 0 : index
    %51 = vector.load %arg1[%c0_67, %c0_68, %c15, %c0_69] : memref<1x4x16x16xf32, #tpu.memory_space<vmem>>, vector<1x4x1x16xf32>
    %52 = vector.shape_cast %51 : vector<1x4x1x16xf32> to vector<4x16xf32>
    %c0_70 = arith.constant 0 : index
    %c308 = arith.constant 308 : index
    %53 = vector.load %arg10[%c0_70, %c308] : memref<8x362xf32, #tpu.memory_space<vmem>>, vector<4x16xf32>
    tpu.vector_store %arg10[%c0_70, %c308], %52 {strides = array<i32>} : memref<8x362xf32, #tpu.memory_space<vmem>>, vector<4x16xf32>,
    %c0_71 = arith.constant 0 : index
    %c0_72 = arith.constant 0 : index
    %c0_73 = arith.constant 0 : index
    %54 = vector.load %arg3[%c0_71, %c0_72, %c0_73] : memref<9x8x8xf32, #tpu.memory_space<vmem>>, vector<1x8x8xf32>
    %55 = vector.shape_cast %54 : vector<1x8x8xf32> to vector<8x8xf32>
    %c0_74 = arith.constant 0 : index
    %c0_75 = arith.constant 0 : index
    %56 = vector.load %arg10[%c0_74, %c0_75] : memref<8x362xf32, #tpu.memory_space<vmem>>, vector<8x324xf32>
    %cst_76 = arith.constant dense<0.000000e+00> : vector<8x324xf32>
    %57 = tpu.matmul %55, %56, %cst_76 {dimension_numbers = #tpu.dot_dimension_numbers<[1], [0], [0], [1], [0, 0, 1, 1], [], []>} : vector<8x8xf32>, vector<8x324xf32>, vector<8x324xf32> -> vector<8x324xf32>
    %c1_77 = arith.constant 1 : index
    %c0_78 = arith.constant 0 : index
    %c0_79 = arith.constant 0 : index
    %58 = vector.load %arg3[%c1_77, %c0_78, %c0_79] : memref<9x8x8xf32, #tpu.memory_space<vmem>>, vector<1x8x8xf32>
    %59 = vector.shape_cast %58 : vector<1x8x8xf32> to vector<8x8xf32>
    %c0_80 = arith.constant 0 : index
    %c1_81 = arith.constant 1 : index
    %60 = vector.load %arg10[%c0_80, %c1_81] : memref<8x362xf32, #tpu.memory_space<vmem>>, vector<8x324xf32>
    %cst_82 = arith.constant dense<0.000000e+00> : vector<8x324xf32>
    %61 = tpu.matmul %59, %60, %cst_82 {dimension_numbers = #tpu.dot_dimension_numbers<[1], [0], [0], [1], [0, 0, 1, 1], [], []>} : vector<8x8xf32>, vector<8x324xf32>, vector<8x324xf32> -> vector<8x324xf32>
    %62 = arith.addf %57, %61 : vector<8x324xf32>
    %c2_83 = arith.constant 2 : index
    %c0_84 = arith.constant 0 : index
    %c0_85 = arith.constant 0 : index
    %63 = vector.load %arg3[%c2_83, %c0_84, %c0_85] : memref<9x8x8xf32, #tpu.memory_space<vmem>>, vector<1x8x8xf32>
    %64 = vector.shape_cast %63 : vector<1x8x8xf32> to vector<8x8xf32>
    %c0_86 = arith.constant 0 : index
    %c2_87 = arith.constant 2 : index
    %65 = vector.load %arg10[%c0_86, %c2_87] : memref<8x362xf32, #tpu.memory_space<vmem>>, vector<8x324xf32>
    %cst_88 = arith.constant dense<0.000000e+00> : vector<8x324xf32>
    %66 = tpu.matmul %64, %65, %cst_88 {dimension_numbers = #tpu.dot_dimension_numbers<[1], [0], [0], [1], [0, 0, 1, 1], [], []>} : vector<8x8xf32>, vector<8x324xf32>, vector<8x324xf32> -> vector<8x324xf32>
    %67 = arith.addf %62, %66 : vector<8x324xf32>
    %c3_89 = arith.constant 3 : index
    %c0_90 = arith.constant 0 : index
    %c0_91 = arith.constant 0 : index
    %68 = vector.load %arg3[%c3_89, %c0_90, %c0_91] : memref<9x8x8xf32, #tpu.memory_space<vmem>>, vector<1x8x8xf32>
    %69 = vector.shape_cast %68 : vector<1x8x8xf32> to vector<8x8xf32>
    %c0_92 = arith.constant 0 : index
    %c18 = arith.constant 18 : index
    %70 = vector.load %arg10[%c0_92, %c18] : memref<8x362xf32, #tpu.memory_space<vmem>>, vector<8x324xf32>
    %cst_93 = arith.constant dense<0.000000e+00> : vector<8x324xf32>
    %71 = tpu.matmul %69, %70, %cst_93 {dimension_numbers = #tpu.dot_dimension_numbers<[1], [0], [0], [1], [0, 0, 1, 1], [], []>} : vector<8x8xf32>, vector<8x324xf32>, vector<8x324xf32> -> vector<8x324xf32>
    %72 = arith.addf %67, %71 : vector<8x324xf32>
    %c4_94 = arith.constant 4 : index
    %c0_95 = arith.constant 0 : index
    %c0_96 = arith.constant 0 : index
    %73 = vector.load %arg3[%c4_94, %c0_95, %c0_96] : memref<9x8x8xf32, #tpu.memory_space<vmem>>, vector<1x8x8xf32>
    %74 = vector.shape_cast %73 : vector<1x8x8xf32> to vector<8x8xf32>
    %c0_97 = arith.constant 0 : index
    %c19 = arith.constant 19 : index
    %75 = vector.load %arg10[%c0_97, %c19] : memref<8x362xf32, #tpu.memory_space<vmem>>, vector<8x324xf32>
    %cst_98 = arith.constant dense<0.000000e+00> : vector<8x324xf32>
    %76 = tpu.matmul %74, %75, %cst_98 {dimension_numbers = #tpu.dot_dimension_numbers<[1], [0], [0], [1], [0, 0, 1, 1], [], []>} : vector<8x8xf32>, vector<8x324xf32>, vector<8x324xf32> -> vector<8x324xf32>
    %77 = arith.addf %72, %76 : vector<8x324xf32>
    %c5_99 = arith.constant 5 : index
    %c0_100 = arith.constant 0 : index
    %c0_101 = arith.constant 0 : index
    %78 = vector.load %arg3[%c5_99, %c0_100, %c0_101] : memref<9x8x8xf32, #tpu.memory_space<vmem>>, vector<1x8x8xf32>
    %79 = vector.shape_cast %78 : vector<1x8x8xf32> to vector<8x8xf32>
    %c0_102 = arith.constant 0 : index
    %c20 = arith.constant 20 : index
    %80 = vector.load %arg10[%c0_102, %c20] : memref<8x362xf32, #tpu.memory_space<vmem>>, vector<8x324xf32>
    %cst_103 = arith.constant dense<0.000000e+00> : vector<8x324xf32>
    %81 = tpu.matmul %79, %80, %cst_103 {dimension_numbers = #tpu.dot_dimension_numbers<[1], [0], [0], [1], [0, 0, 1, 1], [], []>} : vector<8x8xf32>, vector<8x324xf32>, vector<8x324xf32> -> vector<8x324xf32>
    %82 = arith.addf %77, %81 : vector<8x324xf32>
    %c6_104 = arith.constant 6 : index
    %c0_105 = arith.constant 0 : index
    %c0_106 = arith.constant 0 : index
    %83 = vector.load %arg3[%c6_104, %c0_105, %c0_106] : memref<9x8x8xf32, #tpu.memory_space<vmem>>, vector<1x8x8xf32>
    %84 = vector.shape_cast %83 : vector<1x8x8xf32> to vector<8x8xf32>
    %c0_107 = arith.constant 0 : index
    %c36 = arith.constant 36 : index
    %85 = vector.load %arg10[%c0_107, %c36] : memref<8x362xf32, #tpu.memory_space<vmem>>, vector<8x324xf32>
    %cst_108 = arith.constant dense<0.000000e+00> : vector<8x324xf32>
    %86 = tpu.matmul %84, %85, %cst_108 {dimension_numbers = #tpu.dot_dimension_numbers<[1], [0], [0], [1], [0, 0, 1, 1], [], []>} : vector<8x8xf32>, vector<8x324xf32>, vector<8x324xf32> -> vector<8x324xf32>
    %87 = arith.addf %82, %86 : vector<8x324xf32>
    %c7_109 = arith.constant 7 : index
    %c0_110 = arith.constant 0 : index
    %c0_111 = arith.constant 0 : index
    %88 = vector.load %arg3[%c7_109, %c0_110, %c0_111] : memref<9x8x8xf32, #tpu.memory_space<vmem>>, vector<1x8x8xf32>
    %89 = vector.shape_cast %88 : vector<1x8x8xf32> to vector<8x8xf32>
    %c0_112 = arith.constant 0 : index
    %c37 = arith.constant 37 : index
    %90 = vector.load %arg10[%c0_112, %c37] : memref<8x362xf32, #tpu.memory_space<vmem>>, vector<8x324xf32>
    %cst_113 = arith.constant dense<0.000000e+00> : vector<8x324xf32>
    %91 = tpu.matmul %89, %90, %cst_113 {dimension_numbers = #tpu.dot_dimension_numbers<[1], [0], [0], [1], [0, 0, 1, 1], [], []>} : vector<8x8xf32>, vector<8x324xf32>, vector<8x324xf32> -> vector<8x324xf32>
    %92 = arith.addf %87, %91 : vector<8x324xf32>
    %c8_114 = arith.constant 8 : index
    %c0_115 = arith.constant 0 : index
    %c0_116 = arith.constant 0 : index
    %93 = vector.load %arg3[%c8_114, %c0_115, %c0_116] : memref<9x8x8xf32, #tpu.memory_space<vmem>>, vector<1x8x8xf32>
    %94 = vector.shape_cast %93 : vector<1x8x8xf32> to vector<8x8xf32>
    %c0_117 = arith.constant 0 : index
    %c38_118 = arith.constant 38 : index
    %95 = vector.load %arg10[%c0_117, %c38_118] : memref<8x362xf32, #tpu.memory_space<vmem>>, vector<8x324xf32>
    %cst_119 = arith.constant dense<0.000000e+00> : vector<8x324xf32>
    %96 = tpu.matmul %94, %95, %cst_119 {dimension_numbers = #tpu.dot_dimension_numbers<[1], [0], [0], [1], [0, 0, 1, 1], [], []>} : vector<8x8xf32>, vector<8x324xf32>, vector<8x324xf32> -> vector<8x324xf32>
    %97 = arith.addf %92, %96 : vector<8x324xf32>
    %c0_120 = arith.constant 0 : index
    %c0_121 = arith.constant 0 : index
    %98 = vector.load %arg4[%c0_120, %c0_121] : memref<8x1xf32, #tpu.memory_space<vmem>>, vector<8x1xf32>
    %99 = vector.broadcast %98 : vector<8x1xf32> to vector<8x324xf32>
    %100 = arith.addf %97, %99 : vector<8x324xf32>
    %cst_122 = arith.constant 0.000000e+00 : f32
    %101 = vector.broadcast %cst_122 : f32 to vector<8x324xf32>
    %102 = arith.maximumf %100, %101 : vector<8x324xf32>
    %c0_123 = arith.constant 0 : index
    %c0_124 = arith.constant 0 : index
    %103 = vector.load %arg2[%c0_123, %c0_124] : memref<1x324xf32, #tpu.memory_space<vmem>>, vector<1x324xf32>
    %104 = vector.broadcast %103 : vector<1x324xf32> to vector<8x324xf32>
    %105 = arith.mulf %102, %104 : vector<8x324xf32>
    %c0_125 = arith.constant 0 : index
    %c19_126 = arith.constant 19 : index
    %106 = vector.load %arg11[%c0_125, %c19_126] : memref<8x362xf32, #tpu.memory_space<vmem>>, vector<8x324xf32>
    tpu.vector_store %arg11[%c0_125, %c19_126], %105 {strides = array<i32>} : memref<8x362xf32, #tpu.memory_space<vmem>>, vector<8x324xf32>,
    %c0_127 = arith.constant 0 : index
    %c0_128 = arith.constant 0 : index
    %c0_129 = arith.constant 0 : index
    %107 = vector.load %arg5[%c0_127, %c0_128, %c0_129] : memref<9x8x8xf32, #tpu.memory_space<vmem>>, vector<1x8x8xf32>
    %108 = vector.shape_cast %107 : vector<1x8x8xf32> to vector<8x8xf32>
    %c0_130 = arith.constant 0 : index
    %c0_131 = arith.constant 0 : index
    %109 = vector.load %arg11[%c0_130, %c0_131] : memref<8x362xf32, #tpu.memory_space<vmem>>, vector<8x324xf32>
    %cst_132 = arith.constant dense<0.000000e+00> : vector<8x324xf32>
    %110 = tpu.matmul %108, %109, %cst_132 {dimension_numbers = #tpu.dot_dimension_numbers<[1], [0], [0], [1], [0, 0, 1, 1], [], []>} : vector<8x8xf32>, vector<8x324xf32>, vector<8x324xf32> -> vector<8x324xf32>
    %c1_133 = arith.constant 1 : index
    %c0_134 = arith.constant 0 : index
    %c0_135 = arith.constant 0 : index
    %111 = vector.load %arg5[%c1_133, %c0_134, %c0_135] : memref<9x8x8xf32, #tpu.memory_space<vmem>>, vector<1x8x8xf32>
    %112 = vector.shape_cast %111 : vector<1x8x8xf32> to vector<8x8xf32>
    %c0_136 = arith.constant 0 : index
    %c1_137 = arith.constant 1 : index
    %113 = vector.load %arg11[%c0_136, %c1_137] : memref<8x362xf32, #tpu.memory_space<vmem>>, vector<8x324xf32>
    %cst_138 = arith.constant dense<0.000000e+00> : vector<8x324xf32>
    %114 = tpu.matmul %112, %113, %cst_138 {dimension_numbers = #tpu.dot_dimension_numbers<[1], [0], [0], [1], [0, 0, 1, 1], [], []>} : vector<8x8xf32>, vector<8x324xf32>, vector<8x324xf32> -> vector<8x324xf32>
    %115 = arith.addf %110, %114 : vector<8x324xf32>
    %c2_139 = arith.constant 2 : index
    %c0_140 = arith.constant 0 : index
    %c0_141 = arith.constant 0 : index
    %116 = vector.load %arg5[%c2_139, %c0_140, %c0_141] : memref<9x8x8xf32, #tpu.memory_space<vmem>>, vector<1x8x8xf32>
    %117 = vector.shape_cast %116 : vector<1x8x8xf32> to vector<8x8xf32>
    %c0_142 = arith.constant 0 : index
    %c2_143 = arith.constant 2 : index
    %118 = vector.load %arg11[%c0_142, %c2_143] : memref<8x362xf32, #tpu.memory_space<vmem>>, vector<8x324xf32>
    %cst_144 = arith.constant dense<0.000000e+00> : vector<8x324xf32>
    %119 = tpu.matmul %117, %118, %cst_144 {dimension_numbers = #tpu.dot_dimension_numbers<[1], [0], [0], [1], [0, 0, 1, 1], [], []>} : vector<8x8xf32>, vector<8x324xf32>, vector<8x324xf32> -> vector<8x324xf32>
    %120 = arith.addf %115, %119 : vector<8x324xf32>
    %c3_145 = arith.constant 3 : index
    %c0_146 = arith.constant 0 : index
    %c0_147 = arith.constant 0 : index
    %121 = vector.load %arg5[%c3_145, %c0_146, %c0_147] : memref<9x8x8xf32, #tpu.memory_space<vmem>>, vector<1x8x8xf32>
    %122 = vector.shape_cast %121 : vector<1x8x8xf32> to vector<8x8xf32>
    %c0_148 = arith.constant 0 : index
    %c18_149 = arith.constant 18 : index
    %123 = vector.load %arg11[%c0_148, %c18_149] : memref<8x362xf32, #tpu.memory_space<vmem>>, vector<8x324xf32>
    %cst_150 = arith.constant dense<0.000000e+00> : vector<8x324xf32>
    %124 = tpu.matmul %122, %123, %cst_150 {dimension_numbers = #tpu.dot_dimension_numbers<[1], [0], [0], [1], [0, 0, 1, 1], [], []>} : vector<8x8xf32>, vector<8x324xf32>, vector<8x324xf32> -> vector<8x324xf32>
    %125 = arith.addf %120, %124 : vector<8x324xf32>
    %c4_151 = arith.constant 4 : index
    %c0_152 = arith.constant 0 : index
    %c0_153 = arith.constant 0 : index
    %126 = vector.load %arg5[%c4_151, %c0_152, %c0_153] : memref<9x8x8xf32, #tpu.memory_space<vmem>>, vector<1x8x8xf32>
    %127 = vector.shape_cast %126 : vector<1x8x8xf32> to vector<8x8xf32>
    %c0_154 = arith.constant 0 : index
    %c19_155 = arith.constant 19 : index
    %128 = vector.load %arg11[%c0_154, %c19_155] : memref<8x362xf32, #tpu.memory_space<vmem>>, vector<8x324xf32>
    %cst_156 = arith.constant dense<0.000000e+00> : vector<8x324xf32>
    %129 = tpu.matmul %127, %128, %cst_156 {dimension_numbers = #tpu.dot_dimension_numbers<[1], [0], [0], [1], [0, 0, 1, 1], [], []>} : vector<8x8xf32>, vector<8x324xf32>, vector<8x324xf32> -> vector<8x324xf32>
    %130 = arith.addf %125, %129 : vector<8x324xf32>
    %c5_157 = arith.constant 5 : index
    %c0_158 = arith.constant 0 : index
    %c0_159 = arith.constant 0 : index
    %131 = vector.load %arg5[%c5_157, %c0_158, %c0_159] : memref<9x8x8xf32, #tpu.memory_space<vmem>>, vector<1x8x8xf32>
    %132 = vector.shape_cast %131 : vector<1x8x8xf32> to vector<8x8xf32>
    %c0_160 = arith.constant 0 : index
    %c20_161 = arith.constant 20 : index
    %133 = vector.load %arg11[%c0_160, %c20_161] : memref<8x362xf32, #tpu.memory_space<vmem>>, vector<8x324xf32>
    %cst_162 = arith.constant dense<0.000000e+00> : vector<8x324xf32>
    %134 = tpu.matmul %132, %133, %cst_162 {dimension_numbers = #tpu.dot_dimension_numbers<[1], [0], [0], [1], [0, 0, 1, 1], [], []>} : vector<8x8xf32>, vector<8x324xf32>, vector<8x324xf32> -> vector<8x324xf32>
    %135 = arith.addf %130, %134 : vector<8x324xf32>
    %c6_163 = arith.constant 6 : index
    %c0_164 = arith.constant 0 : index
    %c0_165 = arith.constant 0 : index
    %136 = vector.load %arg5[%c6_163, %c0_164, %c0_165] : memref<9x8x8xf32, #tpu.memory_space<vmem>>, vector<1x8x8xf32>
    %137 = vector.shape_cast %136 : vector<1x8x8xf32> to vector<8x8xf32>
    %c0_166 = arith.constant 0 : index
    %c36_167 = arith.constant 36 : index
    %138 = vector.load %arg11[%c0_166, %c36_167] : memref<8x362xf32, #tpu.memory_space<vmem>>, vector<8x324xf32>
    %cst_168 = arith.constant dense<0.000000e+00> : vector<8x324xf32>
    %139 = tpu.matmul %137, %138, %cst_168 {dimension_numbers = #tpu.dot_dimension_numbers<[1], [0], [0], [1], [0, 0, 1, 1], [], []>} : vector<8x8xf32>, vector<8x324xf32>, vector<8x324xf32> -> vector<8x324xf32>
    %140 = arith.addf %135, %139 : vector<8x324xf32>
    %c7_169 = arith.constant 7 : index
    %c0_170 = arith.constant 0 : index
    %c0_171 = arith.constant 0 : index
    %141 = vector.load %arg5[%c7_169, %c0_170, %c0_171] : memref<9x8x8xf32, #tpu.memory_space<vmem>>, vector<1x8x8xf32>
    %142 = vector.shape_cast %141 : vector<1x8x8xf32> to vector<8x8xf32>
    %c0_172 = arith.constant 0 : index
    %c37_173 = arith.constant 37 : index
    %143 = vector.load %arg11[%c0_172, %c37_173] : memref<8x362xf32, #tpu.memory_space<vmem>>, vector<8x324xf32>
    %cst_174 = arith.constant dense<0.000000e+00> : vector<8x324xf32>
    %144 = tpu.matmul %142, %143, %cst_174 {dimension_numbers = #tpu.dot_dimension_numbers<[1], [0], [0], [1], [0, 0, 1, 1], [], []>} : vector<8x8xf32>, vector<8x324xf32>, vector<8x324xf32> -> vector<8x324xf32>
    %145 = arith.addf %140, %144 : vector<8x324xf32>
    %c8_175 = arith.constant 8 : index
    %c0_176 = arith.constant 0 : index
    %c0_177 = arith.constant 0 : index
    %146 = vector.load %arg5[%c8_175, %c0_176, %c0_177] : memref<9x8x8xf32, #tpu.memory_space<vmem>>, vector<1x8x8xf32>
    %147 = vector.shape_cast %146 : vector<1x8x8xf32> to vector<8x8xf32>
    %c0_178 = arith.constant 0 : index
    %c38_179 = arith.constant 38 : index
    %148 = vector.load %arg11[%c0_178, %c38_179] : memref<8x362xf32, #tpu.memory_space<vmem>>, vector<8x324xf32>
    %cst_180 = arith.constant dense<0.000000e+00> : vector<8x324xf32>
    %149 = tpu.matmul %147, %148, %cst_180 {dimension_numbers = #tpu.dot_dimension_numbers<[1], [0], [0], [1], [0, 0, 1, 1], [], []>} : vector<8x8xf32>, vector<8x324xf32>, vector<8x324xf32> -> vector<8x324xf32>
    %150 = arith.addf %145, %149 : vector<8x324xf32>
    %c0_181 = arith.constant 0 : index
    %c0_182 = arith.constant 0 : index
    %151 = vector.load %arg6[%c0_181, %c0_182] : memref<8x1xf32, #tpu.memory_space<vmem>>, vector<8x1xf32>
    %152 = vector.broadcast %151 : vector<8x1xf32> to vector<8x324xf32>
    %153 = arith.addf %150, %152 : vector<8x324xf32>
    %c0_183 = arith.constant 0 : index
    %c0_184 = arith.constant 0 : index
    %154 = vector.load %arg7[%c0_183, %c0_184] : memref<8x8xf32, #tpu.memory_space<vmem>>, vector<8x8xf32>
    %c0_185 = arith.constant 0 : index
    %c19_186 = arith.constant 19 : index
    %155 = vector.load %arg10[%c0_185, %c19_186] : memref<8x362xf32, #tpu.memory_space<vmem>>, vector<8x324xf32>
    %cst_187 = arith.constant dense<0.000000e+00> : vector<8x324xf32>
    %156 = tpu.matmul %154, %155, %cst_187 {dimension_numbers = #tpu.dot_dimension_numbers<[1], [0], [0], [1], [0, 0, 1, 1], [], []>} : vector<8x8xf32>, vector<8x324xf32>, vector<8x324xf32> -> vector<8x324xf32>
    %c0_188 = arith.constant 0 : index
    %c0_189 = arith.constant 0 : index
    %157 = vector.load %arg8[%c0_188, %c0_189] : memref<8x1xf32, #tpu.memory_space<vmem>>, vector<8x1xf32>
    %158 = vector.broadcast %157 : vector<8x1xf32> to vector<8x324xf32>
    %159 = arith.addf %156, %158 : vector<8x324xf32>
    %160 = arith.addf %153, %159 : vector<8x324xf32>
    %cst_190 = arith.constant 0.000000e+00 : f32
    %161 = vector.broadcast %cst_190 : f32 to vector<8x324xf32>
    %162 = arith.maximumf %160, %161 : vector<8x324xf32>
    %163 = vector.extract_strided_slice %162 {offsets = [0, 19], sizes = [8, 16], strides = [1, 1]} : vector<8x324xf32> to vector<8x16xf32>
    %c0_191 = arith.constant 0 : index
    %c0_192 = arith.constant 0 : index
    %c0_193 = arith.constant 0 : index
    %c0_194 = arith.constant 0 : index
    %164 = vector.load %arg9[%c0_191, %c0_192, %c0_193, %c0_194] : memref<1x8x16x16xf32, #tpu.memory_space<vmem>>, vector<1x8x1x16xf32>
    %165 = vector.shape_cast %164 : vector<1x8x1x16xf32> to vector<8x16xf32>
    %166 = vector.shape_cast %163 : vector<8x16xf32> to vector<1x8x1x16xf32>
    tpu.vector_store %arg9[%c0_191, %c0_192, %c0_193, %c0_194], %166 {strides = array<i32>} : memref<1x8x16x16xf32, #tpu.memory_space<vmem>>, vector<1x8x1x16xf32>,
    %167 = vector.extract_strided_slice %162 {offsets = [0, 37], sizes = [8, 16], strides = [1, 1]} : vector<8x324xf32> to vector<8x16xf32>
    %c0_195 = arith.constant 0 : index
    %c0_196 = arith.constant 0 : index
    %c1_197 = arith.constant 1 : index
    %c0_198 = arith.constant 0 : index
    %168 = vector.load %arg9[%c0_195, %c0_196, %c1_197, %c0_198] : memref<1x8x16x16xf32, #tpu.memory_space<vmem>>, vector<1x8x1x16xf32>
    %169 = vector.shape_cast %168 : vector<1x8x1x16xf32> to vector<8x16xf32>
    %170 = vector.shape_cast %167 : vector<8x16xf32> to vector<1x8x1x16xf32>
    tpu.vector_store %arg9[%c0_195, %c0_196, %c1_197, %c0_198], %170 {strides = array<i32>} : memref<1x8x16x16xf32, #tpu.memory_space<vmem>>, vector<1x8x1x16xf32>,
    %171 = vector.extract_strided_slice %162 {offsets = [0, 55], sizes = [8, 16], strides = [1, 1]} : vector<8x324xf32> to vector<8x16xf32>
    %c0_199 = arith.constant 0 : index
    %c0_200 = arith.constant 0 : index
    %c2_201 = arith.constant 2 : index
    %c0_202 = arith.constant 0 : index
    %172 = vector.load %arg9[%c0_199, %c0_200, %c2_201, %c0_202] : memref<1x8x16x16xf32, #tpu.memory_space<vmem>>, vector<1x8x1x16xf32>
    %173 = vector.shape_cast %172 : vector<1x8x1x16xf32> to vector<8x16xf32>
    %174 = vector.shape_cast %171 : vector<8x16xf32> to vector<1x8x1x16xf32>
    tpu.vector_store %arg9[%c0_199, %c0_200, %c2_201, %c0_202], %174 {strides = array<i32>} : memref<1x8x16x16xf32, #tpu.memory_space<vmem>>, vector<1x8x1x16xf32>,
    %175 = vector.extract_strided_slice %162 {offsets = [0, 73], sizes = [8, 16], strides = [1, 1]} : vector<8x324xf32> to vector<8x16xf32>
    %c0_203 = arith.constant 0 : index
    %c0_204 = arith.constant 0 : index
    %c3_205 = arith.constant 3 : index
    %c0_206 = arith.constant 0 : index
    %176 = vector.load %arg9[%c0_203, %c0_204, %c3_205, %c0_206] : memref<1x8x16x16xf32, #tpu.memory_space<vmem>>, vector<1x8x1x16xf32>
    %177 = vector.shape_cast %176 : vector<1x8x1x16xf32> to vector<8x16xf32>
    %178 = vector.shape_cast %175 : vector<8x16xf32> to vector<1x8x1x16xf32>
    tpu.vector_store %arg9[%c0_203, %c0_204, %c3_205, %c0_206], %178 {strides = array<i32>} : memref<1x8x16x16xf32, #tpu.memory_space<vmem>>, vector<1x8x1x16xf32>,
    %179 = vector.extract_strided_slice %162 {offsets = [0, 91], sizes = [8, 16], strides = [1, 1]} : vector<8x324xf32> to vector<8x16xf32>
    %c0_207 = arith.constant 0 : index
    %c0_208 = arith.constant 0 : index
    %c4_209 = arith.constant 4 : index
    %c0_210 = arith.constant 0 : index
    %180 = vector.load %arg9[%c0_207, %c0_208, %c4_209, %c0_210] : memref<1x8x16x16xf32, #tpu.memory_space<vmem>>, vector<1x8x1x16xf32>
    %181 = vector.shape_cast %180 : vector<1x8x1x16xf32> to vector<8x16xf32>
    %182 = vector.shape_cast %179 : vector<8x16xf32> to vector<1x8x1x16xf32>
    tpu.vector_store %arg9[%c0_207, %c0_208, %c4_209, %c0_210], %182 {strides = array<i32>} : memref<1x8x16x16xf32, #tpu.memory_space<vmem>>, vector<1x8x1x16xf32>,
    %183 = vector.extract_strided_slice %162 {offsets = [0, 109], sizes = [8, 16], strides = [1, 1]} : vector<8x324xf32> to vector<8x16xf32>
    %c0_211 = arith.constant 0 : index
    %c0_212 = arith.constant 0 : index
    %c5_213 = arith.constant 5 : index
    %c0_214 = arith.constant 0 : index
    %184 = vector.load %arg9[%c0_211, %c0_212, %c5_213, %c0_214] : memref<1x8x16x16xf32, #tpu.memory_space<vmem>>, vector<1x8x1x16xf32>
    %185 = vector.shape_cast %184 : vector<1x8x1x16xf32> to vector<8x16xf32>
    %186 = vector.shape_cast %183 : vector<8x16xf32> to vector<1x8x1x16xf32>
    tpu.vector_store %arg9[%c0_211, %c0_212, %c5_213, %c0_214], %186 {strides = array<i32>} : memref<1x8x16x16xf32, #tpu.memory_space<vmem>>, vector<1x8x1x16xf32>,
    %187 = vector.extract_strided_slice %162 {offsets = [0, 127], sizes = [8, 16], strides = [1, 1]} : vector<8x324xf32> to vector<8x16xf32>
    %c0_215 = arith.constant 0 : index
    %c0_216 = arith.constant 0 : index
    %c6_217 = arith.constant 6 : index
    %c0_218 = arith.constant 0 : index
    %188 = vector.load %arg9[%c0_215, %c0_216, %c6_217, %c0_218] : memref<1x8x16x16xf32, #tpu.memory_space<vmem>>, vector<1x8x1x16xf32>
    %189 = vector.shape_cast %188 : vector<1x8x1x16xf32> to vector<8x16xf32>
    %190 = vector.shape_cast %187 : vector<8x16xf32> to vector<1x8x1x16xf32>
    tpu.vector_store %arg9[%c0_215, %c0_216, %c6_217, %c0_218], %190 {strides = array<i32>} : memref<1x8x16x16xf32, #tpu.memory_space<vmem>>, vector<1x8x1x16xf32>,
    %191 = vector.extract_strided_slice %162 {offsets = [0, 145], sizes = [8, 16], strides = [1, 1]} : vector<8x324xf32> to vector<8x16xf32>
    %c0_219 = arith.constant 0 : index
    %c0_220 = arith.constant 0 : index
    %c7_221 = arith.constant 7 : index
    %c0_222 = arith.constant 0 : index
    %192 = vector.load %arg9[%c0_219, %c0_220, %c7_221, %c0_222] : memref<1x8x16x16xf32, #tpu.memory_space<vmem>>, vector<1x8x1x16xf32>
    %193 = vector.shape_cast %192 : vector<1x8x1x16xf32> to vector<8x16xf32>
    %194 = vector.shape_cast %191 : vector<8x16xf32> to vector<1x8x1x16xf32>
    tpu.vector_store %arg9[%c0_219, %c0_220, %c7_221, %c0_222], %194 {strides = array<i32>} : memref<1x8x16x16xf32, #tpu.memory_space<vmem>>, vector<1x8x1x16xf32>,
    %195 = vector.extract_strided_slice %162 {offsets = [0, 163], sizes = [8, 16], strides = [1, 1]} : vector<8x324xf32> to vector<8x16xf32>
    %c0_223 = arith.constant 0 : index
    %c0_224 = arith.constant 0 : index
    %c8_225 = arith.constant 8 : index
    %c0_226 = arith.constant 0 : index
    %196 = vector.load %arg9[%c0_223, %c0_224, %c8_225, %c0_226] : memref<1x8x16x16xf32, #tpu.memory_space<vmem>>, vector<1x8x1x16xf32>
    %197 = vector.shape_cast %196 : vector<1x8x1x16xf32> to vector<8x16xf32>
    %198 = vector.shape_cast %195 : vector<8x16xf32> to vector<1x8x1x16xf32>
    tpu.vector_store %arg9[%c0_223, %c0_224, %c8_225, %c0_226], %198 {strides = array<i32>} : memref<1x8x16x16xf32, #tpu.memory_space<vmem>>, vector<1x8x1x16xf32>,
    %199 = vector.extract_strided_slice %162 {offsets = [0, 181], sizes = [8, 16], strides = [1, 1]} : vector<8x324xf32> to vector<8x16xf32>
    %c0_227 = arith.constant 0 : index
    %c0_228 = arith.constant 0 : index
    %c9_229 = arith.constant 9 : index
    %c0_230 = arith.constant 0 : index
    %200 = vector.load %arg9[%c0_227, %c0_228, %c9_229, %c0_230] : memref<1x8x16x16xf32, #tpu.memory_space<vmem>>, vector<1x8x1x16xf32>
    %201 = vector.shape_cast %200 : vector<1x8x1x16xf32> to vector<8x16xf32>
    %202 = vector.shape_cast %199 : vector<8x16xf32> to vector<1x8x1x16xf32>
    tpu.vector_store %arg9[%c0_227, %c0_228, %c9_229, %c0_230], %202 {strides = array<i32>} : memref<1x8x16x16xf32, #tpu.memory_space<vmem>>, vector<1x8x1x16xf32>,
    %203 = vector.extract_strided_slice %162 {offsets = [0, 199], sizes = [8, 16], strides = [1, 1]} : vector<8x324xf32> to vector<8x16xf32>
    %c0_231 = arith.constant 0 : index
    %c0_232 = arith.constant 0 : index
    %c10_233 = arith.constant 10 : index
    %c0_234 = arith.constant 0 : index
    %204 = vector.load %arg9[%c0_231, %c0_232, %c10_233, %c0_234] : memref<1x8x16x16xf32, #tpu.memory_space<vmem>>, vector<1x8x1x16xf32>
    %205 = vector.shape_cast %204 : vector<1x8x1x16xf32> to vector<8x16xf32>
    %206 = vector.shape_cast %203 : vector<8x16xf32> to vector<1x8x1x16xf32>
    tpu.vector_store %arg9[%c0_231, %c0_232, %c10_233, %c0_234], %206 {strides = array<i32>} : memref<1x8x16x16xf32, #tpu.memory_space<vmem>>, vector<1x8x1x16xf32>,
    %207 = vector.extract_strided_slice %162 {offsets = [0, 217], sizes = [8, 16], strides = [1, 1]} : vector<8x324xf32> to vector<8x16xf32>
    %c0_235 = arith.constant 0 : index
    %c0_236 = arith.constant 0 : index
    %c11_237 = arith.constant 11 : index
    %c0_238 = arith.constant 0 : index
    %208 = vector.load %arg9[%c0_235, %c0_236, %c11_237, %c0_238] : memref<1x8x16x16xf32, #tpu.memory_space<vmem>>, vector<1x8x1x16xf32>
    %209 = vector.shape_cast %208 : vector<1x8x1x16xf32> to vector<8x16xf32>
    %210 = vector.shape_cast %207 : vector<8x16xf32> to vector<1x8x1x16xf32>
    tpu.vector_store %arg9[%c0_235, %c0_236, %c11_237, %c0_238], %210 {strides = array<i32>} : memref<1x8x16x16xf32, #tpu.memory_space<vmem>>, vector<1x8x1x16xf32>,
    %211 = vector.extract_strided_slice %162 {offsets = [0, 235], sizes = [8, 16], strides = [1, 1]} : vector<8x324xf32> to vector<8x16xf32>
    %c0_239 = arith.constant 0 : index
    %c0_240 = arith.constant 0 : index
    %c12_241 = arith.constant 12 : index
    %c0_242 = arith.constant 0 : index
    %212 = vector.load %arg9[%c0_239, %c0_240, %c12_241, %c0_242] : memref<1x8x16x16xf32, #tpu.memory_space<vmem>>, vector<1x8x1x16xf32>
    %213 = vector.shape_cast %212 : vector<1x8x1x16xf32> to vector<8x16xf32>
    %214 = vector.shape_cast %211 : vector<8x16xf32> to vector<1x8x1x16xf32>
    tpu.vector_store %arg9[%c0_239, %c0_240, %c12_241, %c0_242], %214 {strides = array<i32>} : memref<1x8x16x16xf32, #tpu.memory_space<vmem>>, vector<1x8x1x16xf32>,
    %215 = vector.extract_strided_slice %162 {offsets = [0, 253], sizes = [8, 16], strides = [1, 1]} : vector<8x324xf32> to vector<8x16xf32>
    %c0_243 = arith.constant 0 : index
    %c0_244 = arith.constant 0 : index
    %c13_245 = arith.constant 13 : index
    %c0_246 = arith.constant 0 : index
    %216 = vector.load %arg9[%c0_243, %c0_244, %c13_245, %c0_246] : memref<1x8x16x16xf32, #tpu.memory_space<vmem>>, vector<1x8x1x16xf32>
    %217 = vector.shape_cast %216 : vector<1x8x1x16xf32> to vector<8x16xf32>
    %218 = vector.shape_cast %215 : vector<8x16xf32> to vector<1x8x1x16xf32>
    tpu.vector_store %arg9[%c0_243, %c0_244, %c13_245, %c0_246], %218 {strides = array<i32>} : memref<1x8x16x16xf32, #tpu.memory_space<vmem>>, vector<1x8x1x16xf32>,
    %219 = vector.extract_strided_slice %162 {offsets = [0, 271], sizes = [8, 16], strides = [1, 1]} : vector<8x324xf32> to vector<8x16xf32>
    %c0_247 = arith.constant 0 : index
    %c0_248 = arith.constant 0 : index
    %c14_249 = arith.constant 14 : index
    %c0_250 = arith.constant 0 : index
    %220 = vector.load %arg9[%c0_247, %c0_248, %c14_249, %c0_250] : memref<1x8x16x16xf32, #tpu.memory_space<vmem>>, vector<1x8x1x16xf32>
    %221 = vector.shape_cast %220 : vector<1x8x1x16xf32> to vector<8x16xf32>
    %222 = vector.shape_cast %219 : vector<8x16xf32> to vector<1x8x1x16xf32>
    tpu.vector_store %arg9[%c0_247, %c0_248, %c14_249, %c0_250], %222 {strides = array<i32>} : memref<1x8x16x16xf32, #tpu.memory_space<vmem>>, vector<1x8x1x16xf32>,
    %223 = vector.extract_strided_slice %162 {offsets = [0, 289], sizes = [8, 16], strides = [1, 1]} : vector<8x324xf32> to vector<8x16xf32>
    %c0_251 = arith.constant 0 : index
    %c0_252 = arith.constant 0 : index
    %c15_253 = arith.constant 15 : index
    %c0_254 = arith.constant 0 : index
    %224 = vector.load %arg9[%c0_251, %c0_252, %c15_253, %c0_254] : memref<1x8x16x16xf32, #tpu.memory_space<vmem>>, vector<1x8x1x16xf32>
    %225 = vector.shape_cast %224 : vector<1x8x1x16xf32> to vector<8x16xf32>
    %226 = vector.shape_cast %223 : vector<8x16xf32> to vector<1x8x1x16xf32>
    tpu.vector_store %arg9[%c0_251, %c0_252, %c15_253, %c0_254], %226 {strides = array<i32>} : memref<1x8x16x16xf32, #tpu.memory_space<vmem>>, vector<1x8x1x16xf32>,
    return
  }
  func.func @transform_0(%arg0: i32) -> (i32, i32, i32, i32) {
    %c0_i32 = arith.constant 0 : i32
    %c0_i32_0 = arith.constant 0 : i32
    %c0_i32_1 = arith.constant 0 : i32
    %c0_i32_2 = arith.constant 0 : i32
    return %arg0, %c0_i32, %c0_i32_0, %c0_i32_1 : i32, i32, i32, i32
  }
  func.func @transform_1(%arg0: i32) -> (i32, i32) {
    %c0_i32 = arith.constant 0 : i32
    %c0_i32_0 = arith.constant 0 : i32
    %c0_i32_1 = arith.constant 0 : i32
    return %c0_i32, %c0_i32_0 : i32, i32
  }
  func.func @transform_2(%arg0: i32) -> (i32, i32, i32) {
    %c0_i32 = arith.constant 0 : i32
    %c0_i32_0 = arith.constant 0 : i32
    %c0_i32_1 = arith.constant 0 : i32
    %c0_i32_2 = arith.constant 0 : i32
    return %c0_i32, %c0_i32_0, %c0_i32_1 : i32, i32, i32
  }
  func.func @transform_3(%arg0: i32) -> (i32, i32) {
    %c0_i32 = arith.constant 0 : i32
    %c0_i32_0 = arith.constant 0 : i32
    %c0_i32_1 = arith.constant 0 : i32
    return %c0_i32, %c0_i32_0 : i32, i32
  }
  func.func @transform_4(%arg0: i32) -> (i32, i32, i32) {
    %c0_i32 = arith.constant 0 : i32
    %c0_i32_0 = arith.constant 0 : i32
    %c0_i32_1 = arith.constant 0 : i32
    %c0_i32_2 = arith.constant 0 : i32
    return %c0_i32, %c0_i32_0, %c0_i32_1 : i32, i32, i32
  }
  func.func @transform_5(%arg0: i32) -> (i32, i32) {
    %c0_i32 = arith.constant 0 : i32
    %c0_i32_0 = arith.constant 0 : i32
    %c0_i32_1 = arith.constant 0 : i32
    return %c0_i32, %c0_i32_0 : i32, i32
  }
  func.func @transform_6(%arg0: i32) -> (i32, i32) {
    %c0_i32 = arith.constant 0 : i32
    %c0_i32_0 = arith.constant 0 : i32
    %c0_i32_1 = arith.constant 0 : i32
    return %c0_i32, %c0_i32_0 : i32, i32
  }
  func.func @transform_7(%arg0: i32) -> (i32, i32) {
    %c0_i32 = arith.constant 0 : i32
    %c0_i32_0 = arith.constant 0 : i32
    %c0_i32_1 = arith.constant 0 : i32
    return %c0_i32, %c0_i32_0 : i32, i32
  }
  func.func @transform_8(%arg0: i32) -> (i32, i32, i32, i32) {
    %c0_i32 = arith.constant 0 : i32
    %c0_i32_0 = arith.constant 0 : i32
    %c0_i32_1 = arith.constant 0 : i32
    %c0_i32_2 = arith.constant 0 : i32
    return %arg0, %c0_i32, %c0_i32_0, %c0_i32_1 : i32, i32, i32, i32
  }
}

</mosaic_0001>

<bundles_post_ra>
// kernel: tpu_custom_call.1
= control target key start
LH: loop header
LB: loop body
LE: loop exit
PB: predicated region body
PF: predicated region fallthrough
CT: control target
= control target key end

     0   :  { %13 = vsyncpa [#allocation5], 0  ;;  %s4422_s0 = inlined_call_operand.vmem [shape: f32[2,4,16,16], index: 0, kind: input, shape index: {}]   ;;  %s4423_s1 = inlined_call_operand.vmem [shape: f32[1,324], index: 1, kind: input, shape index: {}]   ;;  %s4424_s2 = inlined_call_operand.vmem [shape: f32[9,8,8], index: 2, kind: input, shape index: {}]   ;;  %s4425_s3 = inlined_call_operand.vmem [shape: f32[8,1], index: 3, kind: input, shape index: {}]   ;;  %s4426_s4 = inlined_call_operand.vmem [shape: f32[9,8,8], index: 4, kind: input, shape index: {}]   ;;  %s4427_s5 = inlined_call_operand.vmem [shape: f32[8,1], index: 5, kind: input, shape index: {}]   ;;  %s4428_s6 = inlined_call_operand.vmem [shape: f32[8,8], index: 6, kind: input, shape index: {}]   ;;  %s4429_s7 = inlined_call_operand.vmem [shape: f32[8,1], index: 7, kind: input, shape index: {}]   ;;  %s4430_s8 = inlined_call_operand.hbm [shape: f32[2,8,16,16], index: 8, kind: output, shape index: {}]  }
   0x1   :  { %15 = vsyncpa [#allocation5 + $0x1], 0  ;;  %s3325_s27 = smov 0   ;;  %s3327_s28 = smov 0  }
   0x2   :  { %s3329_s29 = smov 0   ;;  %s3331_s30 = smov 0  }
   0x3 LB: > { %s3346_s9 = sadd.s32 4294967295, %s3242_s30   ;;  %s2926_s10 = sadd.s32 4294967294, %s3242_s30   ;;  %s3242_s30 = sphi %s3331_s30, %s4439_s30   ;;  %s3238_s29 = sphi %s3329_s29, %s4438_s29   ;;  %s3234_s28 = sphi %s3327_s28, %s4437_s28   ;;  %s3230_s27 = sphi %s3325_s27, %s4436_s27  }
   0x4   : > { %s3350_s11 = sadd.s32 1, %s3242_s30   ;;  %s201_s12 = sadd.s32 1, %s3238_s29 }
   0x5   : > { %s198_s13 = ssub.s32 %s3242_s30, %s3350_s11  ;;  %p211_p0 = scmp.ne.s32.totalorder %s3238_s29, %s3234_s28 }
   0x6   : > { %p199_p1 = scmp.eq.s32.totalorder %s198_s13, 0  ;;  %p212_p2 = scmp.eq.s32.totalorder %s3346_s9, 1 }
   0x7   : > { %p217_p3 = scmp.ne.s32.totalorder %s3234_s28, %s3230_s27  ;;  %p218_p4 = scmp.eq.s32.totalorder %s2926_s10, 1 }
   0x8   : > { %s3361_s14 = scalar_select %p199_p1, %s3238_s29, %s201_s12  }
   0x9   : > { %p3363_p5 = por %p212_p2, %p211_p0  ;;  %p3367_p6 = por %p218_p4, %p217_p3 }
   0xa   : > { %p2929_p7 = scmp.ge.s32.totalorder %s3242_s30, 1  ;;  %p265_p8 = scmp.lt.s32.totalorder %s3242_s30, 3 }
   0xc   : > { %p266_p9 = pnand %p2929_p7, %p265_p8 }
   0xd   : > { %p299_p10 = scmp.lt.s32.totalorder (!%p266_p9), %s3346_s9, 1  ;;  %s3244_s22 = smov (!%p266_p9), 38  }
   0xe   : > { %269 = sbr.rel (%p266_p9) target bundleno = 1412 (0x584), region = 52  ;;  %s3245_s23 = smov (!%p266_p9), 74  }
   0xf   : > { %s3246_s24 = smov (!%p266_p9), 56   ;;  %s3247_s25 = smov (!%p266_p9), 92  }
  0x10   : > { %s3248_s26 = smov (!%p266_p9), 36   ;;  %s3249_s10 = smov (!%p266_p9), 110  }
  0x11   : > { %s3250_s12 = smov (!%p266_p9), 54   ;;  %s3252_s13 = smov (!%p266_p9), 90  }
  0x12   : > { %s3255_s19 = smov (!%p266_p9), 16   ;;  %s3256_s20 = smov (!%p266_p9), 72  }
  0x13   : > { %s300_s17 = scalar_select %p299_p10, %s3346_s9, 1  ;;  %vm321_vm0 = vcmask 1041409   ;;  %vm324_vm1 = vcmask 1042434   ;;  %vm327_vm2 = vcmask 1043459   ;;  %vm425_vm3 = vcmask 125952  }
  0x14   : > { %vm306_vm4 = vcmask 867328   ;;  %vm332_vm5 = vcmask 437552   ;;  %vm444_vm6 = vcmask 273552   ;;  %vm351_vm7 = vcmask 585152  }
  0x15   : > { %s3011_s18 = sshll.u32 %s300_s17, 6  ;;  %s3253_s17 = smov 18   ;;  %vm370_vm8 = vcmask 732752   ;;  %vm389_vm9 = vcmask 880352   ;;  %vm408_vm10 = vcmask 1027952   ;;  %vm463_vm11 = vcmask 421152  }
  0x16   : > { %s3378_s21 = scalar_lea.vmem %s4422_s0, %s3011_s18  ;;  %s3254_s18 = smov 108   ;;  %vm560_vm12 = vcmask 109568   ;;  %vm482_vm13 = vcmask 568752   ;;  %vm501_vm14 = vcmask 716352   ;;  %vm520_vm15 = vcmask 863952  }
  0x17   : > { %v312_v0 = vld [vmem:[%s3378_s21] sm:$0x1]  ;;  %v313_v1 = vld [vmem:[%s3378_s21 + $0x10] sm:$0x1]  ;;  %v353_v6 = vld [vmem:[%s3378_s21 + $0x2] sm:$0x1] }
  0x18   : > { %v314_v2 = vld [vmem:[%s3378_s21 + $0x20] sm:$0x1]  ;;  %v315_v3 = vld [vmem:[%s3378_s21 + $0x30] sm:$0x1]  ;;  %v320_v4 = vrot.slane %v313_v1, 7 }
  0x19   : > { %v323_v5 = vrot.slane %v314_v2, 6  ;;  %v326_v7 = vrot.slane %v315_v3, 5  ;;  %v354_v8 = vld [vmem:[%s3378_s21 + $0x12] sm:$0x1]  ;;  %v355_v9 = vld [vmem:[%s3378_s21 + $0x22] sm:$0x1] }
  0x1a   : > { %v322_v10 = vsel %vm321_vm0, %v320_v4, %v312_v0  ;;  %v356_v11 = vld [vmem:[%s3378_s21 + $0x32] sm:$0x1]  ;;  %v361_v12 = vrot.slane %v354_v8, 7  ;;  %v363_v13 = vrot.slane %v355_v9, 6  ;;  %v334_v14 = vld [vmem:[%s3378_s21 + $0x1] sm:$0x1] }
  0x1b   : > { %v325_v15 = vsel %vm324_vm1, %v323_v5, %v322_v10  ;;  %v365_v16 = vrot.slane %v356_v11, 5  ;;  %v335_v17 = vld [vmem:[%s3378_s21 + $0x11] sm:$0x1]  ;;  %v336_v18 = vld [vmem:[%s3378_s21 + $0x21] sm:$0x1] }
  0x1c   : > { %v328_v19 = vsel %vm327_vm2, %v326_v7, %v325_v15  ;;  %v362_v20 = vsel %vm321_vm0, %v361_v12, %v353_v6  ;;  %v337_v21 = vld [vmem:[%s3378_s21 + $0x31] sm:$0x1]  ;;  %v342_v22 = vrot.slane %v335_v17, 7  ;;  %v344_v23 = vrot.slane %v336_v18, 6  ;;  %v372_v24 = vld [vmem:[%s3378_s21 + $0x3] sm:$0x1] }
  0x1d   : > { %329 = vrot.lane.b32.xlu0 %v328_v19, %s3244_s22  ;;  %v364_v25 = vsel %vm324_vm1, %v363_v13, %v362_v20  ;;  %v346_v26 = vrot.slane %v337_v21, 5  ;;  %v373_v27 = vld [vmem:[%s3378_s21 + $0x13] sm:$0x1]  ;;  %v374_v28 = vld [vmem:[%s3378_s21 + $0x23] sm:$0x1]  ;;  %s3257_s22 = smov 34  }
  0x1e   : > { %v366_v29 = vsel %vm327_vm2, %v365_v16, %v364_v25  ;;  %v343_v30 = vsel %vm321_vm0, %v342_v22, %v334_v14  ;;  %v375_v31 = vld [vmem:[%s3378_s21 + $0x33] sm:$0x1]  ;;  %v380_v32 = vrot.slane %v373_v27, 7  ;;  %v382_v33 = vrot.slane %v374_v28, 6  ;;  %v447_v35 = vld [vmem:[%s3378_s21 + $0x17] sm:$0x1] }
  0x1f   : > { %367 = vrot.lane.b32.xlu1 %v366_v29, %s3245_s23  ;;  %v345_v34 = vsel %vm324_vm1, %v344_v23, %v343_v30  ;;  %v384_v37 = vrot.slane %v375_v31, 5  ;;  %v448_v38 = vld [vmem:[%s3378_s21 + $0x27] sm:$0x1]  ;;  %v454_v39 = vrot.slane %v447_v35, 7  ;;  %v466_v42 = vld [vmem:[%s3378_s21 + $0x18] sm:$0x1] }
  0x20   : > { %v381_v36 = vsel %vm321_vm0, %v380_v32, %v372_v24  ;;  %v446_v41 = vld [vmem:[%s3378_s21 + $0x7] sm:$0x1]  ;;  %v347_v43 = vsel %vm327_vm2, %v346_v26, %v345_v34  ;;  %v449_v44 = vld [vmem:[%s3378_s21 + $0x37] sm:$0x1]  ;;  %v467_v45 = vld [vmem:[%s3378_s21 + $0x28] sm:$0x1] }
  0x21   : > { %v383_v40 = vsel %vm324_vm1, %v382_v33, %v381_v36  ;;  %v473_v46 = vrot.slane %v466_v42, 7  ;;  %v456_v47 = vrot.slane %v448_v38, 6  ;;  %v465_v48 = vld [vmem:[%s3378_s21 + $0x8] sm:$0x1]  ;;  %v455_v50 = vsel %vm321_vm0, %v454_v39, %v446_v41  ;;  %v468_v52 = vld [vmem:[%s3378_s21 + $0x38] sm:$0x1] }
  0x22   : > { %v385_v49 = vsel %vm327_vm2, %v384_v37, %v383_v40  ;;  %v458_v51 = vrot.slane %v449_v44, 5  ;;  %v475_v53 = vrot.slane %v467_v45, 6  ;;  %v504_v54 = vld [vmem:[%s3378_s21 + $0x1a] sm:$0x1]  ;;  %v505_v56 = vld [vmem:[%s3378_s21 + $0x2a] sm:$0x1] }
  0x23   : > { %v474_v55 = vsel %vm321_vm0, %v473_v46, %v465_v48  ;;  %v506_v57 = vld [vmem:[%s3378_s21 + $0x3a] sm:$0x1]  ;;  %v523_v58 = vld [vmem:[%s3378_s21 + $0x1b] sm:$0x1]  ;;  %v457_v59 = vsel %vm324_vm1, %v456_v47, %v455_v50  ;;  %v391_v60 = vld [vmem:[%s3378_s21 + $0x4] sm:$0x1] }
  0x24   : > { %v392_v61 = vld [vmem:[%s3378_s21 + $0x14] sm:$0x1]  ;;  %v393_v62 = vld [vmem:[%s3378_s21 + $0x24] sm:$0x1]  ;;  %v477_v63 = vrot.slane %v468_v52, 5  ;;  %v511_v0 = vrot.slane %v504_v54, 7  ;;  %v476_v4 = vsel %vm324_vm1, %v475_v53, %v474_v55  ;;  %v459_v7 = vsel %vm327_vm2, %v458_v51, %v457_v59 }
  0x25   : > { %348 = vrot.lane.b32.xlu0 %v347_v43, %s3246_s24  ;;  %v394_v1 = vld [vmem:[%s3378_s21 + $0x34] sm:$0x1]  ;;  %v399_v2 = vrot.slane %v392_v61, 7  ;;  %v401_v3 = vrot.slane %v393_v62, 6  ;;  %v503_v5 = vld [vmem:[%s3378_s21 + $0xa] sm:$0x1] }
  0x26   : > { %v403_v6 = vrot.slane %v394_v1, 5  ;;  %v524_v8 = vld [vmem:[%s3378_s21 + $0x2b] sm:$0x1]  ;;  %v530_v9 = vrot.slane %v523_v58, 7  ;;  %v513_v11 = vrot.slane %v505_v56, 6  ;;  %v515_v12 = vrot.slane %v506_v57, 5 }
  0x27   : > { %386 = vrot.lane.b32.xlu1 %v385_v49, %s3247_s25  ;;  %v400_v10 = vsel %vm321_vm0, %v399_v2, %v391_v60  ;;  %v522_v13 = vld [vmem:[%s3378_s21 + $0xb] sm:$0x1]  ;;  %v478_v15 = vsel %vm327_vm2, %v477_v63, %v476_v4  ;;  %v512_v16 = vsel %vm321_vm0, %v511_v0, %v503_v5  ;;  %v525_v17 = vld [vmem:[%s3378_s21 + $0x3b] sm:$0x1]  ;;  %v563_v19 = vld [vmem:[%s3378_s21 + $0x1d] sm:$0x1] }
  0x28   : > { %v402_v14 = vsel %vm324_vm1, %v401_v3, %v400_v10  ;;  %v427_v20 = vld [vmem:[%s3378_s21 + $0x6] sm:$0x1]  ;;  %v532_v21 = vrot.slane %v524_v8, 6  ;;  %v428_v22 = vld [vmem:[%s3378_s21 + $0x16] sm:$0x1]  ;;  %v531_v24 = vsel %vm321_vm0, %v530_v9, %v522_v13  ;;  %v514_v29 = vsel %vm324_vm1, %v513_v11, %v512_v16  ;;  %s3258_s23 = smov 126  }
  0x29   : > { %v404_v18 = vsel %vm327_vm2, %v403_v6, %v402_v14  ;;  %v429_v23 = vld [vmem:[%s3378_s21 + $0x26] sm:$0x1]  ;;  %v564_v25 = vld [vmem:[%s3378_s21 + $0x2d] sm:$0x1]  ;;  %v430_v26 = vld [vmem:[%s3378_s21 + $0x36] sm:$0x1]  ;;  %v516_v43 = vsel %vm327_vm2, %v515_v12, %v514_v29 }
  0x2a   : > { %405 = vrot.lane.b32.xlu2 %v404_v18, %s3249_s10  ;;  %v435_v27 = vrot.slane %v428_v22, 7  ;;  %v437_v28 = vrot.slane %v429_v23, 6  ;;  %v582_v30 = vld [vmem:[%s3378_s21 + $0x1e] sm:$0x1]  ;;  %v439_v31 = vrot.slane %v430_v26, 5  ;;  %v3251_v33 = vmov 0.0  }
  0x2b   : > { %v485_v32 = vld [vmem:[%s3378_s21 + $0x19] sm:$0x1]  ;;  %304 = vst [vmem:[#allocation2] sm:$0xff] %v3251_v33  ;;  %v534_v34 = vrot.slane %v525_v17, 5  ;;  %v570_v35 = vrot.slane %v563_v19, 7  ;;  %v533_v39 = vsel %vm324_vm1, %v532_v21, %v531_v24  ;;  %v572_v45 = vrot.slane %v564_v25, 6 }
  0x2c   : > { %v436_v36 = vsel %vm321_vm0, %v435_v27, %v427_v20  ;;  %v486_v37 = vld [vmem:[%s3378_s21 + $0x29] sm:$0x1]  ;;  %v492_v38 = vrot.slane %v485_v32, 7  ;;  %v562_v40 = vld [vmem:[%s3378_s21 + $0xd] sm:$0x1]  ;;  %v589_v47 = vrot.slane %v582_v30, 7 }
  0x2d   : > { %460 = vrot.lane.b32.xlu0 %v459_v7, %s3248_s26  ;;  %v438_v41 = vsel %vm324_vm1, %v437_v28, %v436_v36  ;;  %v484_v42 = vld [vmem:[%s3378_s21 + $0x9] sm:$0x1]  ;;  %v565_v44 = vld [vmem:[%s3378_s21 + $0x3d] sm:$0x1]  ;;  %v583_v46 = vld [vmem:[%s3378_s21 + $0x2e] sm:$0x1]  ;;  %v535_v52 = vsel %vm327_vm2, %v534_v34, %v533_v39  ;;  %v571_v53 = vsel %vm321_vm0, %v570_v35, %v562_v40 }
  0x2e   : > { %v440_v48 = vsel %vm327_vm2, %v439_v31, %v438_v41  ;;  %v581_v49 = vld [vmem:[%s3378_s21 + $0xe] sm:$0x1]  ;;  %v487_v50 = vld [vmem:[%s3378_s21 + $0x39] sm:$0x1]  ;;  %v494_v51 = vrot.slane %v486_v37, 6  ;;  %305 = vst [vmem:[#allocation2 + $0x8] sm:$0xff] %v3251_v33  ;;  %v493_v54 = vsel %vm321_vm0, %v492_v38, %v484_v42  ;;  %v573_v61 = vsel %vm324_vm1, %v572_v45, %v571_v53 }
  0x2f   : > { %479 = vrot.lane.b32.xlu1 %v478_v15, %s3250_s12  ;;  %v584_v55 = vld [vmem:[%s3378_s21 + $0x3e] sm:$0x1]  ;;  %v591_v56 = vrot.slane %v583_v46, 6  ;;  %v542_v57 = vld [vmem:[%s3378_s21 + $0x1c] sm:$0x1]  ;;  %v574_v58 = vrot.slane %v565_v44, 5  ;;  %v590_v59 = vsel %vm321_vm0, %v589_v47, %v581_v49 }
  0x30   : > { %v496_v60 = vrot.slane %v487_v50, 5  ;;  %v495_v62 = vsel %vm324_vm1, %v494_v51, %v493_v54  ;;  %v593_v63 = vrot.slane %v584_v55, 5  ;;  %v543_v0 = vld [vmem:[%s3378_s21 + $0x2c] sm:$0x1]  ;;  %v549_v1 = vrot.slane %v542_v57, 7  ;;  %s3259_s24 = smov 52  }
  0x31   : > { %v592_v2 = vsel %vm324_vm1, %v591_v56, %v590_v59  ;;  %v541_v3 = vld [vmem:[%s3378_s21 + $0xc] sm:$0x1]  ;;  %v575_v4 = vsel %vm327_vm2, %v574_v58, %v573_v61  ;;  %v544_v6 = vld [vmem:[%s3378_s21 + $0x3c] sm:$0x1]  ;;  %v551_v7 = vrot.slane %v543_v0, 6  ;;  %307 = vst.msk [vmem:[#allocation2 + $0x10] sm:$0xff] %vm306_vm4, %v3251_v33 }
  0x32   : > { %441 = vrot.lane.b32.xlu2 %v440_v48, %s3253_s17  ;;  %v497_v5 = vsel %vm327_vm2, %v496_v60, %v495_v62  ;;  %v594_v8 = vsel %vm327_vm2, %v593_v63, %v592_v2  ;;  %v550_v9 = vsel %vm321_vm0, %v549_v1, %v541_v3  ;;  %v601_v10 = vld [vmem:[%s3378_s21 + $0x1f] sm:$0x1]  ;;  %v553_v11 = vrot.slane %v544_v6, 5  ;;  %v602_v13 = vld [vmem:[%s3378_s21 + $0x2f] sm:$0x1]  ;;  %s3261_s26 = smov 109  }
  0x33   : > { %v552_v12 = vsel %vm324_vm1, %v551_v7, %v550_v9  ;;  %v608_v14 = vrot.slane %v601_v10, 7  ;;  %v600_v15 = vld [vmem:[%s3378_s21 + $0xf] sm:$0x1]  ;;  %v603_v17 = vld [vmem:[%s3378_s21 + $0x3f] sm:$0x1]  ;;  %v610_v18 = vrot.slane %v602_v13, 6 }
  0x34   : > { %v554_v16 = vsel %vm327_vm2, %v553_v11, %v552_v12  ;;  %v612_v20 = vrot.slane %v603_v17, 5  ;;  %v411_v23 = vld [vmem:[%s3378_s21 + $0x15] sm:$0x1]  ;;  %v412_v24 = vld [vmem:[%s3378_s21 + $0x25] sm:$0x1]  ;;  %vm558_vm4 = vcmask 1044464  }
  0x35   : > { %517 = vrot.lane.b32.xlu0 %v516_v43, %s3252_s13  ;;  %v609_v19 = vsel %vm321_vm0, %v608_v14, %v600_v15  ;;  %v418_v25 = vrot.slane %v411_v23, 7  ;;  %v410_v26 = vld [vmem:[%s3378_s21 + $0x5] sm:$0x1]  ;;  %v413_v27 = vld [vmem:[%s3378_s21 + $0x35] sm:$0x1]  ;;  %v420_v28 = vrot.slane %v412_v24, 6 }
  0x36   : > { %v611_v21 = vsel %vm324_vm1, %v610_v18, %v609_v19  ;;  %v422_v30 = vrot.slane %v413_v27, 5  ;;  %s3260_s21 = smov 127   ;;  %s4431_s12 = smov 91   ;;  %v619_v54 = vld [vmem:[%s4424_s2] sm:$0xff]  ;;  %v2933_v60 = vld [vmem:[%s4424_s2 + $0x8] sm:$0xff] }
  0x37   : > { %536 = vrot.lane.b32.xlu1 %v535_v52, %s3254_s18  ;;  %v613_v22 = vsel %vm327_vm2, %v612_v20, %v611_v21  ;;  %v419_v29 = vsel %vm321_vm0, %v418_v25, %v410_v26  ;;  %v2952_v25 = vld [vmem:[%s4424_s2 + $0x28] sm:$0xff]  ;;  %v1327_v26 = vld [vmem:[%s4425_s3] sm:$0xff]  ;;  %s3272_s17 = smov 75  }
  0x38   : > { %v421_v31 = vsel %vm324_vm1, %v420_v28, %v419_v29  ;;  %v2948_v27 = vld [vmem:[%s4424_s2 + $0x20] sm:$0xff]  ;;  %v3263_v28 = vmov 0  }
  0x39   : > { %v423_v32 = vsel %vm327_vm2, %v422_v30, %v421_v31  ;;  %3128 = vset.pattern.permute.xlu1 %v3263_v28  ;;  %3129 = vset.pattern.permute.xlu0 %v3263_v28 }
  0x3a   : > { %498 = vrot.lane.b32.xlu2 %v497_v5, %s3256_s20  ;;  %426 = vst.msk [vmem:[#allocation2 + $0x8] sm:$0xf] %vm425_vm3, %v423_v32  ;;  %vm539_vm3 = vcmask 1011552   ;;  %s3274_s20 = smov 39  }
  0x3d   : > { %576 = vrot.lane.b32.xlu0 %v575_v4, %s3255_s19  ;;  %s3273_s19 = smov 57  }
  0x3f   : > { %595 = vrot.lane.b32.xlu1 %v594_v8, %s3257_s22  ;;  %v2940_v8 = vld [vmem:[%s4424_s2 + $0x10] sm:$0xff]  ;;  %s4435_s22 = smov 91  }
  0x42   : > { %555 = vrot.lane.b32.xlu2 %v554_v16, %s3258_s23  ;;  %v2944_v16 = vld [vmem:[%s4424_s2 + $0x18] sm:$0xff] }
  0x4a   : > { %614 = vrot.lane.b32.xlu2 %v613_v22, %s3259_s24  ;;  %s3266_s24 = smov 37  }
  0x84   : > { %v406_v34 = vpop.permute.xlu2 %405 }
  0x8c   : > { %v442_v36 = vpop.permute.xlu2 %441 }
  0x8d   : > { %445 = vst.msk [vmem:[#allocation2 + $0x8] sm:$0xf] %vm444_vm6, %v442_v36  ;;  %vm598_vm6 = vcmask 404752  }
  0x8f   : > { %v330_v35 = vpop.permute.xlu0 %329 }
  0x90   : > { %333 = vst.msk [vmem:[#allocation2] sm:$0xf] %vm332_vm5, %v330_v35  ;;  %vm579_vm5 = vcmask 257152  }
  0x91   : > { %v368_v37 = vpop.permute.xlu1 %367 }
  0x94   : > { %v499_v39 = vpop.permute.xlu2 %498 }
  0x97   : > { %v349_v38 = vpop.permute.xlu0 %348 }
  0x98   : > { %352 = vst.msk [vmem:[#allocation2] sm:$0xf] %vm351_vm7, %v349_v38  ;;  %vm617_vm7 = vcmask 552352  }
  0x99   : > { %v387_v40 = vpop.permute.xlu1 %386  ;;  %371 = vst.msk [vmem:[#allocation2] sm:$0xf] %vm370_vm8, %v368_v37  ;;  %vm640_vm8 = vcmask 64512  }
  0x9a   : > { %390 = vst.msk [vmem:[#allocation2] sm:$0xf] %vm389_vm9, %v387_v40  ;;  %vm634_vm9 = vcmask 1039360  }
  0x9b   : > { %409 = vst.msk [vmem:[#allocation2] sm:$0xf] %vm408_vm10, %v406_v34  ;;  %vm775_vm10 = vcmask 1031168  }
  0x9c   : > { %v556_v42 = vpop.permute.xlu2 %555 }
  0x9d   : > { %561 = vst.msk [vmem:[#allocation2 + $0x10] sm:$0xf] %vm560_vm12, %v556_v42  ;;  %vm855_vm12 = vcmask 900096  }
  0x9f   : > { %v461_v41 = vpop.permute.xlu0 %460 }
  0xa0   : > { %464 = vst.msk [vmem:[#allocation2 + $0x8] sm:$0xf] %vm463_vm11, %v461_v41  ;;  %vm1015_vm11 = vcmask 883712   ;;  %v2956_v41 = vld [vmem:[%s4424_s2 + $0x30] sm:$0xff] }
  0xa1   : > { %v480_v43 = vpop.permute.xlu1 %479 }
  0xa2   : > { %483 = vst.msk [vmem:[#allocation2 + $0x8] sm:$0xf] %vm482_vm13, %v480_v43  ;;  %v3500_v44 = vld [vmem:[#allocation2] sm:$0xff]  ;;  %vm935_vm13 = vcmask 891904  }
  0xa3   : > { %502 = vst.msk [vmem:[#allocation2 + $0x8] sm:$0xf] %vm501_vm14, %v499_v39  ;;  %722 = vmatpush.msra.mxu3 %v3500_v44  ;;  %vm1095_vm14 = vcmask 752640  }
  0xa4   : > { %v615_v48 = vpop.permute.xlu2 %614  ;;  %2937 = vmatmul.msk.f32.vlgmr.msra.gmra.mxu3 %vm640_vm8, %v619_v54 }
  0xa7   : > { %v518_v45 = vpop.permute.xlu0 %517 }
  0xa8   : > { %521 = vst.msk [vmem:[#allocation2 + $0x8] sm:$0xf] %vm520_vm15, %v518_v45  ;;  %vm1175_vm15 = vcmask 744448  }
  0xa9   : > { %v537_v46 = vpop.permute.xlu1 %536 }
  0xaa   : > { %540 = vst.msk [vmem:[#allocation2 + $0x8] sm:$0xf] %vm539_vm3, %v537_v46  ;;  %vm1255_vm3 = vcmask 736256  }
  0xab   : > { %559 = vst.msk [vmem:[#allocation2 + $0x8] sm:$0xf] %vm558_vm4, %v556_v42  ;;  %v2081_v42 = vld [vmem:[%s4429_s7] sm:$0xff]  ;;  %vm308_vm4 = vcmask 154624  }
  0xac   : > { %309 = vst.msk [vmem:[#allocation3] sm:$0xff] %vm308_vm4, %v3251_v33 }
  0xaf   : > { %v577_v47 = vpop.permute.xlu0 %576 }
  0xb0   : > { %580 = vst.msk [vmem:[#allocation2 + $0x10] sm:$0xf] %vm579_vm5, %v577_v47  ;;  %vm1364_vm5 = vcmask 1047704  }
  0xb1   : > { %v596_v49 = vpop.permute.xlu1 %595 }
  0xb2   : > { %599 = vst.msk [vmem:[#allocation2 + $0x10] sm:$0xf] %vm598_vm6, %v596_v49  ;;  %v621_v50 = vld [vmem:[#allocation2 + $0x8] sm:$0xff]  ;;  %vm310_vm6 = vcmask 868024  }
  0xb3   : > { %618 = vst.msk [vmem:[#allocation2 + $0x10] sm:$0xf] %vm617_vm7, %v615_v48  ;;  %v3093_v51 = vpack.i.bf16 %v621_v50, %v3500_v44  ;;  %vm1367_vm7 = vcmask 711680  }
  0xb4   : > { %311 = vst.msk [vmem:[#allocation3 + $0x10] sm:$0xff] %vm310_vm6, %v3251_v33 }
  0xb5   : > { %3094 = vrot.lane.b32.xlu2 %v3093_v51, %s3258_s23  ;;  %3089 = vrot.lane.b32.xlu0 %v3093_v51, %s3260_s21 }
  0xba   : > { %v622_v52 = vld [vmem:[#allocation2 + $0x10] sm:$0xff] }
  0xbb   : > { %632 = vrot.lane.b32.xlu1 %v622_v52, %s3260_s21  ;;  %v3130_v53 = vpack.i.bf16 %v622_v52, %v621_v50 }
  0xbd   : > { %853 = vrot.lane.b32.xlu2 %v622_v52, %s3249_s10  ;;  %773 = vrot.lane.b32.xlu0 %v622_v52, %s3258_s23 }
  0xc3   : > { %3099 = vrot.lane.b32.xlu1 %v3093_v51, %s3249_s10 }
  0xc5   : > { %3109 = vrot.lane.b32.xlu2 %v3093_v51, %s3254_s18  ;;  %3104 = vrot.lane.b32.xlu0 %v3093_v51, %s3261_s26 }
  0xcb   : > { %933 = vrot.lane.b32.xlu1 %v622_v52, %s3261_s26 }
  0xcd   : > { %1093 = vrot.lane.b32.xlu2 %v622_v52, %s3247_s25  ;;  %1013 = vrot.lane.b32.xlu0 %v622_v52, %s3254_s18 }
  0xd3   : > { %3114 = vrot.lane.b32.xlu1 %v3093_v51, %s3247_s25 }
  0xd5   : > { %3124 = vrot.lane.b32.xlu2 %v3093_v51, %s3252_s13  ;;  %3119 = vrot.lane.b32.xlu0 %v3093_v51, %s4431_s12  ;;  %v2964_v51 = vld [vmem:[%s4424_s2 + $0x40] sm:$0xff] }
  0xdb   : > { %1173 = vrot.lane.b32.xlu1 %v622_v52, %s4431_s12  ;;  %s3264_s12 = smov 19  }
  0xdd   : > { %3131 = vrot.lane.b32.xlu2 %v3130_v53, %s3261_s26  ;;  %1253 = vrot.lane.b32.xlu0 %v622_v52, %s3252_s13 }
  0xe3   : > { %1330 = vperm.xlu1 %3128, %v1327_v26  }
  0xeb   : > { %2084 = vperm.xlu1 %3128, %v2081_v42  }
 0x10f   : > { %v3095_v55 = vpop.permute.xlu2 %3094 }
 0x110   : > { %v3097_v62 = vunpack.i.h.bf16 %v3095_v55  ;;  %v3096_v63 = vunpack.i.l.bf16 %v3095_v55 }
 0x112   : > { %v776_v3 = vsel %vm775_vm10, %v3096_v63, %v3097_v62 }
 0x117   : > { %v854_v56 = vpop.permute.xlu2 %853 }
 0x11f   : > { %v3110_v0 = vpop.permute.xlu2 %3109 }
 0x120   : > { %v3112_v5 = vunpack.i.h.bf16 %v3110_v0  ;;  %v3111_v6 = vunpack.i.l.bf16 %v3110_v0 }
 0x122   : > { %v1016_v9 = vsel %vm1015_vm11, %v3111_v6, %v3112_v5 }
 0x127   : > { %v3090_v57 = vpop.permute.xlu0 %3089  ;;  %v1094_v19 = vpop.permute.xlu2 %1093 }
 0x128   : > { %v3092_v58 = vunpack.i.h.bf16 %v3090_v57  ;;  %v3091_v59 = vunpack.i.l.bf16 %v3090_v57  ;;  %v724_v53 = vpop.f32.mrf.mxu3 }
 0x12a   : > { %v635_v61 = vsel %vm634_vm9, %v3091_v59, %v3092_v58 }
 0x12b   : > { %659 = vmatpush.msra.mxu0 %v635_v61 }
 0x12c   : > { %2934 = vmatmul.msk.f32.vlgmr.msra.gmra.mxu0 %vm640_vm8, %v2933_v60 }
 0x12d   : > { %742 = vmatpush.msrb.mxu0 %v621_v50  ;;  %v633_v1 = vpop.permute.xlu1 %632  ;;  %v2960_v50 = vld [vmem:[%s4424_s2 + $0x38] sm:$0xff] }
 0x12e   : > { %699 = vmatpush.msra.mxu2 %v633_v1  ;;  %v636_v2 = vsel %vm634_vm9, %v3092_v58, %v633_v1 }
 0x12f   : > { %2936 = vmatmul.msk.f32.vlgmr.msra.gmra.mxu2 %vm640_vm8, %v2933_v60  ;;  %v774_v4 = vpop.permute.xlu0 %773  ;;  %679 = vmatpush.msra.mxu1 %v636_v2  ;;  %v3125_v29 = vpop.permute.xlu2 %3124 }
 0x130   : > { %799 = vmatpush.msrb.mxu2 %v776_v3  ;;  %2935 = vmatmul.msk.f32.vlgmr.msra.gmra.mxu1 %vm640_vm8, %v2933_v60  ;;  %v777_v7 = vsel %vm775_vm10, %v3097_v62, %v774_v4  ;;  %v3127_v34 = vunpack.i.h.bf16 %v3125_v29  ;;  %v3126_v35 = vunpack.i.l.bf16 %v3125_v29  ;;  %v2068_v62 = vld [vmem:[%s4427_s5] sm:$0xff] }
 0x131   : > { %762 = vmatpush.msrb.mxu1 %v622_v52  ;;  %839 = vmatpush.msra.mxu0 %v774_v4  ;;  %v1339_v29 = vld [vmem:[%s4423_s1] sm:$0x7] }
 0x132   : > { %819 = vmatpush.msrb.mxu3 %v777_v7  ;;  %v1256_v45 = vsel %vm1255_vm3, %v3126_v35, %v3127_v34  ;;  %2071 = vperm.xlu0 %3129, %v2068_v62  }
 0x133   : > { %2942 = vmatmul.msk.f32.vlgmr.msrb.gmra.mxu3 %vm640_vm8, %v2940_v8 }
 0x134   : > { %919 = vmatpush.msra.mxu3 %v854_v56  ;;  %2938 = vmatmul.msk.f32.vlgmr.msrb.gmra.mxu0 %vm640_vm8, %v619_v54 }
 0x135   : > { %v3100_v10 = vpop.permute.xlu1 %3099 }
 0x136   : > { %1039 = vmatpush.msrb.mxu3 %v1016_v9  ;;  %v3102_v11 = vunpack.i.h.bf16 %v3100_v10  ;;  %v3101_v12 = vunpack.i.l.bf16 %v3100_v10 }
 0x137   : > { %2941 = vmatmul.msk.f32.vlgmr.msrb.gmra.mxu2 %vm640_vm8, %v2940_v8  ;;  %v3105_v13 = vpop.permute.xlu0 %3104 }
 0x138   : > { %v3107_v14 = vunpack.i.h.bf16 %v3105_v13  ;;  %v3106_v15 = vunpack.i.l.bf16 %v3105_v13  ;;  %2939 = vmatmul.msk.f32.vlgmr.msrb.gmra.mxu1 %vm640_vm8, %v619_v54  ;;  %v856_v17 = vsel %vm855_vm12, %v3101_v12, %v3102_v11  ;;  %v857_v18 = vsel %vm855_vm12, %v3102_v11, %v854_v56 }
 0x139   : > { %879 = vmatpush.msra.mxu1 %v856_v17  ;;  %899 = vmatpush.msra.mxu2 %v857_v18 }
 0x13a   : > { %v936_v20 = vsel %vm935_vm13, %v3106_v15, %v3107_v14 }
 0x13b   : > { %2947 = vmatmul.msk.f32.vlgmr.msra.gmra.mxu3 %vm640_vm8, %v2944_v16  ;;  %959 = vmatpush.msrb.mxu0 %v936_v20 }
 0x13c   : > { %2943 = vmatmul.msk.f32.vlgmr.msra.gmra.mxu0 %vm640_vm8, %v2940_v8 }
 0x13d   : > { %v934_v21 = vpop.permute.xlu1 %933 }
 0x13e   : > { %999 = vmatpush.msrb.mxu2 %v934_v21  ;;  %v937_v22 = vsel %vm935_vm13, %v3107_v14, %v934_v21 }
 0x13f   : > { %2946 = vmatmul.msk.f32.vlgmr.msra.gmra.mxu2 %vm640_vm8, %v2944_v16  ;;  %v1014_v23 = vpop.permute.xlu0 %1013  ;;  %979 = vmatpush.msrb.mxu1 %v937_v22 }
 0x140   : > { %2945 = vmatmul.msk.f32.vlgmr.msra.gmra.mxu1 %vm640_vm8, %v2944_v16  ;;  %v1017_v24 = vsel %vm1015_vm11, %v3112_v5, %v1014_v23 }
 0x141   : > { %1079 = vmatpush.msra.mxu1 %v1014_v23  ;;  %1059 = vmatpush.msra.mxu0 %v1017_v24 }
 0x143   : > { %2953 = vmatmul.msk.f32.vlgmr.msrb.gmra.mxu3 %vm640_vm8, %v2952_v25 }
 0x144   : > { %2949 = vmatmul.msk.f32.vlgmr.msrb.gmra.mxu0 %vm640_vm8, %v2948_v27 }
 0x145   : > { %1159 = vmatpush.msrb.mxu0 %v1094_v19  ;;  %v3115_v30 = vpop.permute.xlu1 %3114 }
 0x146   : > { %v3117_v31 = vunpack.i.h.bf16 %v3115_v30  ;;  %v3116_v32 = vunpack.i.l.bf16 %v3115_v30 }
 0x147   : > { %2951 = vmatmul.msk.f32.vlgmr.msrb.gmra.mxu2 %vm640_vm8, %v2948_v27  ;;  %v3120_v36 = vpop.permute.xlu0 %3119 }
 0x148   : > { %v3122_v37 = vunpack.i.h.bf16 %v3120_v36  ;;  %v3121_v38 = vunpack.i.l.bf16 %v3120_v36  ;;  %2950 = vmatmul.msk.f32.vlgmr.msrb.gmra.mxu1 %vm640_vm8, %v2948_v27  ;;  %v1096_v39 = vsel %vm1095_vm14, %v3116_v32, %v3117_v31  ;;  %v1097_v40 = vsel %vm1095_vm14, %v3117_v31, %v1094_v19 }
 0x149   : > { %1119 = vmatpush.msra.mxu2 %v1096_v39  ;;  %1139 = vmatpush.msra.mxu3 %v1097_v40  ;;  %v1341_v36 = vperm.slane %v1339_v29, 0 }
 0x14a   : > { %v1176_v43 = vsel %vm1175_vm15, %v3121_v38, %v3122_v37 }
 0x14b   : > { %2958 = vmatmul.msk.f32.vlgmr.msra.gmra.mxu3 %vm640_vm8, %v2956_v41  ;;  %1199 = vmatpush.msrb.mxu1 %v1176_v43 }
 0x14c   : > { %2954 = vmatmul.msk.f32.vlgmr.msra.gmra.mxu0 %vm640_vm8, %v2952_v25 }
 0x14d   : > { %1279 = vmatpush.msra.mxu0 %v1256_v45  ;;  %v1174_v46 = vpop.permute.xlu1 %1173 }
 0x14e   : > { %1239 = vmatpush.msrb.mxu3 %v1174_v46  ;;  %v1177_v47 = vsel %vm1175_vm15, %v3122_v37, %v1174_v46  ;;  %v1342_v46 = vperm.slane %v1339_v29, 1 }
 0x14f   : > { %2957 = vmatmul.msk.f32.vlgmr.msra.gmra.mxu2 %vm640_vm8, %v2956_v41  ;;  %v1254_v48 = vpop.permute.xlu0 %1253 }
 0x150   : > { %1219 = vmatpush.msrb.mxu2 %v1177_v47  ;;  %2955 = vmatmul.msk.f32.vlgmr.msra.gmra.mxu1 %vm640_vm8, %v2952_v25  ;;  %v1257_v49 = vsel %vm1255_vm3, %v3127_v34, %v1254_v48 }
 0x151   : > { %1299 = vmatpush.msra.mxu1 %v1257_v49 }
 0x152   : > { %1319 = vmatpush.msra.mxu2 %v1254_v48 }
 0x153   : > { %2963 = vmatmul.msk.f32.vlgmr.msrb.gmra.mxu3 %vm640_vm8, %v2960_v50 }
 0x154   : > { %2959 = vmatmul.msk.f32.vlgmr.msrb.gmra.mxu0 %vm640_vm8, %v2956_v41 }
 0x155   : > { %v1331_v32 = vpop.permute.xlu1 %1330 }
 0x157   : > { %2962 = vmatmul.msk.f32.vlgmr.msrb.gmra.mxu2 %vm640_vm8, %v2960_v50 }
 0x158   : > { %2961 = vmatmul.msk.f32.vlgmr.msrb.gmra.mxu1 %vm640_vm8, %v2960_v50 }
 0x15c   : > { %2965 = vmatmul.msk.f32.vlgmr.msra.gmra.mxu0 %vm640_vm8, %v2964_v51 }
 0x15f   : > { %2967 = vmatmul.msk.f32.vlgmr.msra.gmra.mxu2 %vm640_vm8, %v2964_v51 }
 0x160   : > { %2966 = vmatmul.msk.f32.vlgmr.msra.gmra.mxu1 %vm640_vm8, %v2964_v51 }
 0x1a9   : > { %v661_v52 = vpop.f32.mrf.mxu0 }
 0x1aa   : > { %v725_v3 = vadd.f32 %v724_v53, %v661_v52  ;;  %v1343_v53 = vperm.slane %v1339_v29, 2 }
 0x1ad   : > { %v681_v54 = vpop.f32.mrf.mxu1 }
 0x1b1   : > { %v744_v55 = vpop.f32.mrf.mxu0 }
 0x1b2   : > { %v701_v56 = vpop.f32.mrf.mxu2  ;;  %v745_v8 = vadd.f32 %v744_v55, %v681_v54 }
 0x1b5   : > { %v764_v57 = vpop.f32.mrf.mxu1 }
 0x1b6   : > { %v821_v58 = vpop.f32.mrf.mxu3  ;;  %v765_v17 = vadd.f32 %v764_v57, %v701_v56  ;;  %v3608_v56 = vpop.permute.xlu2 %3131 }
 0x1b7   : > { %v845_v11 = vadd.f32 %v821_v58, %v745_v8 }
 0x1b9   : > { %v841_v59 = vpop.f32.mrf.mxu0 }
 0x1ba   : > { %v801_v60 = vpop.f32.mrf.mxu2  ;;  %v846_v20 = vadd.f32 %v841_v59, %v765_v17  ;;  %v3611_v59 = vpop.permute.xlu0 %2071 }
 0x1bb   : > { %v844_v5 = vadd.f32 %v801_v60, %v725_v3  ;;  %v3613_v60 = vpop.permute.xlu1 %2084  ;;  %v3637_v3 = vld [vmem:[%s4426_s4] sm:$0xff] }
 0x1bd   : > { %v881_v61 = vpop.f32.mrf.mxu1 }
 0x1be   : > { %v921_v63 = vpop.f32.mrf.mxu3  ;;  %v924_v10 = vadd.f32 %v881_v61, %v844_v5 }
 0x1bf   : > { %v926_v23 = vadd.f32 %v921_v63, %v846_v20 }
 0x1c1   : > { %v961_v0 = vpop.f32.mrf.mxu0 }
 0x1c2   : > { %v901_v1 = vpop.f32.mrf.mxu2  ;;  %v1004_v12 = vadd.f32 %v961_v0, %v924_v10 }
 0x1c3   : > { %v925_v13 = vadd.f32 %v901_v1, %v845_v11 }
 0x1c5   : > { %v981_v2 = vpop.f32.mrf.mxu1 }
 0x1c6   : > { %v1041_v6 = vpop.f32.mrf.mxu3  ;;  %v1005_v21 = vadd.f32 %v981_v2, %v925_v13 }
 0x1c7   : > { %v1084_v15 = vadd.f32 %v1041_v6, %v1004_v12 }
 0x1c9   : > { %v1061_v4 = vpop.f32.mrf.mxu0 }
 0x1ca   : > { %v1001_v7 = vpop.f32.mrf.mxu2  ;;  %v1085_v24 = vadd.f32 %v1061_v4, %v1005_v21 }
 0x1cb   : > { %v1006_v26 = vadd.f32 %v1001_v7, %v926_v23  ;;  %v2968_v7 = vld [vmem:[%s4426_s4 + $0x8] sm:$0xff]  ;;  %v3660_v23 = vld [vmem:[%s4426_s4 + $0x20] sm:$0xff] }
 0x1cd   : > { %v1081_v9 = vpop.f32.mrf.mxu1 }
 0x1ce   : > { %v1141_v18 = vpop.f32.mrf.mxu3  ;;  %v1086_v37 = vadd.f32 %v1081_v9, %v1006_v26 }
 0x1cf   : > { %v1165_v27 = vadd.f32 %v1141_v18, %v1085_v24 }
 0x1d1   : > { %v1161_v14 = vpop.f32.mrf.mxu0 }
 0x1d2   : > { %v1121_v16 = vpop.f32.mrf.mxu2  ;;  %v1166_v42 = vadd.f32 %v1161_v14, %v1086_v37 }
 0x1d3   : > { %v1164_v19 = vadd.f32 %v1121_v16, %v1084_v15  ;;  %v2975_v16 = vld [vmem:[%s4426_s4 + $0x10] sm:$0xff] }
 0x1d5   : > { %v1201_v22 = vpop.f32.mrf.mxu1 }
 0x1d6   : > { %v1244_v25 = vadd.f32 %v1201_v22, %v1164_v19  ;;  %v1241_v39 = vpop.f32.mrf.mxu3 }
 0x1d7   : > { %v1246_v47 = vadd.f32 %v1241_v39, %v1166_v42 }
 0x1d9   : > { %v1281_v28 = vpop.f32.mrf.mxu0 }
 0x1da   : > { %v1324_v30 = vadd.f32 %v1281_v28, %v1244_v25  ;;  %v1221_v31 = vpop.f32.mrf.mxu2 }
 0x1db   : > { %v1245_v34 = vadd.f32 %v1221_v31, %v1165_v27 }
 0x1dc   : > { %v1333_v35 = vadd.f32 %v1331_v32, %v1324_v30 }
 0x1dd   : > { %v1301_v38 = vpop.f32.mrf.mxu1 }
 0x1de   : > { %v1336_v40 = vmax.f32 %v1333_v35, 0.0  ;;  %v1325_v41 = vadd.f32 %v1301_v38, %v1245_v34 }
 0x1e0   : > { %v1334_v43 = vadd.f32 %v1331_v32, %v1325_v41  ;;  %v1347_v45 = vmul.f32 %v1341_v36, %v1336_v40  ;;  %v2979_v36 = vld [vmem:[%s4426_s4 + $0x18] sm:$0xff] }
 0x1e2   : > { %v1337_v48 = vmax.f32 %v1334_v43, 0.0  ;;  %v1321_v49 = vpop.f32.mrf.mxu2  ;;  %1353 = vrot.lane.b32.xlu2 %v1347_v45, %s3264_s12 }
 0x1e3   : > { %v1326_v50 = vadd.f32 %v1321_v49, %v1246_v47  ;;  %v3134_v49 = vunpack.i.h.bf16 %v3608_v56 }
 0x1e4   : > { %v1348_v51 = vmul.f32 %v1342_v46, %v1337_v48 }
 0x1e5   : > { %v1335_v52 = vadd.f32 %v1331_v32, %v1326_v50  ;;  %v3673_v32 = vld [vmem:[%s4426_s4 + $0x28] sm:$0xff]  ;;  %v3133_v50 = vunpack.i.l.bf16 %v3608_v56 }
 0x1e6   : > { %1355 = vrot.lane.b32.xlu0 %v1348_v51, %s3264_s12 }
 0x1e7   : > { %v1338_v54 = vmax.f32 %v1335_v52, 0.0  ;;  %v2991_v52 = vld [vmem:[%s4426_s4 + $0x30] sm:$0xff]  ;;  %v2097_v56 = vsel %vm935_vm13, %v3133_v50, %v3134_v49 }
 0x1e9   : > { %v1349_v55 = vmul.f32 %v1343_v53, %v1338_v54 }
 0x1eb   : > { %1357 = vrot.lane.b32.xlu1 %v1349_v55, %s3264_s12 }
 0x23c   : > { %v1354_v57 = vpop.permute.xlu2 %1353 }
 0x23d   : > { %1365 = vst.msk [vmem:[#allocation3] sm:$0xff] %vm1364_vm5, %v1354_v57 }
 0x244   : > { %v1370_v58 = vld [vmem:[#allocation3] sm:$0xff] }
 0x245   : > { %1470 = vmatpush.msrb.mxu2 %v1370_v58 }
 0x246   : > { %2972 = vmatmul.msk.f32.vlgmr.msrb.gmra.mxu2 %vm640_vm8, %v3637_v3 }
 0x258   : > { %v1356_v61 = vpop.permute.xlu0 %1355 }
 0x259   : > { %v1359_v62 = vsel %vm308_vm4, %v1354_v57, %v1356_v61 }
 0x25a   : > { %v3145_v63 = vpack.i.bf16 %v1359_v62, %v1370_v58 }
 0x25c   : > { %3146 = vrot.lane.b32.xlu0 %v3145_v63, %s3249_s10  ;;  %3141 = vrot.lane.b32.xlu1 %v3145_v63, %s3258_s23 }
 0x25d   : > { %v1358_v0 = vpop.permute.xlu1 %1357  ;;  %3136 = vrot.lane.b32.xlu2 %v3145_v63, %s3260_s21 }
 0x25e   : > { %v1360_v33 = vsel %vm308_vm4, %v1356_v61, %v1358_v0 }
 0x25f   : > { %1368 = vst.msk [vmem:[#allocation3 + $0x10] sm:$0xff] %vm1367_vm7, %v1360_v33 }
 0x264   : > { %3161 = vrot.lane.b32.xlu0 %v3145_v63, %s3247_s25  ;;  %3156 = vrot.lane.b32.xlu1 %v3145_v63, %s3254_s18 }
 0x265   : > { %3151 = vrot.lane.b32.xlu2 %v3145_v63, %s3261_s26 }
 0x266   : > { %v1372_v1 = vld [vmem:[#allocation3 + $0x10] sm:$0xff] }
 0x267   : > { %v3175_v2 = vpack.i.bf16 %v3500_v44, %v1372_v1 }
 0x26c   : > { %1382 = vrot.lane.b32.xlu0 %v1372_v1, %s3260_s21  ;;  %3171 = vrot.lane.b32.xlu1 %v3145_v63, %s3252_s13  ;;  %s3265_s21 = smov 73  }
 0x26d   : > { %3166 = vrot.lane.b32.xlu2 %v3145_v63, %s4435_s22 }
 0x274   : > { %3176 = vrot.lane.b32.xlu0 %v3175_v2, %s3261_s26  ;;  %1600 = vrot.lane.b32.xlu1 %v1372_v1, %s3249_s10  ;;  %v2077_v2 = vld [vmem:[%s4428_s6] sm:$0xff]  ;;  %s3267_s10 = smov 55  }
 0x275   : > { %1521 = vrot.lane.b32.xlu2 %v1372_v1, %s3258_s23 }
 0x27c   : > { %1916 = vrot.lane.b32.xlu0 %v1372_v1, %s4435_s22  ;;  %1837 = vrot.lane.b32.xlu1 %v1372_v1, %s3247_s25  ;;  %s3268_s25 = smov 113  }
 0x27d   : > { %1758 = vrot.lane.b32.xlu2 %v1372_v1, %s3254_s18  ;;  %s3271_s18 = smov 93  }
 0x285   : > { %1995 = vrot.lane.b32.xlu2 %v1372_v1, %s3252_s13  ;;  %s3270_s13 = smov 111  }
 0x2b7   : > { %v3137_v44 = vpop.permute.xlu2 %3136 }
 0x2b8   : > { %v3139_v4 = vunpack.i.h.bf16 %v3137_v44  ;;  %v3138_v5 = vunpack.i.l.bf16 %v3137_v44 }
 0x2ba   : > { %v1384_v6 = vsel %vm634_vm9, %v3138_v5, %v3139_v4 }
 0x2bb   : > { %1407 = vmatpush.msra.mxu3 %v1384_v6 }
 0x2bc   : > { %2969 = vmatmul.msk.f32.vlgmr.msra.gmra.mxu3 %vm640_vm8, %v2968_v7 }
 0x2bd   : > { %1490 = vmatpush.msrb.mxu3 %v1359_v62  ;;  %v2999_v62 = vld [vmem:[%s4426_s4 + $0x40] sm:$0xff] }
 0x2bf   : > { %v3152_v8 = vpop.permute.xlu2 %3151 }
 0x2c0   : > { %v3154_v10 = vunpack.i.h.bf16 %v3152_v8  ;;  %v3153_v11 = vunpack.i.l.bf16 %v3152_v8 }
 0x2c2   : > { %v1681_v17 = vsel %vm935_vm13, %v3153_v11, %v3154_v10 }
 0x2c4   : > { %2973 = vmatmul.msk.f32.vlgmr.msrb.gmra.mxu3 %vm640_vm8, %v3637_v3 }
 0x2c7   : > { %v3648_v9 = vpop.permute.xlu2 %3166 }
 0x2c8   : > { %v3169_v58 = vunpack.i.h.bf16 %v3648_v9  ;;  %v3168_v61 = vunpack.i.l.bf16 %v3648_v9 }
 0x2c9   : > { %v1472_v6 = vpop.f32.mrf.mxu2 }
 0x2ca   : > { %v1918_v33 = vsel %vm1175_vm15, %v3168_v61, %v3169_v58 }
 0x2ce   : > { %v3147_v12 = vpop.permute.xlu0 %3146  ;;  %v3142_v13 = vpop.permute.xlu1 %3141 }
 0x2cf   : > { %v3144_v14 = vunpack.i.h.bf16 %v3142_v13  ;;  %v1522_v15 = vpop.permute.xlu2 %1521  ;;  %v3143_v25 = vunpack.i.l.bf16 %v3142_v13  ;;  %v3149_v26 = vunpack.i.h.bf16 %v3147_v12  ;;  %v3148_v27 = vunpack.i.l.bf16 %v3147_v12 }
 0x2d0   : > { %1586 = vmatpush.msra.mxu3 %v1522_v15 }
 0x2d1   : > { %v1524_v18 = vsel %vm775_vm10, %v3144_v14, %v1522_v15  ;;  %2978 = vmatmul.msk.f32.vlgmr.msra.gmra.mxu3 %vm640_vm8, %v2975_v16  ;;  %v1523_v31 = vsel %vm775_vm10, %v3143_v25, %v3144_v14  ;;  %v1602_v34 = vsel %vm855_vm12, %v3148_v27, %v3149_v26  ;;  %vm2392_vm10 = vcmask 1045509  }
 0x2d2   : > { %1704 = vmatpush.msrb.mxu3 %v1681_v17  ;;  %1566 = vmatpush.msra.mxu2 %v1524_v18 }
 0x2d3   : > { %2977 = vmatmul.msk.f32.vlgmr.msra.gmra.mxu2 %vm640_vm8, %v2975_v16 }
 0x2d6   : > { %v3162_v19 = vpop.permute.xlu0 %3161  ;;  %v3157_v20 = vpop.permute.xlu1 %3156 }
 0x2d7   : > { %v3159_v21 = vunpack.i.h.bf16 %v3157_v20  ;;  %v1759_v22 = vpop.permute.xlu2 %1758  ;;  %v3158_v35 = vunpack.i.l.bf16 %v3157_v20  ;;  %v3164_v43 = vunpack.i.h.bf16 %v3162_v19  ;;  %v3163_v45 = vunpack.i.l.bf16 %v3162_v19 }
 0x2d9   : > { %v1761_v24 = vsel %vm1015_vm11, %v3159_v21, %v1759_v22  ;;  %2984 = vmatmul.msk.f32.vlgmr.msrb.gmra.mxu3 %vm640_vm8, %v3660_v23  ;;  %v1760_v41 = vsel %vm1015_vm11, %v3158_v35, %v3159_v21  ;;  %v1839_v53 = vsel %vm1095_vm14, %v3163_v45, %v3164_v43  ;;  %vm2395_vm11 = vcmask 1046534  }
 0x2da   : > { %1803 = vmatpush.msra.mxu3 %v1761_v24 }
 0x2de   : > { %v1383_v28 = vpop.permute.xlu0 %1382  ;;  %v3665_v29 = vpop.permute.xlu1 %3171 }
 0x2df   : > { %1447 = vmatpush.msrb.mxu1 %v1383_v28  ;;  %v1385_v30 = vsel %vm634_vm9, %v3139_v4, %v1383_v28  ;;  %v3174_v46 = vunpack.i.h.bf16 %v3665_v29  ;;  %v3173_v47 = vunpack.i.l.bf16 %v3665_v29  ;;  %vm2389_vm9 = vcmask 1044484  }
 0x2e0   : > { %1427 = vmatpush.msrb.mxu0 %v1385_v30  ;;  %2971 = vmatmul.msk.f32.vlgmr.msrb.gmra.mxu1 %vm640_vm8, %v2968_v7 }
 0x2e1   : > { %1546 = vmatpush.msra.mxu1 %v1523_v31  ;;  %2970 = vmatmul.msk.f32.vlgmr.msrb.gmra.mxu0 %vm640_vm8, %v2968_v7  ;;  %v1997_v54 = vsel %vm1255_vm3, %v3173_v47, %v3174_v46 }
 0x2e2   : > { %1510 = vmatpush.msra.mxu0 %v1372_v1  ;;  %2989 = vmatmul.msk.f32.vlgmr.msra.gmra.mxu3 %vm640_vm8, %v3673_v32  ;;  %v2995_v1 = vld [vmem:[%s4426_s4 + $0x38] sm:$0xff] }
 0x2e4   : > { %1625 = vmatpush.msrb.mxu0 %v1602_v34 }
 0x2e6   : > { %v3177_v37 = vpop.permute.xlu0 %3176  ;;  %v1601_v38 = vpop.permute.xlu1 %1600 }
 0x2e7   : > { %v3178_v39 = vunpack.i.l.bf16 %v3177_v37  ;;  %1665 = vmatpush.msrb.mxu2 %v1601_v38  ;;  %v1603_v40 = vsel %vm855_vm12, %v3149_v26, %v1601_v38  ;;  %v3179_v57 = vunpack.i.h.bf16 %v3177_v37  ;;  %vm2449_vm12 = vcmask 7168  }
 0x2e8   : > { %2976 = vmatmul.msk.f32.vlgmr.msra.gmra.mxu1 %vm640_vm8, %v2975_v16  ;;  %2982 = vmatmul.msk.f32.vlgmr.msrb.gmra.mxu2 %vm640_vm8, %v2979_v36 }
 0x2e9   : > { %1645 = vmatpush.msrb.mxu1 %v1603_v40  ;;  %1783 = vmatpush.msra.mxu2 %v1760_v41  ;;  %v1682_v42 = vsel %vm935_vm13, %v3154_v10, %v3178_v39  ;;  %v2096_v0 = vsel %vm935_vm13, %v3179_v57, %v3133_v50 }
 0x2ea   : > { %2974 = vmatmul.msk.f32.vlgmr.msra.gmra.mxu0 %vm640_vm8, %v3637_v3  ;;  %v1996_v3 = vpop.permute.xlu2 %1995 }
 0x2eb   : > { %1744 = vmatpush.msra.mxu1 %v3178_v39  ;;  %1724 = vmatpush.msra.mxu0 %v1682_v42  ;;  %v1998_v44 = vsel %vm1255_vm3, %v3174_v46, %v1996_v3 }
 0x2ee   : > { %v1838_v48 = vpop.permute.xlu1 %1837  ;;  %v1917_v55 = vpop.permute.xlu0 %1916 }
 0x2ef   : > { %v1840_v51 = vsel %vm1095_vm14, %v3164_v43, %v1838_v48  ;;  %1902 = vmatpush.msrb.mxu3 %v1838_v48  ;;  %v1919_v63 = vsel %vm1175_vm15, %v3169_v58, %v1917_v55 }
 0x2f0   : > { %2981 = vmatmul.msk.f32.vlgmr.msrb.gmra.mxu1 %vm640_vm8, %v2979_v36  ;;  %2988 = vmatmul.msk.f32.vlgmr.msra.gmra.mxu2 %vm640_vm8, %v3673_v32 }
 0x2f1   : > { %1862 = vmatpush.msrb.mxu1 %v1839_v53  ;;  %1882 = vmatpush.msrb.mxu2 %v1840_v51 }
 0x2f2   : > { %2994 = vmatmul.msk.f32.vlgmr.msrb.gmra.mxu3 %vm640_vm8, %v2991_v52  ;;  %2980 = vmatmul.msk.f32.vlgmr.msrb.gmra.mxu0 %vm640_vm8, %v2979_v36 }
 0x2f3   : > { %2020 = vmatpush.msra.mxu3 %v1997_v54  ;;  %1823 = vmatpush.msrb.mxu0 %v1759_v22 }
 0x2f4   : > { %1981 = vmatpush.msra.mxu2 %v1917_v55 }
 0x2f5   : > { %2139 = vmatpush.msrb.mxu3 %v2097_v56 }
 0x2f8   : > { %2986 = vmatmul.msk.f32.vlgmr.msra.gmra.mxu1 %vm640_vm8, %v3660_v23  ;;  %2993 = vmatmul.msk.f32.vlgmr.msrb.gmra.mxu2 %vm640_vm8, %v2991_v52 }
 0x2f9   : > { %1961 = vmatpush.msra.mxu1 %v1919_v63  ;;  %2119 = vmatpush.msrb.mxu2 %v2096_v0 }
 0x2fa   : > { %3000 = vmatmul.msk.f32.vlgmr.msra.gmra.mxu3 %vm640_vm8, %v2999_v62  ;;  %2985 = vmatmul.msk.f32.vlgmr.msra.gmra.mxu0 %vm640_vm8, %v3660_v23 }
 0x2fb   : > { %1941 = vmatpush.msra.mxu0 %v1918_v33 }
 0x300   : > { %2992 = vmatmul.msk.f32.vlgmr.msrb.gmra.mxu1 %vm640_vm8, %v2991_v52  ;;  %2998 = vmatmul.msk.f32.vlgmr.msra.gmra.mxu2 %vm640_vm8, %v2995_v1 }
 0x301   : > { %2060 = vmatpush.msrb.mxu1 %v1996_v3 }
 0x302   : > { %3004 = vmatmul.msk.f32.vlgmr.msrb.gmra.mxu3 %vm640_vm8, %v2077_v2  ;;  %2990 = vmatmul.msk.f32.vlgmr.msrb.gmra.mxu0 %vm640_vm8, %v3673_v32 }
 0x303   : > { %2040 = vmatpush.msrb.mxu0 %v1998_v44 }
 0x308   : > { %2997 = vmatmul.msk.f32.vlgmr.msra.gmra.mxu1 %vm640_vm8, %v2995_v1  ;;  %3003 = vmatmul.msk.f32.vlgmr.msrb.gmra.mxu2 %vm640_vm8, %v2077_v2 }
 0x30a   : > { %2996 = vmatmul.msk.f32.vlgmr.msra.gmra.mxu0 %vm640_vm8, %v2995_v1 }
 0x30b   : > { %2159 = vmatpush.msra.mxu0 %v3134_v49 }
 0x310   : > { %3002 = vmatmul.msk.f32.vlgmr.msrb.gmra.mxu1 %vm640_vm8, %v2999_v62 }
 0x312   : > { %3001 = vmatmul.msk.f32.vlgmr.msrb.gmra.mxu0 %vm640_vm8, %v2999_v62 }
 0x31a   : > { %3005 = vmatmul.msk.f32.vlgmr.msra.gmra.mxu0 %vm640_vm8, %v2077_v2  ;;  %vm2381_vm8 = vcmask 1040384  }
 0x33f   : > { %v1409_v4 = vpop.f32.mrf.mxu3 }
 0x340   : > { %v1473_v28 = vadd.f32 %v1472_v6, %v1409_v4 }
 0x347   : > { %v1492_v5 = vpop.f32.mrf.mxu3 }
 0x354   : > { %v1588_v7 = vpop.f32.mrf.mxu3 }
 0x356   : > { %v1568_v10 = vpop.f32.mrf.mxu2 }
 0x35c   : > { %v1706_v14 = vpop.f32.mrf.mxu3 }
 0x35d   : > { %v1449_v8 = vpop.f32.mrf.mxu1 }
 0x35e   : > { %v1429_v9 = vpop.f32.mrf.mxu0 }
 0x35f   : > { %v1493_v11 = vadd.f32 %v1492_v5, %v1429_v9 }
 0x361   : > { %v1592_v12 = vadd.f32 %v1568_v10, %v1493_v11 }
 0x365   : > { %v1548_v13 = vpop.f32.mrf.mxu1  ;;  %v1805_v23 = vpop.f32.mrf.mxu3 }
 0x366   : > { %v1591_v30 = vadd.f32 %v1548_v13, %v1473_v28 }
 0x367   : > { %v1512_v15 = vpop.f32.mrf.mxu0 }
 0x368   : > { %v1513_v16 = vadd.f32 %v1512_v15, %v1449_v8 }
 0x36a   : > { %v1593_v17 = vadd.f32 %v1588_v7, %v1513_v16 }
 0x36b   : > { %v1667_v18 = vpop.f32.mrf.mxu2 }
 0x36c   : > { %v1672_v19 = vadd.f32 %v1667_v18, %v1593_v17 }
 0x36d   : > { %v1647_v20 = vpop.f32.mrf.mxu1 }
 0x36e   : > { %v1671_v21 = vadd.f32 %v1647_v20, %v1592_v12 }
 0x36f   : > { %v1627_v22 = vpop.f32.mrf.mxu0 }
 0x370   : > { %v1670_v35 = vadd.f32 %v1627_v22, %v1591_v30 }
 0x372   : > { %v1749_v39 = vadd.f32 %v1706_v14, %v1670_v35 }
 0x373   : > { %v1785_v24 = vpop.f32.mrf.mxu2 }
 0x374   : > { %v1828_v43 = vadd.f32 %v1785_v24, %v1749_v39 }
 0x375   : > { %v1746_v25 = vpop.f32.mrf.mxu1  ;;  %v1904_v32 = vpop.f32.mrf.mxu3 }
 0x376   : > { %v1751_v26 = vadd.f32 %v1746_v25, %v1672_v19 }
 0x377   : > { %v1726_v27 = vpop.f32.mrf.mxu0 }
 0x378   : > { %v1750_v29 = vadd.f32 %v1726_v27, %v1671_v21 }
 0x37a   : > { %v1829_v31 = vadd.f32 %v1805_v23, %v1750_v29 }
 0x37b   : > { %v1884_v34 = vpop.f32.mrf.mxu2 }
 0x37c   : > { %v1908_v36 = vadd.f32 %v1884_v34, %v1829_v31 }
 0x37d   : > { %v1864_v37 = vpop.f32.mrf.mxu1  ;;  %v2022_v46 = vpop.f32.mrf.mxu3 }
 0x37e   : > { %v1907_v47 = vadd.f32 %v1864_v37, %v1828_v43 }
 0x37f   : > { %v1825_v38 = vpop.f32.mrf.mxu0 }
 0x380   : > { %v1830_v40 = vadd.f32 %v1825_v38, %v1751_v26 }
 0x382   : > { %v1909_v41 = vadd.f32 %v1904_v32, %v1830_v40 }
 0x383   : > { %v1983_v42 = vpop.f32.mrf.mxu2 }
 0x384   : > { %v1988_v45 = vadd.f32 %v1983_v42, %v1909_v41 }
 0x385   : > { %v1963_v48 = vpop.f32.mrf.mxu1  ;;  %v2141_v57 = vpop.f32.mrf.mxu3 }
 0x386   : > { %v1987_v55 = vadd.f32 %v1963_v48, %v1908_v36  ;;  %v2142_v0 = vadd.f32 %v2141_v57, %v3613_v60 }
 0x387   : > { %v1943_v49 = vpop.f32.mrf.mxu0 }
 0x388   : > { %v1986_v50 = vadd.f32 %v1943_v49, %v1907_v47 }
 0x38a   : > { %v2065_v51 = vadd.f32 %v2022_v46, %v1986_v50 }
 0x38b   : > { %v2121_v52 = vpop.f32.mrf.mxu2 }
 0x38c   : > { %v2074_v53 = vadd.f32 %v3611_v59, %v2065_v51  ;;  %v2122_v54 = vadd.f32 %v2121_v52, %v3613_v60 }
 0x38d   : > { %v2062_v63 = vpop.f32.mrf.mxu1 }
 0x38e   : > { %v2164_v56 = vadd.f32 %v2122_v54, %v2074_v53  ;;  %v2067_v2 = vadd.f32 %v2062_v63, %v1988_v45 }
 0x38f   : > { %v2042_v58 = vpop.f32.mrf.mxu0 }
 0x390   : > { %v3739_v61 = vmax.f32 %v2164_v56, 0.0  ;;  %v2066_v62 = vadd.f32 %v2042_v58, %v1987_v55  ;;  %v2076_v5 = vadd.f32 %v3611_v59, %v2067_v2 }
 0x392   : > { %v2075_v33 = vadd.f32 %v3611_v59, %v2066_v62  ;;  %v2178_v1 = vperm.slane %v3739_v61, 0  ;;  %v2172_v12 = vrot.slane %v3739_v61, 2  ;;  %v2171_v13 = vrot.slane %v3739_v61, 1 }
 0x393   : > { %v2173_v14 = vrot.slane %v3739_v61, 3  ;;  %v2175_v25 = vrot.slane %v3739_v61, 5  ;;  %v2174_v26 = vrot.slane %v3739_v61, 4  ;;  %v2176_v27 = vrot.slane %v3739_v61, 6 }
 0x394   : > { %v2165_v3 = vadd.f32 %v2142_v0, %v2075_v33  ;;  %2251 = vrot.lane.b32.xlu2 %v2178_v1, %s3265_s21  ;;  %2219 = vrot.lane.b32.xlu0 %v2178_v1, %s4435_s22  ;;  %v3785_v16 = vperm.slane %v2172_v12, 0  ;;  %v3787_v17 = vperm.slane %v2171_v13, 0  ;;  %v2177_v38 = vrot.slane %v3739_v61, 7 }
 0x395   : > { %2186 = vrot.lane.b32.xlu1 %v2178_v1, %s3261_s26  ;;  %v3799_v20 = vperm.slane %v2173_v14, 0  ;;  %v2183_v30 = vperm.slane %v2175_v25, 0  ;;  %v2182_v31 = vperm.slane %v2174_v26, 0  ;;  %v2184_v34 = vperm.slane %v2176_v27, 0 }
 0x396   : > { %v3747_v44 = vmax.f32 %v2165_v3, 0.0  ;;  %v2185_v39 = vperm.slane %v2177_v38, 0 }
 0x397   : > { %v2161_v4 = vpop.f32.mrf.mxu0 }
 0x398   : > { %v2162_v6 = vadd.f32 %v2161_v4, %v3613_v60  ;;  %v3752_v8 = vrot.slane %v3747_v44, 7 }
 0x39a   : > { %v2166_v7 = vadd.f32 %v2162_v6, %v2076_v5  ;;  %v3761_v10 = vsel %vm2381_vm8, %v3739_v61, %v3752_v8  ;;  %v3766_v59 = vsel %vm321_vm0, %v3739_v61, %v3752_v8  ;;  %v3772_v60 = vsel %vm324_vm1, %v3739_v61, %v3752_v8 }
 0x39b   : > { %v3837_v29 = vsel %vm327_vm2, %v3739_v61, %v3752_v8  ;;  %v3842_v32 = vsel %vm2389_vm9, %v3739_v61, %v3752_v8  ;;  %v3847_v35 = vsel %vm2392_vm10, %v3739_v61, %v3752_v8  ;;  %v3854_v36 = vsel %vm2395_vm11, %v3739_v61, %v3752_v8 }
 0x39c   : > { %v3754_v9 = vmax.f32 %v2166_v7, 0.0  ;;  %2347 = vrot.lane.b32.xlu2 %v2178_v1, %s3264_s12  ;;  %2315 = vrot.lane.b32.xlu0 %v2178_v1, %s3266_s24 }
 0x39d   : > { %2283 = vrot.lane.b32.xlu1 %v2178_v1, %s3267_s10 }
 0x39e   : > { %v3775_v11 = vrot.slane %v3754_v9, 7  ;;  %v2770_v50 = vrot.slane %v3754_v9, 1  ;;  %v2776_v51 = vperm.slane %v3754_v9, 0  ;;  %v2772_v55 = vrot.slane %v3754_v9, 3 }
 0x39f   : > { %v2771_v56 = vrot.slane %v3754_v9, 2  ;;  %v2773_v58 = vrot.slane %v3754_v9, 4  ;;  %v2775_v1 = vrot.slane %v3754_v9, 6  ;;  %v2774_v2 = vrot.slane %v3754_v9, 5 }
 0x3a0   : > { %v3783_v15 = vsel %vm2381_vm8, %v3747_v44, %v3775_v11  ;;  %v3792_v18 = vsel %vm321_vm0, %v3747_v44, %v3775_v11  ;;  %v3797_v19 = vsel %vm324_vm1, %v3747_v44, %v3775_v11  ;;  %v3804_v21 = vsel %vm327_vm2, %v3747_v44, %v3775_v11 }
 0x3a1   : > { %v3809_v22 = vsel %vm2389_vm9, %v3747_v44, %v3775_v11  ;;  %v3818_v23 = vsel %vm2392_vm10, %v3747_v44, %v3775_v11  ;;  %v3823_v24 = vsel %vm2395_vm11, %v3747_v44, %v3775_v11  ;;  %vm2398_vm0 = vcmask 1046528  }
 0x3a2   : > { %v3832_v28 = vsel %vm2398_vm0, %v3775_v11, %v3747_v44  ;;  %v3859_v37 = vsel %vm2398_vm0, %v3752_v8, %v3739_v61  ;;  %vm2210_vm1 = vcmask 122880   ;;  %v2777_v52 = vperm.slane %v2770_v50, 0 }
 0x3a3   : > { %v2779_v61 = vperm.slane %v2772_v55, 0  ;;  %v2778_v62 = vperm.slane %v2771_v56, 0  ;;  %v2780_v63 = vperm.slane %v2773_v58, 0  ;;  %v3961_v4 = vperm.slane %v2775_v1, 0 }
 0x3a4   : > { %2190 = vrot.lane.b32.xlu0 %v3785_v16, %s3261_s26  ;;  %2188 = vrot.lane.b32.xlu2 %v3787_v17, %s3261_s26  ;;  %v3963_v5 = vperm.slane %v2774_v2, 0  ;;  %v2783_v6 = vperm.slane %v3775_v11, 0  ;;  %v2697_v38 = vperm.slane %v3783_v15, 0  ;;  %vm2745_vm2 = vcmask 23552  }
 0x3a5   : > { %2192 = vrot.lane.b32.xlu1 %v3799_v20, %s3261_s26 }
 0x3ac   : > { %2196 = vrot.lane.b32.xlu0 %v2183_v30, %s3261_s26  ;;  %2194 = vrot.lane.b32.xlu2 %v2182_v31, %s3261_s26 }
 0x3ad   : > { %2198 = vrot.lane.b32.xlu1 %v2184_v34, %s3261_s26 }
 0x3b4   : > { %2225 = vrot.lane.b32.xlu0 %v3799_v20, %s4435_s22  ;;  %2200 = vrot.lane.b32.xlu2 %v2185_v39, %s3261_s26  ;;  %s296_s26 = sand.u32 1, %s3234_s28  }
 0x3b5   : > { %2221 = vrot.lane.b32.xlu1 %v3787_v17, %s4435_s22 }
 0x3bc   : > { %2231 = vrot.lane.b32.xlu0 %v2184_v34, %s4435_s22  ;;  %2223 = vrot.lane.b32.xlu2 %v3785_v16, %s4435_s22 }
 0x3bd   : > { %2227 = vrot.lane.b32.xlu1 %v2182_v31, %s4435_s22 }
 0x3c4   : > { %2253 = vrot.lane.b32.xlu0 %v3787_v17, %s3265_s21  ;;  %2229 = vrot.lane.b32.xlu2 %v2183_v30, %s4435_s22 }
 0x3c5   : > { %2233 = vrot.lane.b32.xlu1 %v2185_v39, %s4435_s22  ;;  %s2930_s22 = sshll.u32 %s296_s26, 7 }
 0x3c6   : > { %s3900_s23 = scalar_lea.vmem [#allocation4], %s2930_s22  ;;  %s3012_s22 = sshll.u32 %s3346_s9, 7 }
 0x3c7   : > { %s2849_s9 = scalar_lea.sflag [#allocation5], %s296_s26 }
 0x3cc   : > { %2259 = vrot.lane.b32.xlu0 %v2182_v31, %s3265_s21  ;;  %2257 = vrot.lane.b32.xlu2 %v3799_v20, %s3265_s21 }
 0x3cd   : > { %2255 = vrot.lane.b32.xlu1 %v3785_v16, %s3265_s21 }
 0x3d4   : > { %2265 = vrot.lane.b32.xlu0 %v2185_v39, %s3265_s21  ;;  %2263 = vrot.lane.b32.xlu2 %v2184_v34, %s3265_s21 }
 0x3d5   : > { %2261 = vrot.lane.b32.xlu1 %v2183_v30, %s3265_s21  ;;  %s3275_s21 = smov 21  }
 0x3dc   : > { %2287 = vrot.lane.b32.xlu0 %v3785_v16, %s3267_s10  ;;  %2285 = vrot.lane.b32.xlu2 %v3787_v17, %s3267_s10 }
 0x3dd   : > { %2289 = vrot.lane.b32.xlu1 %v3799_v20, %s3267_s10 }
 0x3e4   : > { %2293 = vrot.lane.b32.xlu0 %v2183_v30, %s3267_s10  ;;  %2291 = vrot.lane.b32.xlu2 %v2182_v31, %s3267_s10 }
 0x3e5   : > { %2295 = vrot.lane.b32.xlu1 %v2184_v34, %s3267_s10 }
 0x3ec   : > { %2321 = vrot.lane.b32.xlu0 %v3799_v20, %s3266_s24  ;;  %2297 = vrot.lane.b32.xlu2 %v2185_v39, %s3267_s10  ;;  %s3277_s10 = smov 1  }
 0x3ed   : > { %2317 = vrot.lane.b32.xlu1 %v3787_v17, %s3266_s24 }
 0x3ee   : > { %v2252_v40 = vpop.permute.xlu2 %2251 }
 0x3ef   : > { %2275 = vst.msk [vmem:[%s3900_s23 + $0x2] sm:$0x1] %vm2210_vm1, %v2252_v40 }
 0x3f4   : > { %2327 = vrot.lane.b32.xlu0 %v2184_v34, %s3266_s24  ;;  %2319 = vrot.lane.b32.xlu2 %v3785_v16, %s3266_s24 }
 0x3f5   : > { %2323 = vrot.lane.b32.xlu1 %v2182_v31, %s3266_s24 }
 0x3f6   : > { %v2348_v41 = vpop.permute.xlu2 %2347 }
 0x3f7   : > { %2371 = vst.msk [vmem:[%s3900_s23 + $0x5] sm:$0x1] %vm2210_vm1, %v2348_v41 }
 0x3fc   : > { %2349 = vrot.lane.b32.xlu0 %v3787_v17, %s3264_s12  ;;  %2325 = vrot.lane.b32.xlu2 %v2183_v30, %s3266_s24  ;;  %v2480_v17 = vperm.slane %v3747_v44, 0 }
 0x3fd   : > { %2329 = vrot.lane.b32.xlu1 %v2185_v39, %s3266_s24  ;;  %s3276_s24 = smov 3  }
 0x3fe   : > { %v2189_v42 = vpop.permute.xlu2 %2188 }
 0x3ff   : > { %2212 = vst.msk [vmem:[%s3900_s23 + $0x10] sm:$0x1] %vm2210_vm1, %v2189_v42  ;;  %v2476_v42 = vrot.slane %v3747_v44, 3 }
 0x404   : > { %2355 = vrot.lane.b32.xlu0 %v2182_v31, %s3264_s12  ;;  %2353 = vrot.lane.b32.xlu2 %v3799_v20, %s3264_s12 }
 0x405   : > { %2351 = vrot.lane.b32.xlu1 %v3785_v16, %s3264_s12 }
 0x406   : > { %v2220_v43 = vpop.permute.xlu0 %2219  ;;  %v2195_v45 = vpop.permute.xlu2 %2194 }
 0x407   : > { %2243 = vst.msk [vmem:[%s3900_s23 + $0x1] sm:$0x1] %vm2210_vm1, %v2220_v43  ;;  %v2187_v46 = vpop.permute.xlu1 %2186 }
 0x408   : > { %2211 = vst.msk [vmem:[%s3900_s23] sm:$0x1] %vm2210_vm1, %v2187_v46  ;;  %v2698_v46 = vperm.slane %v3783_v15, 1  ;;  %v2479_v15 = vrot.slane %v3747_v44, 6 }
 0x409   : > { %2215 = vst.msk [vmem:[%s3900_s23 + $0x40] sm:$0x1] %vm2210_vm1, %v2195_v45  ;;  %v2478_v45 = vrot.slane %v3747_v44, 5 }
 0x40c   : > { %2361 = vrot.lane.b32.xlu0 %v2185_v39, %s3264_s12  ;;  %2359 = vrot.lane.b32.xlu2 %v2184_v34, %s3264_s12  ;;  %v2475_v34 = vrot.slane %v3747_v44, 2 }
 0x40d   : > { %2357 = vrot.lane.b32.xlu1 %v2183_v30, %s3264_s12  ;;  %s3269_s12 = smov 95  }
 0x40e   : > { %v2316_v47 = vpop.permute.xlu0 %2315  ;;  %v2201_v48 = vpop.permute.xlu2 %2200  ;;  %v4009_v39 = vperm.slane %v2475_v34, 0 }
 0x40f   : > { %2339 = vst.msk [vmem:[%s3900_s23 + $0x4] sm:$0x1] %vm2210_vm1, %v2316_v47  ;;  %v2284_v49 = vpop.permute.xlu1 %2283  ;;  %v4024_v47 = vperm.slane %v2476_v42, 0 }
 0x410   : > { %2307 = vst.msk [vmem:[%s3900_s23 + $0x3] sm:$0x1] %vm2210_vm1, %v2284_v49 }
 0x411   : > { %2218 = vst.msk [vmem:[%s3900_s23 + $0x70] sm:$0x1] %vm2210_vm1, %v2201_v48  ;;  %v4026_v48 = vperm.slane %v2478_v45, 0 }
 0x414   : > { %2784 = vrot.lane.b32.xlu0 %v2776_v51, %s3268_s25  ;;  %2816 = vrot.lane.b32.xlu2 %v2776_v51, %s3269_s12  ;;  %v2474_v51 = vrot.slane %v3747_v44, 1 }
 0x415   : > { %2786 = vrot.lane.b32.xlu1 %v2777_v52, %s3268_s25 }
 0x416   : > { %v2191_v53 = vpop.permute.xlu0 %2190  ;;  %v2224_v54 = vpop.permute.xlu2 %2223 }
 0x417   : > { %v2193_v57 = vpop.permute.xlu1 %2192  ;;  %2213 = vst.msk [vmem:[%s3900_s23 + $0x20] sm:$0x1] %vm2210_vm1, %v2191_v53  ;;  %v4041_v53 = vperm.slane %v2474_v51, 0 }
 0x418   : > { %2214 = vst.msk [vmem:[%s3900_s23 + $0x30] sm:$0x1] %vm2210_vm1, %v2193_v57  ;;  %v2477_v57 = vrot.slane %v3747_v44, 4 }
 0x419   : > { %2245 = vst.msk [vmem:[%s3900_s23 + $0x21] sm:$0x1] %vm2210_vm1, %v2224_v54  ;;  %v4043_v54 = vperm.slane %v2479_v15, 0 }
 0x41c   : > { %2790 = vrot.lane.b32.xlu0 %v2779_v61, %s3268_s25  ;;  %2788 = vrot.lane.b32.xlu2 %v2778_v62, %s3268_s25 }
 0x41d   : > { %2792 = vrot.lane.b32.xlu1 %v2780_v63, %s3268_s25 }
 0x41e   : > { %v2197_v0 = vpop.permute.xlu0 %2196  ;;  %v2230_v33 = vpop.permute.xlu2 %2229 }
 0x41f   : > { %v2199_v3 = vpop.permute.xlu1 %2198  ;;  %2216 = vst.msk [vmem:[%s3900_s23 + $0x50] sm:$0x1] %vm2210_vm1, %v2197_v0  ;;  %v4073_v0 = vperm.slane %v3752_v8, 0 }
 0x420   : > { %2217 = vst.msk [vmem:[%s3900_s23 + $0x60] sm:$0x1] %vm2210_vm1, %v2199_v3 }
 0x421   : > { %2248 = vst.msk [vmem:[%s3900_s23 + $0x51] sm:$0x1] %vm2210_vm1, %v2230_v33 }
 0x424   : > { %2796 = vrot.lane.b32.xlu0 %v3961_v4, %s3268_s25  ;;  %2794 = vrot.lane.b32.xlu2 %v3963_v5, %s3268_s25 }
 0x425   : > { %2798 = vrot.lane.b32.xlu1 %v2783_v6, %s3268_s25 }
 0x426   : > { %v2226_v7 = vpop.permute.xlu0 %2225  ;;  %v2258_v9 = vpop.permute.xlu2 %2257 }
 0x427   : > { %2246 = vst.msk [vmem:[%s3900_s23 + $0x31] sm:$0x1] %vm2210_vm1, %v2226_v7  ;;  %v2222_v12 = vpop.permute.xlu1 %2221 }
 0x428   : > { %2244 = vst.msk [vmem:[%s3900_s23 + $0x11] sm:$0x1] %vm2210_vm1, %v2222_v12 }
 0x429   : > { %2278 = vst.msk [vmem:[%s3900_s23 + $0x32] sm:$0x1] %vm2210_vm1, %v2258_v9 }
 0x42c   : > { %2818 = vrot.lane.b32.xlu0 %v2777_v52, %s3269_s12  ;;  %2822 = vrot.lane.b32.xlu2 %v2779_v61, %s3269_s12  ;;  %v4058_v61 = vperm.slane %v2477_v57, 0 }
 0x42d   : > { %2820 = vrot.lane.b32.xlu1 %v2778_v62, %s3269_s12 }
 0x42e   : > { %v2232_v13 = vpop.permute.xlu0 %2231  ;;  %v2264_v14 = vpop.permute.xlu2 %2263 }
 0x42f   : > { %2249 = vst.msk [vmem:[%s3900_s23 + $0x61] sm:$0x1] %vm2210_vm1, %v2232_v13  ;;  %v2228_v16 = vpop.permute.xlu1 %2227 }
 0x430   : > { %2247 = vst.msk [vmem:[%s3900_s23 + $0x41] sm:$0x1] %vm2210_vm1, %v2228_v16 }
 0x431   : > { %2281 = vst.msk [vmem:[%s3900_s23 + $0x62] sm:$0x1] %vm2210_vm1, %v2264_v14 }
 0x434   : > { %2824 = vrot.lane.b32.xlu0 %v2780_v63, %s3269_s12  ;;  %2488 = vrot.lane.b32.xlu2 %v2480_v17, %s3270_s13 }
 0x435   : > { %2520 = vrot.lane.b32.xlu1 %v2480_v17, %s3271_s18 }
 0x436   : > { %v2254_v20 = vpop.permute.xlu0 %2253  ;;  %v2286_v25 = vpop.permute.xlu2 %2285 }
 0x437   : > { %2276 = vst.msk [vmem:[%s3900_s23 + $0x12] sm:$0x1] %vm2210_vm1, %v2254_v20  ;;  %v2234_v26 = vpop.permute.xlu1 %2233 }
 0x438   : > { %2250 = vst.msk [vmem:[%s3900_s23 + $0x71] sm:$0x1] %vm2210_vm1, %v2234_v26 }
 0x439   : > { %2308 = vst.msk [vmem:[%s3900_s23 + $0x13] sm:$0x1] %vm2210_vm1, %v2286_v25 }
 0x43c   : > { %2552 = vrot.lane.b32.xlu0 %v2480_v17, %s3272_s17  ;;  %2584 = vrot.lane.b32.xlu2 %v2480_v17, %s3273_s19 }
 0x43d   : > { %2616 = vrot.lane.b32.xlu1 %v2480_v17, %s3274_s20 }
 0x43e   : > { %v2260_v27 = vpop.permute.xlu0 %2259  ;;  %v2292_v30 = vpop.permute.xlu2 %2291 }
 0x43f   : > { %2279 = vst.msk [vmem:[%s3900_s23 + $0x42] sm:$0x1] %vm2210_vm1, %v2260_v27  ;;  %v2256_v31 = vpop.permute.xlu1 %2255 }
 0x440   : > { %2277 = vst.msk [vmem:[%s3900_s23 + $0x22] sm:$0x1] %vm2210_vm1, %v2256_v31 }
 0x441   : > { %2311 = vst.msk [vmem:[%s3900_s23 + $0x43] sm:$0x1] %vm2210_vm1, %v2292_v30 }
 0x444   : > { %2648 = vrot.lane.b32.xlu0 %v2480_v17, %s3275_s21  ;;  %2713 = vrot.lane.b32.xlu2 %v2697_v38, %s3276_s24 }
 0x445   : > { %2492 = vrot.lane.b32.xlu1 %v4009_v39, %s3270_s13 }
 0x446   : > { %v2266_v40 = vpop.permute.xlu0 %2265  ;;  %v2298_v41 = vpop.permute.xlu2 %2297 }
 0x447   : > { %2282 = vst.msk [vmem:[%s3900_s23 + $0x72] sm:$0x1] %vm2210_vm1, %v2266_v40  ;;  %v2262_v43 = vpop.permute.xlu1 %2261 }
 0x448   : > { %2280 = vst.msk [vmem:[%s3900_s23 + $0x52] sm:$0x1] %vm2210_vm1, %v2262_v43 }
 0x449   : > { %2314 = vst.msk [vmem:[%s3900_s23 + $0x73] sm:$0x1] %vm2210_vm1, %v2298_v41 }
 0x44c   : > { %2715 = vrot.lane.b32.xlu0 %v2698_v46, %s3276_s24  ;;  %2494 = vrot.lane.b32.xlu2 %v4024_v47, %s3270_s13 }
 0x44d   : > { %2498 = vrot.lane.b32.xlu1 %v4026_v48, %s3270_s13 }
 0x44e   : > { %v2288_v49 = vpop.permute.xlu0 %2287  ;;  %v2320_v50 = vpop.permute.xlu2 %2319 }
 0x44f   : > { %2309 = vst.msk [vmem:[%s3900_s23 + $0x23] sm:$0x1] %vm2210_vm1, %v2288_v49  ;;  %v2290_v52 = vpop.permute.xlu1 %2289 }
 0x450   : > { %2310 = vst.msk [vmem:[%s3900_s23 + $0x33] sm:$0x1] %vm2210_vm1, %v2290_v52  ;;  %v2401_v52 = vperm.slane %v3761_v10, 0 }
 0x451   : > { %2341 = vst.msk [vmem:[%s3900_s23 + $0x24] sm:$0x1] %vm2210_vm1, %v2320_v50 }
 0x454   : > { %2490 = vrot.lane.b32.xlu0 %v4041_v53, %s3270_s13  ;;  %2500 = vrot.lane.b32.xlu2 %v4043_v54, %s3270_s13 }
 0x455   : > { %2526 = vrot.lane.b32.xlu1 %v4024_v47, %s3271_s18 }
 0x456   : > { %v2294_v55 = vpop.permute.xlu0 %2293  ;;  %v2326_v56 = vpop.permute.xlu2 %2325 }
 0x457   : > { %2312 = vst.msk [vmem:[%s3900_s23 + $0x53] sm:$0x1] %vm2210_vm1, %v2294_v55  ;;  %v2296_v58 = vpop.permute.xlu1 %2295 }
 0x458   : > { %2313 = vst.msk [vmem:[%s3900_s23 + $0x63] sm:$0x1] %vm2210_vm1, %v2296_v58 }
 0x459   : > { %2344 = vst.msk [vmem:[%s3900_s23 + $0x54] sm:$0x1] %vm2210_vm1, %v2326_v56  ;;  %v2684_v56 = vrot.slane %v3792_v18, 1  ;;  %v2686_v18 = vrot.slane %v3797_v19, 2 }
 0x45c   : > { %2496 = vrot.lane.b32.xlu0 %v4058_v61, %s3270_s13  ;;  %2522 = vrot.lane.b32.xlu2 %v4041_v53, %s3271_s18 }
 0x45d   : > { %2532 = vrot.lane.b32.xlu1 %v4043_v54, %s3271_s18 }
 0x45e   : > { %v2322_v44 = vpop.permute.xlu0 %2321  ;;  %v2354_v62 = vpop.permute.xlu2 %2353 }
 0x45f   : > { %2342 = vst.msk [vmem:[%s3900_s23 + $0x34] sm:$0x1] %vm2210_vm1, %v2322_v44  ;;  %v2318_v63 = vpop.permute.xlu1 %2317 }
 0x460   : > { %2340 = vst.msk [vmem:[%s3900_s23 + $0x14] sm:$0x1] %vm2210_vm1, %v2318_v63 }
 0x461   : > { %2374 = vst.msk [vmem:[%s3900_s23 + $0x35] sm:$0x1] %vm2210_vm1, %v2354_v62  ;;  %v2702_v62 = vperm.slane %v2686_v18, 1 }
 0x464   : > { %2502 = vrot.lane.b32.xlu0 %v4073_v0, %s3270_s13  ;;  %2528 = vrot.lane.b32.xlu2 %v4058_v61, %s3271_s18  ;;  %s2860_s13 = scalar_lea.hbm %s4430_s8, %s3012_s22 }
 0x465   : > { %2554 = vrot.lane.b32.xlu1 %v4041_v53, %s3272_s17 }
 0x466   : > { %v2328_v33 = vpop.permute.xlu0 %2327  ;;  %v2360_v1 = vpop.permute.xlu2 %2359 }
 0x467   : > { %2345 = vst.msk [vmem:[%s3900_s23 + $0x64] sm:$0x1] %vm2210_vm1, %v2328_v33  ;;  %v2324_v2 = vpop.permute.xlu1 %2323 }
 0x468   : > { %2343 = vst.msk [vmem:[%s3900_s23 + $0x44] sm:$0x1] %vm2210_vm1, %v2324_v2 }
 0x469   : > { %2377 = vst.msk [vmem:[%s3900_s23 + $0x65] sm:$0x1] %vm2210_vm1, %v2360_v1  ;;  %v2690_v1 = vrot.slane %v3809_v22, 4 }
 0x46c   : > { %2524 = vrot.lane.b32.xlu0 %v4009_v39, %s3271_s18  ;;  %2534 = vrot.lane.b32.xlu2 %v4073_v0, %s3271_s18 }
 0x46d   : > { %2560 = vrot.lane.b32.xlu1 %v4058_v61, %s3272_s17 }
 0x46e   : > { %v2350_v8 = vpop.permute.xlu0 %2349  ;;  %v2817_v3 = vpop.permute.xlu2 %2816 }
 0x46f   : > { %2372 = vst.msk [vmem:[%s3900_s23 + $0x15] sm:$0x1] %vm2210_vm1, %v2350_v8  ;;  %v2330_v7 = vpop.permute.xlu1 %2329 }
 0x470   : > { %2346 = vst.msk [vmem:[%s3900_s23 + $0x74] sm:$0x1] %vm2210_vm1, %v2330_v7 }
 0x471   : > { %2840 = vst.msk [vmem:[%s3900_s23 + $0xf] sm:$0x1] %vm2210_vm1, %v2817_v3  ;;  %v2705_v3 = vperm.slane %v2690_v1, 0 }
 0x474   : > { %2530 = vrot.lane.b32.xlu0 %v4026_v48, %s3271_s18  ;;  %2556 = vrot.lane.b32.xlu2 %v4009_v39, %s3272_s17  ;;  %s2861_s18 = sshll.u32 %s3900_s23, 4  ;;  %s2862_s18 = int_to_ptr.vmem [resolvable:$true] %s2861_s18 }
 0x475   : > { %2566 = vrot.lane.b32.xlu1 %v4073_v0, %s3272_s17 }
 0x476   : > { %v2356_v9 = vpop.permute.xlu0 %2355  ;;  %v2789_v12 = vpop.permute.xlu2 %2788 }
 0x477   : > { %2375 = vst.msk [vmem:[%s3900_s23 + $0x45] sm:$0x1] %vm2210_vm1, %v2356_v9  ;;  %v2352_v13 = vpop.permute.xlu1 %2351  ;;  %v2692_v9 = vrot.slane %v3818_v23, 5 }
 0x478   : > { %2373 = vst.msk [vmem:[%s3900_s23 + $0x25] sm:$0x1] %vm2210_vm1, %v2352_v13  ;;  %v2706_v13 = vperm.slane %v2690_v1, 1 }
 0x479   : > { %2810 = vst.msk [vmem:[%s3900_s23 + $0x2e] sm:$0x1] %vm2210_vm1, %v2789_v12  ;;  %v2707_v12 = vperm.slane %v2692_v9, 0 }
 0x47c   : > { %2558 = vrot.lane.b32.xlu0 %v4024_v47, %s3272_s17  ;;  %2562 = vrot.lane.b32.xlu2 %v4026_v48, %s3272_s17 }
 0x47d   : > { %2588 = vrot.lane.b32.xlu1 %v4009_v39, %s3273_s19 }
 0x47e   : > { %v2362_v14 = vpop.permute.xlu0 %2361  ;;  %v2795_v16 = vpop.permute.xlu2 %2794 }
 0x47f   : > { %2378 = vst.msk [vmem:[%s3900_s23 + $0x75] sm:$0x1] %vm2210_vm1, %v2362_v14  ;;  %v2358_v17 = vpop.permute.xlu1 %2357  ;;  %v2708_v14 = vperm.slane %v2692_v9, 1 }
 0x480   : > { %2376 = vst.msk [vmem:[%s3900_s23 + $0x55] sm:$0x1] %vm2210_vm1, %v2358_v17  ;;  %v2694_v17 = vrot.slane %v3823_v24, 6 }
 0x481   : > { %2813 = vst.msk [vmem:[%s3900_s23 + $0x5e] sm:$0x1] %vm2210_vm1, %v2795_v16 }
 0x484   : > { %2564 = vrot.lane.b32.xlu0 %v4043_v54, %s3272_s17  ;;  %2590 = vrot.lane.b32.xlu2 %v4024_v47, %s3273_s19  ;;  %s2863_s17 = sshll.u32 %s2860_s13, 4  ;;  %s2864_s17 = int_to_ptr.hbm [resolvable:$true] %s2863_s17 }
 0x485   : > { %2594 = vrot.lane.b32.xlu1 %v4026_v48, %s3273_s19 }
 0x486   : > { %v2785_v20 = vpop.permute.xlu0 %2784  ;;  %v2823_v25 = vpop.permute.xlu2 %2822 }
 0x487   : > { %2808 = vst.msk [vmem:[%s3900_s23 + $0xe] sm:$0x1] %vm2210_vm1, %v2785_v20  ;;  %v2787_v26 = vpop.permute.xlu1 %2786 }
 0x488   : > { %2809 = vst.msk [vmem:[%s3900_s23 + $0x1e] sm:$0x1] %vm2210_vm1, %v2787_v26  ;;  %v2710_v26 = vperm.slane %v2694_v17, 1 }
 0x489   : > { %2843 = vst.msk [vmem:[%s3900_s23 + $0x3f] sm:$0x1] %vm2210_vm1, %v2823_v25  ;;  %v2696_v25 = vrot.slane %v3832_v28, 7 }
 0x48c   : > { %2586 = vrot.lane.b32.xlu0 %v4041_v53, %s3273_s19  ;;  %2596 = vrot.lane.b32.xlu2 %v4043_v54, %s3273_s19 }
 0x48d   : > { %2622 = vrot.lane.b32.xlu1 %v4024_v47, %s3274_s20 }
 0x48e   : > { %v2791_v27 = vpop.permute.xlu0 %2790  ;;  %v2489_v30 = vpop.permute.xlu2 %2488 }
 0x48f   : > { %2811 = vst.msk [vmem:[%s3900_s23 + $0x3e] sm:$0x1] %vm2210_vm1, %v2791_v27  ;;  %v2793_v31 = vpop.permute.xlu1 %2792  ;;  %v2709_v27 = vperm.slane %v2694_v17, 0 }
 0x490   : > { %2812 = vst.msk [vmem:[%s3900_s23 + $0x4e] sm:$0x1] %vm2210_vm1, %v2793_v31 }
 0x491   : > { %2512 = vst.msk [vmem:[%s3900_s23 + $0x7] sm:$0x1] %vm2210_vm1, %v2489_v30  ;;  %v2711_v30 = vperm.slane %v2696_v25, 0 }
 0x494   : > { %2592 = vrot.lane.b32.xlu0 %v4058_v61, %s3273_s19  ;;  %2618 = vrot.lane.b32.xlu2 %v4041_v53, %s3274_s20 }
 0x495   : > { %2628 = vrot.lane.b32.xlu1 %v4043_v54, %s3274_s20 }
 0x496   : > { %v2797_v34 = vpop.permute.xlu0 %2796  ;;  %v2585_v38 = vpop.permute.xlu2 %2584 }
 0x497   : > { %2814 = vst.msk [vmem:[%s3900_s23 + $0x6e] sm:$0x1] %vm2210_vm1, %v2797_v34  ;;  %v2799_v40 = vpop.permute.xlu1 %2798  ;;  %v2384_v34 = vrot.slane %v3766_v59, 1 }
 0x498   : > { %2815 = vst.msk [vmem:[%s3900_s23 + $0x7e] sm:$0x1] %vm2210_vm1, %v2799_v40  ;;  %v2712_v40 = vperm.slane %v2696_v25, 1 }
 0x499   : > { %2608 = vst.msk [vmem:[%s3900_s23 + $0xa] sm:$0x1] %vm2210_vm1, %v2585_v38  ;;  %v2403_v38 = vperm.slane %v2384_v34, 0 }
 0x49c   : > { %2598 = vrot.lane.b32.xlu0 %v4073_v0, %s3273_s19  ;;  %2624 = vrot.lane.b32.xlu2 %v4058_v61, %s3274_s20  ;;  %s3194_s19 = sshra.s32 %s2864_s17, 4  ;;  %s3195_s19 = int_to_ptr.hbm [resolvable:$true] %s3194_s19 }
 0x49d   : > { %2650 = vrot.lane.b32.xlu1 %v4041_v53, %s3275_s21  ;;  %p3201_p0 = scmp.lt.s32.totalorder %s3195_s19, %s4430_s8 }
 0x49e   : > { %v2819_v41 = vpop.permute.xlu0 %2818  ;;  %v2714_v42 = vpop.permute.xlu2 %2713 }
 0x49f   : > { %2841 = vst.msk [vmem:[%s3900_s23 + $0x1f] sm:$0x1] %vm2210_vm1, %v2819_v41  ;;  %v2821_v43 = vpop.permute.xlu1 %2820  ;;  %v2404_v41 = vperm.slane %v2384_v34, 1 }
 0x4a0   : > { %2842 = vst.msk [vmem:[%s3900_s23 + $0x2f] sm:$0x1] %vm2210_vm1, %v2821_v43  ;;  %v2386_v43 = vrot.slane %v3772_v60, 2 }
 0x4a4   : > { %2620 = vrot.lane.b32.xlu0 %v4009_v39, %s3274_s20  ;;  %2630 = vrot.lane.b32.xlu2 %v4073_v0, %s3274_s20 }
 0x4a5   : > { %2656 = vrot.lane.b32.xlu1 %v4058_v61, %s3275_s21 }
 0x4a6   : > { %v2825_v45 = vpop.permute.xlu0 %2824  ;;  %v2495_v46 = vpop.permute.xlu2 %2494 }
 0x4a7   : > { %2844 = vst.msk [vmem:[%s3900_s23 + $0x4f] sm:$0x1] %vm2210_vm1, %v2825_v45  ;;  %v2521_v49 = vpop.permute.xlu1 %2520 }
 0x4a8   : > { %2544 = vst.msk [vmem:[%s3900_s23 + $0x8] sm:$0x1] %vm2210_vm1, %v2521_v49  ;;  %v2406_v49 = vperm.slane %v2386_v43, 1 }
 0x4a9   : > { %2515 = vst.msk [vmem:[%s3900_s23 + $0x37] sm:$0x1] %vm2210_vm1, %v2495_v46  ;;  %v2388_v46 = vrot.slane %v3837_v29, 3 }
 0x4ac   : > { %2626 = vrot.lane.b32.xlu0 %v4026_v48, %s3274_s20  ;;  %2652 = vrot.lane.b32.xlu2 %v4009_v39, %s3275_s21  ;;  %s3196_s20 = scalar_lea.hbm %s3195_s19, 128 }
 0x4ad   : > { %2662 = vrot.lane.b32.xlu1 %v4073_v0, %s3275_s21  ;;  %v2688_v0 = vrot.slane %v3804_v21, 3  ;;  %p3197_p11 = scmp.ne.s32.totalorder %s3195_s19, %s3196_s20 }
 0x4ae   : > { %v2553_v50 = vpop.permute.xlu0 %2552  ;;  %v2501_v51 = vpop.permute.xlu2 %2500 }
 0x4af   : > { %2576 = vst.msk [vmem:[%s3900_s23 + $0x9] sm:$0x1] %vm2210_vm1, %v2553_v50  ;;  %v2617_v15 = vpop.permute.xlu1 %2616  ;;  %v2704_v2 = vperm.slane %v2688_v0, 1  ;;  %v2703_v8 = vperm.slane %v2688_v0, 0  ;;  %v2405_v50 = vperm.slane %v2386_v43, 0  ;;  %p3198_p12 = pnand %p3197_p11, %p3363_p5 }
 0x4b0   : > { %2640 = vst.msk [vmem:[%s3900_s23 + $0xb] sm:$0x1] %vm2210_vm1, %v2617_v15 }
 0x4b1   : > { %2518 = vst.msk [vmem:[%s3900_s23 + $0x67] sm:$0x1] %vm2210_vm1, %v2501_v51  ;;  %v2407_v51 = vperm.slane %v2388_v46, 0  ;;  %p3199_p13 = pneg %p3198_p12 }
 0x4b4   : > { %2654 = vrot.lane.b32.xlu0 %v4024_v47, %s3275_s21  ;;  %2658 = vrot.lane.b32.xlu2 %v4026_v48, %s3275_s21  ;;  %v2402_v47 = vperm.slane %v3761_v10, 1  ;;  %v2699_v48 = vperm.slane %v2684_v56, 0  ;;  %v2701_v10 = vperm.slane %v2686_v18, 0 }
 0x4b5   : > { %2417 = vrot.lane.b32.xlu1 %v2401_v52, %s3277_s10  ;;  %v2391_v52 = vrot.slane %v3842_v32, 4 }
 0x4b6   : > { %v2649_v39 = vpop.permute.xlu0 %2648  ;;  %v2523_v53 = vpop.permute.xlu2 %2522 }
 0x4b7   : > { %2672 = vst.msk [vmem:[%s3900_s23 + $0xc] sm:$0x1] %vm2210_vm1, %v2649_v39  ;;  %v2493_v55 = vpop.permute.xlu1 %2492  ;;  %v2409_v39 = vperm.slane %v2391_v52, 0 }
 0x4b8   : > { %2514 = vst.msk [vmem:[%s3900_s23 + $0x27] sm:$0x1] %vm2210_vm1, %v2493_v55  ;;  %v2410_v55 = vperm.slane %v2391_v52, 1 }
 0x4b9   : > { %2545 = vst.msk [vmem:[%s3900_s23 + $0x18] sm:$0x1] %vm2210_vm1, %v2523_v53  ;;  %v2408_v53 = vperm.slane %v2388_v46, 1 }
 0x4bc   : > { %2660 = vrot.lane.b32.xlu0 %v4043_v54, %s3275_s21  ;;  %2419 = vrot.lane.b32.xlu2 %v2402_v47, %s3277_s10  ;;  %v2700_v54 = vperm.slane %v2684_v56, 1  ;;  %v2394_v47 = vrot.slane %v3847_v35, 5 }
 0x4bd   : > { %2717 = vrot.lane.b32.xlu1 %v2699_v48, %s3276_s24 }
 0x4be   : > { %v2716_v57 = vpop.permute.xlu0 %2715  ;;  %v2529_v58 = vpop.permute.xlu2 %2528  ;;  %v2411_v18 = vperm.slane %v2394_v47, 0 }
 0x4bf   : > { %v2746_v61 = vsel %vm2745_vm2, %v2714_v42, %v2716_v57  ;;  %v2499_v44 = vpop.permute.xlu1 %2498  ;;  %2548 = vst.msk [vmem:[%s3900_s23 + $0x48] sm:$0x1] %vm2210_vm1, %v2529_v58  ;;  %v2397_v57 = vrot.slane %v3854_v36, 6  ;;  %v2412_v58 = vperm.slane %v2394_v47, 1 }
 0x4c0   : > { %2762 = vst.msk [vmem:[%s3900_s23 + $0xd] sm:$0x1] %vm2210_vm1, %v2746_v61 }
 0x4c1   : > { %2517 = vst.msk [vmem:[%s3900_s23 + $0x57] sm:$0x1] %vm2210_vm1, %v2499_v44  ;;  %v2413_v61 = vperm.slane %v2397_v57, 0 }
 0x4c4   : > { %2721 = vrot.lane.b32.xlu0 %v2701_v10, %s3276_s24  ;;  %2719 = vrot.lane.b32.xlu2 %v2700_v54, %s3276_s24  ;;  %v2400_v10 = vrot.slane %v3859_v37, 7 }
 0x4c5   : > { %2723 = vrot.lane.b32.xlu1 %v2702_v62, %s3276_s24  ;;  %v2414_v62 = vperm.slane %v2397_v57, 1 }
 0x4c6   : > { %v2491_v19 = vpop.permute.xlu0 %2490  ;;  %v2535_v63 = vpop.permute.xlu2 %2534  ;;  %v2415_v54 = vperm.slane %v2400_v10, 0 }
 0x4c7   : > { %2513 = vst.msk [vmem:[%s3900_s23 + $0x17] sm:$0x1] %vm2210_vm1, %v2491_v19  ;;  %v2527_v33 = vpop.permute.xlu1 %2526  ;;  %v2416_v19 = vperm.slane %v2400_v10, 1 }
 0x4c8   : > { %2547 = vst.msk [vmem:[%s3900_s23 + $0x38] sm:$0x1] %vm2210_vm1, %v2527_v33 }
 0x4c9   : > { %2551 = vst.msk [vmem:[%s3900_s23 + $0x78] sm:$0x1] %vm2210_vm1, %v2535_v63 }
 0x4cc   : > { %2727 = vrot.lane.b32.xlu0 %v2704_v2, %s3276_s24  ;;  %2725 = vrot.lane.b32.xlu2 %v2703_v8, %s3276_s24 }
 0x4cd   : > { %2729 = vrot.lane.b32.xlu1 %v2705_v3, %s3276_s24 }
 0x4ce   : > { %v2497_v21 = vpop.permute.xlu0 %2496  ;;  %v2557_v7 = vpop.permute.xlu2 %2556 }
 0x4cf   : > { %2516 = vst.msk [vmem:[%s3900_s23 + $0x47] sm:$0x1] %vm2210_vm1, %v2497_v21  ;;  %v2533_v22 = vpop.permute.xlu1 %2532 }
 0x4d0   : > { %2550 = vst.msk [vmem:[%s3900_s23 + $0x68] sm:$0x1] %vm2210_vm1, %v2533_v22 }
 0x4d1   : > { %2578 = vst.msk [vmem:[%s3900_s23 + $0x29] sm:$0x1] %vm2210_vm1, %v2557_v7 }
 0x4d4   : > { %2733 = vrot.lane.b32.xlu0 %v2707_v12, %s3276_s24  ;;  %2731 = vrot.lane.b32.xlu2 %v2706_v13, %s3276_s24 }
 0x4d5   : > { %2735 = vrot.lane.b32.xlu1 %v2708_v14, %s3276_s24 }
 0x4d6   : > { %v2503_v16 = vpop.permute.xlu0 %2502  ;;  %v2563_v23 = vpop.permute.xlu2 %2562 }
 0x4d7   : > { %2519 = vst.msk [vmem:[%s3900_s23 + $0x77] sm:$0x1] %vm2210_vm1, %v2503_v16  ;;  %v2555_v20 = vpop.permute.xlu1 %2554 }
 0x4d8   : > { %2577 = vst.msk [vmem:[%s3900_s23 + $0x19] sm:$0x1] %vm2210_vm1, %v2555_v20 }
 0x4d9   : > { %2581 = vst.msk [vmem:[%s3900_s23 + $0x59] sm:$0x1] %vm2210_vm1, %v2563_v23 }
 0x4dc   : > { %2739 = vrot.lane.b32.xlu0 %v2710_v26, %s3276_s24  ;;  %2737 = vrot.lane.b32.xlu2 %v2709_v27, %s3276_s24 }
 0x4dd   : > { %2741 = vrot.lane.b32.xlu1 %v2711_v30, %s3276_s24 }
 0x4de   : > { %v2525_v24 = vpop.permute.xlu0 %2524  ;;  %v2591_v31 = vpop.permute.xlu2 %2590 }
 0x4df   : > { %2546 = vst.msk [vmem:[%s3900_s23 + $0x28] sm:$0x1] %vm2210_vm1, %v2525_v24  ;;  %v2561_v28 = vpop.permute.xlu1 %2560 }
 0x4e0   : > { %2580 = vst.msk [vmem:[%s3900_s23 + $0x49] sm:$0x1] %vm2210_vm1, %v2561_v28 }
 0x4e1   : > { %2611 = vst.msk [vmem:[%s3900_s23 + $0x3a] sm:$0x1] %vm2210_vm1, %v2591_v31 }
 0x4e4   : > { %2421 = vrot.lane.b32.xlu0 %v2403_v38, %s3277_s10  ;;  %2743 = vrot.lane.b32.xlu2 %v2712_v40, %s3276_s24 }
 0x4e5   : > { %2423 = vrot.lane.b32.xlu1 %v2404_v41, %s3277_s10 }
 0x4e6   : > { %v2531_v42 = vpop.permute.xlu0 %2530  ;;  %v2597_v59 = vpop.permute.xlu2 %2596 }
 0x4e7   : > { %2549 = vst.msk [vmem:[%s3900_s23 + $0x58] sm:$0x1] %vm2210_vm1, %v2531_v42  ;;  %v2567_v45 = vpop.permute.xlu1 %2566 }
 0x4e8   : > { %2583 = vst.msk [vmem:[%s3900_s23 + $0x79] sm:$0x1] %vm2210_vm1, %v2567_v45 }
 0x4e9   : > { %2614 = vst.msk [vmem:[%s3900_s23 + $0x6a] sm:$0x1] %vm2210_vm1, %v2597_v59 }
 0x4ec   : > { %2427 = vrot.lane.b32.xlu0 %v2406_v49, %s3277_s10  ;;  %2425 = vrot.lane.b32.xlu2 %v2405_v50, %s3277_s10 }
 0x4ed   : > { %2429 = vrot.lane.b32.xlu1 %v2407_v51, %s3277_s10 }
 0x4ee   : > { %v2559_v60 = vpop.permute.xlu0 %2558  ;;  %v2619_v15 = vpop.permute.xlu2 %2618 }
 0x4ef   : > { %2579 = vst.msk [vmem:[%s3900_s23 + $0x39] sm:$0x1] %vm2210_vm1, %v2559_v60  ;;  %v2589_v29 = vpop.permute.xlu1 %2588 }
 0x4f0   : > { %2610 = vst.msk [vmem:[%s3900_s23 + $0x2a] sm:$0x1] %vm2210_vm1, %v2589_v29 }
 0x4f1   : > { %2641 = vst.msk [vmem:[%s3900_s23 + $0x1b] sm:$0x1] %vm2210_vm1, %v2619_v15 }
 0x4f4   : > { %2433 = vrot.lane.b32.xlu0 %v2409_v39, %s3277_s10  ;;  %2431 = vrot.lane.b32.xlu2 %v2408_v53, %s3277_s10 }
 0x4f5   : > { %2435 = vrot.lane.b32.xlu1 %v2410_v55, %s3277_s10 }
 0x4f6   : > { %v2565_v56 = vpop.permute.xlu0 %2564  ;;  %v2625_v32 = vpop.permute.xlu2 %2624 }
 0x4f7   : > { %2582 = vst.msk [vmem:[%s3900_s23 + $0x69] sm:$0x1] %vm2210_vm1, %v2565_v56  ;;  %v2595_v48 = vpop.permute.xlu1 %2594 }
 0x4f8   : > { %2613 = vst.msk [vmem:[%s3900_s23 + $0x5a] sm:$0x1] %vm2210_vm1, %v2595_v48 }
 0x4f9   : > { %2644 = vst.msk [vmem:[%s3900_s23 + $0x4b] sm:$0x1] %vm2210_vm1, %v2625_v32 }
 0x4fc   : > { %2439 = vrot.lane.b32.xlu0 %v2412_v58, %s3277_s10  ;;  %2437 = vrot.lane.b32.xlu2 %v2411_v18, %s3277_s10 }
 0x4fd   : > { %2441 = vrot.lane.b32.xlu1 %v2413_v61, %s3277_s10 }
 0x4fe   : > { %v2587_v35 = vpop.permute.xlu0 %2586  ;;  %v2631_v44 = vpop.permute.xlu2 %2630 }
 0x4ff   : > { %2609 = vst.msk [vmem:[%s3900_s23 + $0x1a] sm:$0x1] %vm2210_vm1, %v2587_v35  ;;  %v2623_v36 = vpop.permute.xlu1 %2622 }
 0x500   : > { %2643 = vst.msk [vmem:[%s3900_s23 + $0x3b] sm:$0x1] %vm2210_vm1, %v2623_v36 }
 0x501   : > { %2647 = vst.msk [vmem:[%s3900_s23 + $0x7b] sm:$0x1] %vm2210_vm1, %v2631_v44 }
 0x504   : > { %2445 = vrot.lane.b32.xlu0 %v2415_v54, %s3277_s10  ;;  %2443 = vrot.lane.b32.xlu2 %v2414_v62, %s3277_s10 }
 0x505   : > { %2447 = vrot.lane.b32.xlu1 %v2416_v19, %s3277_s10  ;;  %s3200_s10 = scalar_lea.hbm %s4430_s8, 256 }
 0x506   : > { %v2593_v37 = vpop.permute.xlu0 %2592  ;;  %v2653_v63 = vpop.permute.xlu2 %2652  ;;  %p3202_p1 = scmp.lt.s32.totalorder %s3200_s10, %s3196_s20 }
 0x507   : > { %2612 = vst.msk [vmem:[%s3900_s23 + $0x4a] sm:$0x1] %vm2210_vm1, %v2593_v37  ;;  %v2629_v0 = vpop.permute.xlu1 %2628 }
 0x508   : > { %2646 = vst.msk [vmem:[%s3900_s23 + $0x6b] sm:$0x1] %vm2210_vm1, %v2629_v0  ;;  %p3203_p2 = por %p3202_p1, %p3201_p0 }
 0x509   : > { %2674 = vst.msk [vmem:[%s3900_s23 + $0x2c] sm:$0x1] %vm2210_vm1, %v2653_v63 }
 0x50a   : > { %p3204_p3 = pnand %p3203_p2, %p3199_p13 }
 0x50c   : > { %2830 = vrot.lane.b32.xlu0 %v2783_v6, %s3269_s12  ;;  %2828 = vrot.lane.b32.xlu2 %v3961_v4, %s3269_s12 }
 0x50d   : > { %2826 = vrot.lane.b32.xlu1 %v3963_v5, %s3269_s12 }
 0x50e   : > { %v2599_v33 = vpop.permute.xlu0 %2598  ;;  %v2659_v1 = vpop.permute.xlu2 %2658 }
 0x50f   : > { %2615 = vst.msk [vmem:[%s3900_s23 + $0x7a] sm:$0x1] %vm2210_vm1, %v2599_v33  ;;  %v2651_v2 = vpop.permute.xlu1 %2650 }
 0x510   : > { %2673 = vst.msk [vmem:[%s3900_s23 + $0x1c] sm:$0x1] %vm2210_vm1, %v2651_v2 }
 0x511   : > { %2677 = vst.msk [vmem:[%s3900_s23 + $0x5c] sm:$0x1] %vm2210_vm1, %v2659_v1 }
 0x516   : > { %v2621_v11 = vpop.permute.xlu0 %2620  ;;  %v2420_v6 = vpop.permute.xlu2 %2419 }
 0x517   : > { %2642 = vst.msk [vmem:[%s3900_s23 + $0x2b] sm:$0x1] %vm2210_vm1, %v2621_v11  ;;  %v2657_v4 = vpop.permute.xlu1 %2656 }
 0x518   : > { %2676 = vst.msk [vmem:[%s3900_s23 + $0x4c] sm:$0x1] %vm2210_vm1, %v2657_v4 }
 0x51e   : > { %v2627_v5 = vpop.permute.xlu0 %2626  ;;  %v2720_v8 = vpop.permute.xlu2 %2719 }
 0x51f   : > { %2645 = vst.msk [vmem:[%s3900_s23 + $0x5b] sm:$0x1] %vm2210_vm1, %v2627_v5  ;;  %v2663_v3 = vpop.permute.xlu1 %2662 }
 0x520   : > { %2679 = vst.msk [vmem:[%s3900_s23 + $0x7c] sm:$0x1] %vm2210_vm1, %v2663_v3 }
 0x526   : > { %v2655_v21 = vpop.permute.xlu0 %2654  ;;  %v2726_v7 = vpop.permute.xlu2 %2725 }
 0x527   : > { %2675 = vst.msk [vmem:[%s3900_s23 + $0x3c] sm:$0x1] %vm2210_vm1, %v2655_v21  ;;  %v2418_v9 = vpop.permute.xlu1 %2417 }
 0x528   : > { %v2450_v22 = vsel %vm2449_vm12, %v2418_v9, %v2420_v6 }
 0x529   : > { %2466 = vst.msk [vmem:[%s3900_s23 + $0x6] sm:$0x1] %vm2210_vm1, %v2450_v22 }
 0x52e   : > { %v2661_v12 = vpop.permute.xlu0 %2660  ;;  %v2732_v13 = vpop.permute.xlu2 %2731 }
 0x52f   : > { %2678 = vst.msk [vmem:[%s3900_s23 + $0x6c] sm:$0x1] %vm2210_vm1, %v2661_v12  ;;  %v2718_v14 = vpop.permute.xlu1 %2717 }
 0x530   : > { %v2747_v16 = vsel %vm2745_vm2, %v2718_v14, %v2720_v8 }
 0x531   : > { %2763 = vst.msk [vmem:[%s3900_s23 + $0x1d] sm:$0x1] %vm2210_vm1, %v2747_v16 }
 0x536   : > { %v2722_v23 = vpop.permute.xlu0 %2721  ;;  %v2738_v17 = vpop.permute.xlu2 %2737 }
 0x537   : > { %v2724_v20 = vpop.permute.xlu1 %2723 }
 0x538   : > { %v2748_v25 = vsel %vm2745_vm2, %v2722_v23, %v2724_v20 }
 0x539   : > { %2764 = vst.msk [vmem:[%s3900_s23 + $0x2d] sm:$0x1] %vm2210_vm1, %v2748_v25 }
 0x53e   : > { %v2728_v26 = vpop.permute.xlu0 %2727  ;;  %v2744_v27 = vpop.permute.xlu2 %2743 }
 0x53f   : > { %v2749_v30 = vsel %vm2745_vm2, %v2726_v7, %v2728_v26  ;;  %v2730_v24 = vpop.permute.xlu1 %2729 }
 0x540   : > { %2765 = vst.msk [vmem:[%s3900_s23 + $0x3d] sm:$0x1] %vm2210_vm1, %v2749_v30  ;;  %v2750_v31 = vsel %vm2745_vm2, %v2730_v24, %v2732_v13 }
 0x541   : > { %2766 = vst.msk [vmem:[%s3900_s23 + $0x4d] sm:$0x1] %vm2210_vm1, %v2750_v31 }
 0x546   : > { %v2734_v34 = vpop.permute.xlu0 %2733  ;;  %v2426_v28 = vpop.permute.xlu2 %2425 }
 0x547   : > { %v2736_v38 = vpop.permute.xlu1 %2735 }
 0x548   : > { %v2751_v40 = vsel %vm2745_vm2, %v2734_v34, %v2736_v38 }
 0x549   : > { %2767 = vst.msk [vmem:[%s3900_s23 + $0x5d] sm:$0x1] %vm2210_vm1, %v2751_v40 }
 0x54e   : > { %v2740_v41 = vpop.permute.xlu0 %2739  ;;  %v2432_v42 = vpop.permute.xlu2 %2431 }
 0x54f   : > { %v2752_v59 = vsel %vm2745_vm2, %v2738_v17, %v2740_v41  ;;  %v2742_v43 = vpop.permute.xlu1 %2741 }
 0x550   : > { %2768 = vst.msk [vmem:[%s3900_s23 + $0x6d] sm:$0x1] %vm2210_vm1, %v2752_v59  ;;  %v2753_v45 = vsel %vm2745_vm2, %v2742_v43, %v2744_v27 }
 0x551   : > { %2769 = vst.msk [vmem:[%s3900_s23 + $0x7d] sm:$0x1] %vm2210_vm1, %v2753_v45 }
 0x556   : > { %v2422_v46 = vpop.permute.xlu0 %2421  ;;  %v2438_v49 = vpop.permute.xlu2 %2437 }
 0x557   : > { %v2424_v50 = vpop.permute.xlu1 %2423 }
 0x558   : > { %v2451_v51 = vsel %vm2449_vm12, %v2422_v46, %v2424_v50 }
 0x559   : > { %2467 = vst.msk [vmem:[%s3900_s23 + $0x16] sm:$0x1] %vm2210_vm1, %v2451_v51 }
 0x55e   : > { %v2428_v60 = vpop.permute.xlu0 %2427  ;;  %v2444_v15 = vpop.permute.xlu2 %2443 }
 0x55f   : > { %v2452_v52 = vsel %vm2449_vm12, %v2426_v28, %v2428_v60  ;;  %v2430_v29 = vpop.permute.xlu1 %2429 }
 0x560   : > { %2468 = vst.msk [vmem:[%s3900_s23 + $0x26] sm:$0x1] %vm2210_vm1, %v2452_v52  ;;  %v2453_v39 = vsel %vm2449_vm12, %v2430_v29, %v2432_v42 }
 0x561   : > { %2469 = vst.msk [vmem:[%s3900_s23 + $0x36] sm:$0x1] %vm2210_vm1, %v2453_v39 }
 0x566   : > { %v2434_v53 = vpop.permute.xlu0 %2433  ;;  %v2829_v55 = vpop.permute.xlu2 %2828 }
 0x567   : > { %v2436_v56 = vpop.permute.xlu1 %2435  ;;  %2846 = vst.msk [vmem:[%s3900_s23 + $0x6f] sm:$0x1] %vm2210_vm1, %v2829_v55 }
 0x568   : > { %v2454_v32 = vsel %vm2449_vm12, %v2434_v53, %v2436_v56 }
 0x569   : > { %2470 = vst.msk [vmem:[%s3900_s23 + $0x46] sm:$0x1] %vm2210_vm1, %v2454_v32 }
 0x56e   : > { %v2440_v47 = vpop.permute.xlu0 %2439 }
 0x56f   : > { %v2455_v48 = vsel %vm2449_vm12, %v2438_v49, %v2440_v47  ;;  %v2442_v57 = vpop.permute.xlu1 %2441 }
 0x570   : > { %2471 = vst.msk [vmem:[%s3900_s23 + $0x56] sm:$0x1] %vm2210_vm1, %v2455_v48  ;;  %v2456_v58 = vsel %vm2449_vm12, %v2442_v57, %v2444_v15 }
 0x571   : > { %2472 = vst.msk [vmem:[%s3900_s23 + $0x66] sm:$0x1] %vm2210_vm1, %v2456_v58 }
 0x576   : > { %v2446_v18 = vpop.permute.xlu0 %2445 }
 0x577   : > { %v2448_v61 = vpop.permute.xlu1 %2447 }
 0x578   : > { %v2457_v35 = vsel %vm2449_vm12, %v2446_v18, %v2448_v61 }
 0x579   : > { %2473 = vst.msk [vmem:[%s3900_s23 + $0x76] sm:$0x1] %vm2210_vm1, %v2457_v35 }
 0x57e   : > { %v2831_v44 = vpop.permute.xlu0 %2830 }
 0x57f   : > { %2847 = vst.msk [vmem:[%s3900_s23 + $0x7f] sm:$0x1] %vm2210_vm1, %v2831_v44  ;;  %v2827_v10 = vpop.permute.xlu1 %2826 }
 0x580   : > { %2845 = vst.msk [vmem:[%s3900_s23 + $0x5f] sm:$0x1] %vm2210_vm1, %v2827_v10 }
 0x581   : > { %3207 = shalt.err (!%p3204_p3)
}
 0x582   : > { %s3278_s26 = smov 128   ;;  %s3279_s23 = smov 8  }
 0x583   : > { %3013 = dma.vmem_to_hbm [thread:$0]  (%p3363_p5), %s2862_s18, 2048, %s2864_s17, %s2849_s9, %s3278_s26, %s3278_s26, %s3279_s23  }
 0x584 PF: > { %p3019_p4 = scmp.ge.s32.totalorder %s3242_s30, 2  ;;  %s2878_s12 = sand.u32 1, %s3230_s27  }
 0x585   : > { %s2879_s13 = scalar_lea.sflag [#allocation5], %s2878_s12 }
 0x586   : > { %p3016_p7 = pnand %p3019_p4, %p3367_p6 }
 0x588   : > { %p3017_p8 = pneg %p3016_p7 }
 0x58a   : > { %3225 = dma.done.wait (%p3017_p8), %s2879_s13, 2048  }
 0x58b   : > { %3227 = vsyncadd (%p3017_p8), %s2879_s13, 4294965248  ;;  %p18_p9 = scmp.ge.s32.totalorder %s3350_s11, 4   ;;  %s4436_s27 = smov %s3234_s28 }
 0x58c   : > { %s4437_s28 = smov %s3238_s29  ;;  %s4438_s29 = smov %s3361_s14 }
 0x58d   : > { %s4439_s30 = smov %s3350_s11  ;;  %20 = sbr.rel (!%p18_p9) target bundleno = 3 (0x3), region = 103 }
 0x592   :  { %2885 = vsyncpa [#allocation5], 1 }
 0x593   :  { %2887 = vsyncpa [#allocation5 + $0x1], 1 }

</bundles_post_ra>
